<compile_context>
chip_gen: v7x
topology: tpu7x:2x2x1
jax: 0.10.0
libtpu: 0.0.40
codegen_flags: <defaults>
</compile_context>

<pallas_src>
import numpy as np

import jax
import jax.numpy as jnp
from jax.experimental import pallas as pl
from jax.experimental.pallas import tpu as pltpu

OUT_ROWS = 8  # padded sublane height of the batched tail / output block


# ----------------------------------------------------------------------------
# Weight packing (init-time, hoisted out of the forward pass)
# ----------------------------------------------------------------------------
def _pack_conv(w_oihw, bias, *, w_in, row_pad, col_block):
    """Pack a KxK conv into K banded matmul slabs.

    Input rows  : r = w*Cin + c               (the [H, W*Cin] image layout)
    Output cols : col = dx*col_block + xx*Cout + o, where x_out = 2*xx + dx
                  (pool-friendly: horizontal 2x2-pool = max of the two blocks)
    """
    c_out, c_in, k, _ = w_oihw.shape
    w_out = w_in - k + 1
    band = np.zeros((k, row_pad, 2 * col_block), np.float32)
    brow = np.zeros((1, 2 * col_block), np.float32)
    for i in range(k):
        for x in range(w_out):
            xx, dx = divmod(x, 2)
            col0 = dx * col_block + xx * c_out
            for j in range(k):
                r0 = (x + j) * c_in
                band[i, r0:r0 + c_in, col0:col0 + c_out] = w_oihw[:, :, i, j].T
    for x in range(w_out):
        xx, dx = divmod(x, 2)
        col0 = dx * col_block + xx * c_out
        brow[0, col0:col0 + c_out] = bias
    return band, brow


def init_params():
    """Deterministic synthetic init (PyTorch-like uniform bounds), pre-packed
    into the exact layouts the fused kernel consumes."""
    key = jax.random.PRNGKey(42)
    ks = jax.random.split(key, 10)

    def u(k, shape, fan_in):
        bound = float(1.0 / np.sqrt(fan_in))
        return np.asarray(jax.random.uniform(k, shape, jnp.float32, -bound, bound))

    conv1_w = u(ks[0], (6, 3, 5, 5), 3 * 25)
    conv1_b = u(ks[1], (6,), 3 * 25)
    conv2_w = u(ks[2], (16, 6, 5, 5), 6 * 25)
    conv2_b = u(ks[3], (16,), 6 * 25)
    fc1_w = u(ks[4], (400, 120), 400)
    fc1_b = u(ks[5], (120,), 400)
    fc2_w = u(ks[6], (120, 84), 120)
    fc2_b = u(ks[7], (84,), 120)
    bn_g = np.ones((84,), np.float32)
    bn_b = np.zeros((84,), np.float32)
    fc3_w = u(ks[8], (84, 10), 84)
    fc3_b = u(ks[9], (10,), 84)

    # conv1: input [32, 32*3=96] -> acc [28, 2*128]; conv2: [14, 128] -> [10, 2*128]
    w1_band, b1_row = _pack_conv(conv1_w, conv1_b, w_in=32, row_pad=96, col_block=128)
    w2_band, b2_row = _pack_conv(conv2_w, conv2_b, w_in=14, row_pad=128, col_block=128)

    # fc1: pooled2 layout is [y, x*16 + c]; PyTorch view(-1,400) order is c*25+y*5+x.
    fc1_wp = np.zeros((5, 128, 128), np.float32)
    for y in range(5):
        for x in range(5):
            for c in range(16):
                fc1_wp[y, x * 16 + c, :120] = fc1_w[c * 25 + y * 5 + x, :]

    fc2_wp = np.zeros((128, 128), np.float32)
    fc2_wp[:120, :84] = fc2_w
    fc3_wp = np.zeros((128, 128), np.float32)   # lane-dense fc3 (cols 10..127 = 0)
    fc3_wp[:84, :10] = fc3_w

    # ---- single [8, 256] slab for all bias / BN-affine rows --------------
    # row 0: conv1 bias (pool-packed, 256)   row 1: conv2 bias (256)
    # row 2: fc1 bias   row 3: fc2 bias   row 4: bn gamma   row 5: bn beta
    # row 6: fc3 bias (padded to 128 lanes)  row 7: unused
    bias_slab = np.zeros((8, 256), np.float32)
    bias_slab[0, :] = b1_row[0]
    bias_slab[1, :] = b2_row[0]
    bias_slab[2, :120] = fc1_b
    bias_slab[3, :84] = fc2_b
    bias_slab[4, :84] = bn_g
    bias_slab[5, :84] = bn_b
    bias_slab[6, :10] = fc3_b

    # ---- single [16, 128] slab for the 0/1 vertical-pool selectors -------
    # e1 = sel[0:14, 0:28], o1 = sel[0:14, 32:60]   (pool1: 28 rows -> 14)
    # e2 = sel[0:5, 64:74], o2 = sel[0:5, 96:106]   (pool2: 10 rows -> 5)
    sel_slab = np.zeros((16, 128), np.float32)
    for r in range(14):
        sel_slab[r, 2 * r] = 1.0
        sel_slab[r, 32 + 2 * r + 1] = 1.0
    for r in range(5):
        sel_slab[r, 64 + 2 * r] = 1.0
        sel_slab[r, 96 + 2 * r + 1] = 1.0

    packed = dict(
        w1_band=w1_band, w2_band=w2_band,
        fc1_wp=fc1_wp, fc2_wp=fc2_wp, fc3_wp=fc3_wp,
        bias_slab=bias_slab, sel_slab=sel_slab,
    )
    return {k: jnp.asarray(v) for k, v in packed.items()}


# ----------------------------------------------------------------------------
# Fused forward kernel: ONE grid step, batch unrolled, batched BN/fc3 tail.
# ----------------------------------------------------------------------------
def _cnn_kernel(x_ref, w1_ref, w2_ref, fc1w_ref, fc2w_ref, fc3w_ref,
                bias_ref, sel_ref, out_ref):
    f32 = jnp.float32
    n_img = x_ref.shape[0]

    # ---- hoisted constants: one load each, reused for every image --------
    bias = bias_ref[...]                                   # [8, 256]
    b1 = bias[0:1, :]                                      # [1, 256]
    b2 = bias[1:2, :]                                      # [1, 256]
    fc1_b = bias[2:3, 0:128]                               # [1, 128]
    fc2_b = bias[3:4, 0:128]
    gamma = bias[4:5, 0:128]
    beta = bias[5:6, 0:128]
    fc3_b = bias[6:7, 0:128]

    sel = sel_ref[...]                                     # [16, 128]
    e1 = sel[0:14, 0:28]
    o1 = sel[0:14, 32:60]
    e2 = sel[0:5, 64:74]
    o2 = sel[0:5, 96:106]

    fc1_rows = []
    for b in range(n_img):                                 # unrolled batch
        x = x_ref[b]                                       # [32, 96] = [H, W*Cin]

        # conv1 + bias + ReLU : 5 banded matmuls, cols = (dx | xx*6+o) x 128
        acc1 = jnp.dot(x[0:28, :], w1_ref[0], preferred_element_type=f32)
        for i in range(1, 5):
            acc1 = acc1 + jnp.dot(x[i:i + 28, :], w1_ref[i],
                                  preferred_element_type=f32)
        acc1 = jnp.maximum(acc1 + b1, 0.0)                 # [28, 256]

        # pool1: horizontal = aligned column-half max; vertical = selector dots
        h1 = jnp.maximum(acc1[:, 0:128], acc1[:, 128:256])  # [28, 128]
        p1 = jnp.maximum(jnp.dot(e1, h1, preferred_element_type=f32),
                         jnp.dot(o1, h1, preferred_element_type=f32))  # [14,128]

        # conv2 + bias + ReLU
        acc2 = jnp.dot(p1[0:10, :], w2_ref[0], preferred_element_type=f32)
        for i in range(1, 5):
            acc2 = acc2 + jnp.dot(p1[i:i + 10, :], w2_ref[i],
                                  preferred_element_type=f32)
        acc2 = jnp.maximum(acc2 + b2, 0.0)                 # [10, 256]

        # pool2
        h2 = jnp.maximum(acc2[:, 0:128], acc2[:, 128:256])  # [10, 128]
        p2 = jnp.maximum(jnp.dot(e2, h2, preferred_element_type=f32),
                         jnp.dot(o2, h2, preferred_element_type=f32))  # [5, 128]

        # fc1 + ReLU : 5 row-dots against per-row weight slabs (flatten fused)
        f1 = jnp.dot(p2[0:1, :], fc1w_ref[0], preferred_element_type=f32)
        for y in range(1, 5):
            f1 = f1 + jnp.dot(p2[y:y + 1, :], fc1w_ref[y],
                              preferred_element_type=f32)
        fc1_rows.append(jnp.maximum(f1 + fc1_b, 0.0))      # [1, 128]

    # ---- assemble the batched [8,128] activation (rows >= n_img are zero) ----
    row_ids = jax.lax.broadcasted_iota(jnp.int32, (OUT_ROWS, 128), 0)
    f1_all = jnp.zeros((OUT_ROWS, 128), f32)
    for b in range(n_img):
        f1_all = jnp.where(row_ids == b,
                           jnp.broadcast_to(fc1_rows[b], (OUT_ROWS, 128)),
                           f1_all)

    # ---- fc2 (batched) -----------------------------------------------------
    f2_all = jnp.dot(f1_all, fc2w_ref[...], preferred_element_type=f32) + fc2_b

    # ---- BatchNorm1d (training-mode batch stats, biased var) + ReLU --------
    f2_valid = f2_all[0:n_img, :]                          # stats over real rows only
    mean = jnp.mean(f2_valid, axis=0, keepdims=True)
    var = jnp.mean((f2_valid - mean) ** 2, axis=0, keepdims=True)
    xn = (f2_all - mean) * jax.lax.rsqrt(var + 1e-5)
    y_act = jnp.maximum(xn * gamma + beta, 0.0)            # [8, 128]

    # ---- fc3 (batched, lane-dense 128-wide output) -------------------------
    out_ref[...] = (jnp.dot(y_act, fc3w_ref[...], preferred_element_type=f32)
                    + fc3_b)


def _full(shape):
    nd = len(shape)
    return pl.BlockSpec(tuple(shape), lambda *_: (0,) * nd)


def cnn_forward(params, x_nchw):
    b, c, h, w = x_nchw.shape
    assert (c, h, w) == (3, 32, 32), (c, h, w)
    assert 1 <= b <= OUT_ROWS, b
    # Only glue: NCHW -> per-image [H, W*Cin] layout (2 cheap XLA ops).
    x = jnp.transpose(x_nchw, (0, 2, 3, 1)).reshape(b, h, w * c)

    p = params
    operands = [x, p["w1_band"], p["w2_band"], p["fc1_wp"], p["fc2_wp"],
                p["fc3_wp"], p["bias_slab"], p["sel_slab"]]

    out = pl.pallas_call(
        _cnn_kernel,
        grid=(1,),
        in_specs=[_full(a.shape) for a in operands],
        out_specs=_full((OUT_ROWS, 128)),
        out_shape=jax.ShapeDtypeStruct((OUT_ROWS, 128), jnp.float32),
        compiler_params=pltpu.CompilerParams(
            dimension_semantics=("arbitrary",)),
    )(*operands)
    return out[:b, :10]


if __name__ == "__main__":
    params = init_params()
    x = jax.random.normal(jax.random.PRNGKey(0), (2, 3, 32, 32), jnp.float32)
    out = jax.jit(cnn_forward)(params, x)
    out = jax.block_until_ready(out)
    assert out.shape == (2, 10), out.shape
    assert bool(jnp.all(jnp.isfinite(out))), "non-finite output"
    print("KERNEL_OK")
</pallas_src>

<mosaic_0001>
module attributes {stable_mosaic.version = 11 : i64} {
  func.func @_cnn_kernel(%arg0: i32, %arg1: memref<2x32x96xf32, #tpu.memory_space<vmem>>, %arg2: memref<5x96x256xf32, #tpu.memory_space<vmem>>, %arg3: memref<5x128x256xf32, #tpu.memory_space<vmem>>, %arg4: memref<5x128x128xf32, #tpu.memory_space<vmem>>, %arg5: memref<128x128xf32, #tpu.memory_space<vmem>>, %arg6: memref<128x128xf32, #tpu.memory_space<vmem>>, %arg7: memref<8x256xf32, #tpu.memory_space<vmem>>, %arg8: memref<16x128xf32, #tpu.memory_space<vmem>>, %arg9: memref<8x128xf32, #tpu.memory_space<vmem>>) attributes {dimension_semantics = [#tpu.dimension_semantics<arbitrary>], iteration_bounds = array<i64: 1>, scalar_prefetch = 0 : i64, scratch_operands = 0 : i64, tpu.core_type = #tpu.core_type<tc>, window_params = [{pipeline_mode = #tpu.pipeline_mode<synchronous>, transform_indices = @transform_0, window_bounds = array<i64: 2, 32, 96>}, {pipeline_mode = #tpu.pipeline_mode<synchronous>, transform_indices = @transform_1, window_bounds = array<i64: 5, 96, 256>}, {pipeline_mode = #tpu.pipeline_mode<synchronous>, transform_indices = @transform_2, window_bounds = array<i64: 5, 128, 256>}, {pipeline_mode = #tpu.pipeline_mode<synchronous>, transform_indices = @transform_3, window_bounds = array<i64: 5, 128, 128>}, {pipeline_mode = #tpu.pipeline_mode<synchronous>, transform_indices = @transform_4, window_bounds = array<i64: 128, 128>}, {pipeline_mode = #tpu.pipeline_mode<synchronous>, transform_indices = @transform_5, window_bounds = array<i64: 128, 128>}, {pipeline_mode = #tpu.pipeline_mode<synchronous>, transform_indices = @transform_6, window_bounds = array<i64: 8, 256>}, {pipeline_mode = #tpu.pipeline_mode<synchronous>, transform_indices = @transform_7, window_bounds = array<i64: 16, 128>}, {pipeline_mode = #tpu.pipeline_mode<synchronous>, transform_indices = @transform_8, window_bounds = array<i64: 8, 128>}]} {
    %c0 = arith.constant 0 : index
    %c0_0 = arith.constant 0 : index
    %0 = vector.load %arg7[%c0, %c0_0] : memref<8x256xf32, #tpu.memory_space<vmem>>, vector<8x256xf32>
    %1 = vector.extract_strided_slice %0 {offsets = [0, 0], sizes = [1, 256], strides = [1, 1]} : vector<8x256xf32> to vector<1x256xf32>
    %2 = vector.extract_strided_slice %0 {offsets = [1, 0], sizes = [1, 256], strides = [1, 1]} : vector<8x256xf32> to vector<1x256xf32>
    %3 = vector.extract_strided_slice %0 {offsets = [2, 0], sizes = [1, 128], strides = [1, 1]} : vector<8x256xf32> to vector<1x128xf32>
    %4 = vector.extract_strided_slice %0 {offsets = [3, 0], sizes = [1, 128], strides = [1, 1]} : vector<8x256xf32> to vector<1x128xf32>
    %5 = vector.extract_strided_slice %0 {offsets = [4, 0], sizes = [1, 128], strides = [1, 1]} : vector<8x256xf32> to vector<1x128xf32>
    %6 = vector.extract_strided_slice %0 {offsets = [5, 0], sizes = [1, 128], strides = [1, 1]} : vector<8x256xf32> to vector<1x128xf32>
    %7 = vector.extract_strided_slice %0 {offsets = [6, 0], sizes = [1, 128], strides = [1, 1]} : vector<8x256xf32> to vector<1x128xf32>
    %c0_1 = arith.constant 0 : index
    %c0_2 = arith.constant 0 : index
    %8 = vector.load %arg8[%c0_1, %c0_2] : memref<16x128xf32, #tpu.memory_space<vmem>>, vector<16x128xf32>
    %9 = vector.extract_strided_slice %8 {offsets = [0, 0], sizes = [14, 28], strides = [1, 1]} : vector<16x128xf32> to vector<14x28xf32>
    %10 = vector.extract_strided_slice %8 {offsets = [0, 32], sizes = [14, 28], strides = [1, 1]} : vector<16x128xf32> to vector<14x28xf32>
    %11 = vector.extract_strided_slice %8 {offsets = [0, 64], sizes = [5, 10], strides = [1, 1]} : vector<16x128xf32> to vector<5x10xf32>
    %12 = vector.extract_strided_slice %8 {offsets = [0, 96], sizes = [5, 10], strides = [1, 1]} : vector<16x128xf32> to vector<5x10xf32>
    %c0_3 = arith.constant 0 : index
    %c0_4 = arith.constant 0 : index
    %c0_5 = arith.constant 0 : index
    %13 = vector.load %arg1[%c0_3, %c0_4, %c0_5] : memref<2x32x96xf32, #tpu.memory_space<vmem>>, vector<1x32x96xf32>
    %14 = vector.shape_cast %13 : vector<1x32x96xf32> to vector<32x96xf32>
    %15 = vector.extract_strided_slice %14 {offsets = [0, 0], sizes = [28, 96], strides = [1, 1]} : vector<32x96xf32> to vector<28x96xf32>
    %c0_6 = arith.constant 0 : index
    %c0_7 = arith.constant 0 : index
    %c0_8 = arith.constant 0 : index
    %16 = vector.load %arg2[%c0_6, %c0_7, %c0_8] : memref<5x96x256xf32, #tpu.memory_space<vmem>>, vector<1x96x256xf32>
    %17 = vector.shape_cast %16 : vector<1x96x256xf32> to vector<96x256xf32>
    %cst = arith.constant dense<0.000000e+00> : vector<28x256xf32>
    %18 = tpu.matmul %15, %17, %cst {dimension_numbers = #tpu.dot_dimension_numbers<[1], [0], [0], [1], [0, 0, 1, 1], [], []>} : vector<28x96xf32>, vector<96x256xf32>, vector<28x256xf32> -> vector<28x256xf32>
    %19 = vector.extract_strided_slice %14 {offsets = [1, 0], sizes = [28, 96], strides = [1, 1]} : vector<32x96xf32> to vector<28x96xf32>
    %c1 = arith.constant 1 : index
    %c0_9 = arith.constant 0 : index
    %c0_10 = arith.constant 0 : index
    %20 = vector.load %arg2[%c1, %c0_9, %c0_10] : memref<5x96x256xf32, #tpu.memory_space<vmem>>, vector<1x96x256xf32>
    %21 = vector.shape_cast %20 : vector<1x96x256xf32> to vector<96x256xf32>
    %cst_11 = arith.constant dense<0.000000e+00> : vector<28x256xf32>
    %22 = tpu.matmul %19, %21, %cst_11 {dimension_numbers = #tpu.dot_dimension_numbers<[1], [0], [0], [1], [0, 0, 1, 1], [], []>} : vector<28x96xf32>, vector<96x256xf32>, vector<28x256xf32> -> vector<28x256xf32>
    %23 = arith.addf %18, %22 : vector<28x256xf32>
    %24 = vector.extract_strided_slice %14 {offsets = [2, 0], sizes = [28, 96], strides = [1, 1]} : vector<32x96xf32> to vector<28x96xf32>
    %c2 = arith.constant 2 : index
    %c0_12 = arith.constant 0 : index
    %c0_13 = arith.constant 0 : index
    %25 = vector.load %arg2[%c2, %c0_12, %c0_13] : memref<5x96x256xf32, #tpu.memory_space<vmem>>, vector<1x96x256xf32>
    %26 = vector.shape_cast %25 : vector<1x96x256xf32> to vector<96x256xf32>
    %cst_14 = arith.constant dense<0.000000e+00> : vector<28x256xf32>
    %27 = tpu.matmul %24, %26, %cst_14 {dimension_numbers = #tpu.dot_dimension_numbers<[1], [0], [0], [1], [0, 0, 1, 1], [], []>} : vector<28x96xf32>, vector<96x256xf32>, vector<28x256xf32> -> vector<28x256xf32>
    %28 = arith.addf %23, %27 : vector<28x256xf32>
    %29 = vector.extract_strided_slice %14 {offsets = [3, 0], sizes = [28, 96], strides = [1, 1]} : vector<32x96xf32> to vector<28x96xf32>
    %c3 = arith.constant 3 : index
    %c0_15 = arith.constant 0 : index
    %c0_16 = arith.constant 0 : index
    %30 = vector.load %arg2[%c3, %c0_15, %c0_16] : memref<5x96x256xf32, #tpu.memory_space<vmem>>, vector<1x96x256xf32>
    %31 = vector.shape_cast %30 : vector<1x96x256xf32> to vector<96x256xf32>
    %cst_17 = arith.constant dense<0.000000e+00> : vector<28x256xf32>
    %32 = tpu.matmul %29, %31, %cst_17 {dimension_numbers = #tpu.dot_dimension_numbers<[1], [0], [0], [1], [0, 0, 1, 1], [], []>} : vector<28x96xf32>, vector<96x256xf32>, vector<28x256xf32> -> vector<28x256xf32>
    %33 = arith.addf %28, %32 : vector<28x256xf32>
    %34 = vector.extract_strided_slice %14 {offsets = [4, 0], sizes = [28, 96], strides = [1, 1]} : vector<32x96xf32> to vector<28x96xf32>
    %c4 = arith.constant 4 : index
    %c0_18 = arith.constant 0 : index
    %c0_19 = arith.constant 0 : index
    %35 = vector.load %arg2[%c4, %c0_18, %c0_19] : memref<5x96x256xf32, #tpu.memory_space<vmem>>, vector<1x96x256xf32>
    %36 = vector.shape_cast %35 : vector<1x96x256xf32> to vector<96x256xf32>
    %cst_20 = arith.constant dense<0.000000e+00> : vector<28x256xf32>
    %37 = tpu.matmul %34, %36, %cst_20 {dimension_numbers = #tpu.dot_dimension_numbers<[1], [0], [0], [1], [0, 0, 1, 1], [], []>} : vector<28x96xf32>, vector<96x256xf32>, vector<28x256xf32> -> vector<28x256xf32>
    %38 = arith.addf %33, %37 : vector<28x256xf32>
    %39 = vector.broadcast %1 : vector<1x256xf32> to vector<28x256xf32>
    %40 = arith.addf %38, %39 : vector<28x256xf32>
    %cst_21 = arith.constant 0.000000e+00 : f32
    %41 = vector.broadcast %cst_21 : f32 to vector<28x256xf32>
    %42 = arith.maximumf %40, %41 : vector<28x256xf32>
    %43 = vector.extract_strided_slice %42 {offsets = [0, 0], sizes = [28, 128], strides = [1, 1]} : vector<28x256xf32> to vector<28x128xf32>
    %44 = vector.extract_strided_slice %42 {offsets = [0, 128], sizes = [28, 128], strides = [1, 1]} : vector<28x256xf32> to vector<28x128xf32>
    %45 = arith.maximumf %43, %44 : vector<28x128xf32>
    %cst_22 = arith.constant dense<0.000000e+00> : vector<14x128xf32>
    %46 = tpu.matmul %9, %45, %cst_22 {dimension_numbers = #tpu.dot_dimension_numbers<[1], [0], [0], [1], [0, 0, 1, 1], [], []>} : vector<14x28xf32>, vector<28x128xf32>, vector<14x128xf32> -> vector<14x128xf32>
    %cst_23 = arith.constant dense<0.000000e+00> : vector<14x128xf32>
    %47 = tpu.matmul %10, %45, %cst_23 {dimension_numbers = #tpu.dot_dimension_numbers<[1], [0], [0], [1], [0, 0, 1, 1], [], []>} : vector<14x28xf32>, vector<28x128xf32>, vector<14x128xf32> -> vector<14x128xf32>
    %48 = arith.maximumf %46, %47 : vector<14x128xf32>
    %49 = vector.extract_strided_slice %48 {offsets = [0, 0], sizes = [10, 128], strides = [1, 1]} : vector<14x128xf32> to vector<10x128xf32>
    %c0_24 = arith.constant 0 : index
    %c0_25 = arith.constant 0 : index
    %c0_26 = arith.constant 0 : index
    %50 = vector.load %arg3[%c0_24, %c0_25, %c0_26] : memref<5x128x256xf32, #tpu.memory_space<vmem>>, vector<1x128x256xf32>
    %51 = vector.shape_cast %50 : vector<1x128x256xf32> to vector<128x256xf32>
    %cst_27 = arith.constant dense<0.000000e+00> : vector<10x256xf32>
    %52 = tpu.matmul %49, %51, %cst_27 {dimension_numbers = #tpu.dot_dimension_numbers<[1], [0], [0], [1], [0, 0, 1, 1], [], []>} : vector<10x128xf32>, vector<128x256xf32>, vector<10x256xf32> -> vector<10x256xf32>
    %53 = vector.extract_strided_slice %48 {offsets = [1, 0], sizes = [10, 128], strides = [1, 1]} : vector<14x128xf32> to vector<10x128xf32>
    %c1_28 = arith.constant 1 : index
    %c0_29 = arith.constant 0 : index
    %c0_30 = arith.constant 0 : index
    %54 = vector.load %arg3[%c1_28, %c0_29, %c0_30] : memref<5x128x256xf32, #tpu.memory_space<vmem>>, vector<1x128x256xf32>
    %55 = vector.shape_cast %54 : vector<1x128x256xf32> to vector<128x256xf32>
    %cst_31 = arith.constant dense<0.000000e+00> : vector<10x256xf32>
    %56 = tpu.matmul %53, %55, %cst_31 {dimension_numbers = #tpu.dot_dimension_numbers<[1], [0], [0], [1], [0, 0, 1, 1], [], []>} : vector<10x128xf32>, vector<128x256xf32>, vector<10x256xf32> -> vector<10x256xf32>
    %57 = arith.addf %52, %56 : vector<10x256xf32>
    %58 = vector.extract_strided_slice %48 {offsets = [2, 0], sizes = [10, 128], strides = [1, 1]} : vector<14x128xf32> to vector<10x128xf32>
    %c2_32 = arith.constant 2 : index
    %c0_33 = arith.constant 0 : index
    %c0_34 = arith.constant 0 : index
    %59 = vector.load %arg3[%c2_32, %c0_33, %c0_34] : memref<5x128x256xf32, #tpu.memory_space<vmem>>, vector<1x128x256xf32>
    %60 = vector.shape_cast %59 : vector<1x128x256xf32> to vector<128x256xf32>
    %cst_35 = arith.constant dense<0.000000e+00> : vector<10x256xf32>
    %61 = tpu.matmul %58, %60, %cst_35 {dimension_numbers = #tpu.dot_dimension_numbers<[1], [0], [0], [1], [0, 0, 1, 1], [], []>} : vector<10x128xf32>, vector<128x256xf32>, vector<10x256xf32> -> vector<10x256xf32>
    %62 = arith.addf %57, %61 : vector<10x256xf32>
    %63 = vector.extract_strided_slice %48 {offsets = [3, 0], sizes = [10, 128], strides = [1, 1]} : vector<14x128xf32> to vector<10x128xf32>
    %c3_36 = arith.constant 3 : index
    %c0_37 = arith.constant 0 : index
    %c0_38 = arith.constant 0 : index
    %64 = vector.load %arg3[%c3_36, %c0_37, %c0_38] : memref<5x128x256xf32, #tpu.memory_space<vmem>>, vector<1x128x256xf32>
    %65 = vector.shape_cast %64 : vector<1x128x256xf32> to vector<128x256xf32>
    %cst_39 = arith.constant dense<0.000000e+00> : vector<10x256xf32>
    %66 = tpu.matmul %63, %65, %cst_39 {dimension_numbers = #tpu.dot_dimension_numbers<[1], [0], [0], [1], [0, 0, 1, 1], [], []>} : vector<10x128xf32>, vector<128x256xf32>, vector<10x256xf32> -> vector<10x256xf32>
    %67 = arith.addf %62, %66 : vector<10x256xf32>
    %68 = vector.extract_strided_slice %48 {offsets = [4, 0], sizes = [10, 128], strides = [1, 1]} : vector<14x128xf32> to vector<10x128xf32>
    %c4_40 = arith.constant 4 : index
    %c0_41 = arith.constant 0 : index
    %c0_42 = arith.constant 0 : index
    %69 = vector.load %arg3[%c4_40, %c0_41, %c0_42] : memref<5x128x256xf32, #tpu.memory_space<vmem>>, vector<1x128x256xf32>
    %70 = vector.shape_cast %69 : vector<1x128x256xf32> to vector<128x256xf32>
    %cst_43 = arith.constant dense<0.000000e+00> : vector<10x256xf32>
    %71 = tpu.matmul %68, %70, %cst_43 {dimension_numbers = #tpu.dot_dimension_numbers<[1], [0], [0], [1], [0, 0, 1, 1], [], []>} : vector<10x128xf32>, vector<128x256xf32>, vector<10x256xf32> -> vector<10x256xf32>
    %72 = arith.addf %67, %71 : vector<10x256xf32>
    %73 = vector.broadcast %2 : vector<1x256xf32> to vector<10x256xf32>
    %74 = arith.addf %72, %73 : vector<10x256xf32>
    %cst_44 = arith.constant 0.000000e+00 : f32
    %75 = vector.broadcast %cst_44 : f32 to vector<10x256xf32>
    %76 = arith.maximumf %74, %75 : vector<10x256xf32>
    %77 = vector.extract_strided_slice %76 {offsets = [0, 0], sizes = [10, 128], strides = [1, 1]} : vector<10x256xf32> to vector<10x128xf32>
    %78 = vector.extract_strided_slice %76 {offsets = [0, 128], sizes = [10, 128], strides = [1, 1]} : vector<10x256xf32> to vector<10x128xf32>
    %79 = arith.maximumf %77, %78 : vector<10x128xf32>
    %cst_45 = arith.constant dense<0.000000e+00> : vector<5x128xf32>
    %80 = tpu.matmul %11, %79, %cst_45 {dimension_numbers = #tpu.dot_dimension_numbers<[1], [0], [0], [1], [0, 0, 1, 1], [], []>} : vector<5x10xf32>, vector<10x128xf32>, vector<5x128xf32> -> vector<5x128xf32>
    %cst_46 = arith.constant dense<0.000000e+00> : vector<5x128xf32>
    %81 = tpu.matmul %12, %79, %cst_46 {dimension_numbers = #tpu.dot_dimension_numbers<[1], [0], [0], [1], [0, 0, 1, 1], [], []>} : vector<5x10xf32>, vector<10x128xf32>, vector<5x128xf32> -> vector<5x128xf32>
    %82 = arith.maximumf %80, %81 : vector<5x128xf32>
    %83 = vector.extract_strided_slice %82 {offsets = [0, 0], sizes = [1, 128], strides = [1, 1]} : vector<5x128xf32> to vector<1x128xf32>
    %c0_47 = arith.constant 0 : index
    %c0_48 = arith.constant 0 : index
    %c0_49 = arith.constant 0 : index
    %84 = vector.load %arg4[%c0_47, %c0_48, %c0_49] : memref<5x128x128xf32, #tpu.memory_space<vmem>>, vector<1x128x128xf32>
    %85 = vector.shape_cast %84 : vector<1x128x128xf32> to vector<128x128xf32>
    %cst_50 = arith.constant dense<0.000000e+00> : vector<1x128xf32>
    %86 = tpu.matmul %83, %85, %cst_50 {dimension_numbers = #tpu.dot_dimension_numbers<[1], [0], [0], [1], [0, 0, 1, 1], [], []>} : vector<1x128xf32>, vector<128x128xf32>, vector<1x128xf32> -> vector<1x128xf32>
    %87 = vector.extract_strided_slice %82 {offsets = [1, 0], sizes = [1, 128], strides = [1, 1]} : vector<5x128xf32> to vector<1x128xf32>
    %c1_51 = arith.constant 1 : index
    %c0_52 = arith.constant 0 : index
    %c0_53 = arith.constant 0 : index
    %88 = vector.load %arg4[%c1_51, %c0_52, %c0_53] : memref<5x128x128xf32, #tpu.memory_space<vmem>>, vector<1x128x128xf32>
    %89 = vector.shape_cast %88 : vector<1x128x128xf32> to vector<128x128xf32>
    %cst_54 = arith.constant dense<0.000000e+00> : vector<1x128xf32>
    %90 = tpu.matmul %87, %89, %cst_54 {dimension_numbers = #tpu.dot_dimension_numbers<[1], [0], [0], [1], [0, 0, 1, 1], [], []>} : vector<1x128xf32>, vector<128x128xf32>, vector<1x128xf32> -> vector<1x128xf32>
    %91 = arith.addf %86, %90 : vector<1x128xf32>
    %92 = vector.extract_strided_slice %82 {offsets = [2, 0], sizes = [1, 128], strides = [1, 1]} : vector<5x128xf32> to vector<1x128xf32>
    %c2_55 = arith.constant 2 : index
    %c0_56 = arith.constant 0 : index
    %c0_57 = arith.constant 0 : index
    %93 = vector.load %arg4[%c2_55, %c0_56, %c0_57] : memref<5x128x128xf32, #tpu.memory_space<vmem>>, vector<1x128x128xf32>
    %94 = vector.shape_cast %93 : vector<1x128x128xf32> to vector<128x128xf32>
    %cst_58 = arith.constant dense<0.000000e+00> : vector<1x128xf32>
    %95 = tpu.matmul %92, %94, %cst_58 {dimension_numbers = #tpu.dot_dimension_numbers<[1], [0], [0], [1], [0, 0, 1, 1], [], []>} : vector<1x128xf32>, vector<128x128xf32>, vector<1x128xf32> -> vector<1x128xf32>
    %96 = arith.addf %91, %95 : vector<1x128xf32>
    %97 = vector.extract_strided_slice %82 {offsets = [3, 0], sizes = [1, 128], strides = [1, 1]} : vector<5x128xf32> to vector<1x128xf32>
    %c3_59 = arith.constant 3 : index
    %c0_60 = arith.constant 0 : index
    %c0_61 = arith.constant 0 : index
    %98 = vector.load %arg4[%c3_59, %c0_60, %c0_61] : memref<5x128x128xf32, #tpu.memory_space<vmem>>, vector<1x128x128xf32>
    %99 = vector.shape_cast %98 : vector<1x128x128xf32> to vector<128x128xf32>
    %cst_62 = arith.constant dense<0.000000e+00> : vector<1x128xf32>
    %100 = tpu.matmul %97, %99, %cst_62 {dimension_numbers = #tpu.dot_dimension_numbers<[1], [0], [0], [1], [0, 0, 1, 1], [], []>} : vector<1x128xf32>, vector<128x128xf32>, vector<1x128xf32> -> vector<1x128xf32>
    %101 = arith.addf %96, %100 : vector<1x128xf32>
    %102 = vector.extract_strided_slice %82 {offsets = [4, 0], sizes = [1, 128], strides = [1, 1]} : vector<5x128xf32> to vector<1x128xf32>
    %c4_63 = arith.constant 4 : index
    %c0_64 = arith.constant 0 : index
    %c0_65 = arith.constant 0 : index
    %103 = vector.load %arg4[%c4_63, %c0_64, %c0_65] : memref<5x128x128xf32, #tpu.memory_space<vmem>>, vector<1x128x128xf32>
    %104 = vector.shape_cast %103 : vector<1x128x128xf32> to vector<128x128xf32>
    %cst_66 = arith.constant dense<0.000000e+00> : vector<1x128xf32>
    %105 = tpu.matmul %102, %104, %cst_66 {dimension_numbers = #tpu.dot_dimension_numbers<[1], [0], [0], [1], [0, 0, 1, 1], [], []>} : vector<1x128xf32>, vector<128x128xf32>, vector<1x128xf32> -> vector<1x128xf32>
    %106 = arith.addf %101, %105 : vector<1x128xf32>
    %107 = arith.addf %106, %3 : vector<1x128xf32>
    %cst_67 = arith.constant 0.000000e+00 : f32
    %108 = vector.broadcast %cst_67 : f32 to vector<1x128xf32>
    %109 = arith.maximumf %107, %108 : vector<1x128xf32>
    %c1_68 = arith.constant 1 : index
    %c0_69 = arith.constant 0 : index
    %c0_70 = arith.constant 0 : index
    %110 = vector.load %arg1[%c1_68, %c0_69, %c0_70] : memref<2x32x96xf32, #tpu.memory_space<vmem>>, vector<1x32x96xf32>
    %111 = vector.shape_cast %110 : vector<1x32x96xf32> to vector<32x96xf32>
    %112 = vector.extract_strided_slice %111 {offsets = [0, 0], sizes = [28, 96], strides = [1, 1]} : vector<32x96xf32> to vector<28x96xf32>
    %c0_71 = arith.constant 0 : index
    %c0_72 = arith.constant 0 : index
    %c0_73 = arith.constant 0 : index
    %113 = vector.load %arg2[%c0_71, %c0_72, %c0_73] : memref<5x96x256xf32, #tpu.memory_space<vmem>>, vector<1x96x256xf32>
    %114 = vector.shape_cast %113 : vector<1x96x256xf32> to vector<96x256xf32>
    %cst_74 = arith.constant dense<0.000000e+00> : vector<28x256xf32>
    %115 = tpu.matmul %112, %114, %cst_74 {dimension_numbers = #tpu.dot_dimension_numbers<[1], [0], [0], [1], [0, 0, 1, 1], [], []>} : vector<28x96xf32>, vector<96x256xf32>, vector<28x256xf32> -> vector<28x256xf32>
    %116 = vector.extract_strided_slice %111 {offsets = [1, 0], sizes = [28, 96], strides = [1, 1]} : vector<32x96xf32> to vector<28x96xf32>
    %c1_75 = arith.constant 1 : index
    %c0_76 = arith.constant 0 : index
    %c0_77 = arith.constant 0 : index
    %117 = vector.load %arg2[%c1_75, %c0_76, %c0_77] : memref<5x96x256xf32, #tpu.memory_space<vmem>>, vector<1x96x256xf32>
    %118 = vector.shape_cast %117 : vector<1x96x256xf32> to vector<96x256xf32>
    %cst_78 = arith.constant dense<0.000000e+00> : vector<28x256xf32>
    %119 = tpu.matmul %116, %118, %cst_78 {dimension_numbers = #tpu.dot_dimension_numbers<[1], [0], [0], [1], [0, 0, 1, 1], [], []>} : vector<28x96xf32>, vector<96x256xf32>, vector<28x256xf32> -> vector<28x256xf32>
    %120 = arith.addf %115, %119 : vector<28x256xf32>
    %121 = vector.extract_strided_slice %111 {offsets = [2, 0], sizes = [28, 96], strides = [1, 1]} : vector<32x96xf32> to vector<28x96xf32>
    %c2_79 = arith.constant 2 : index
    %c0_80 = arith.constant 0 : index
    %c0_81 = arith.constant 0 : index
    %122 = vector.load %arg2[%c2_79, %c0_80, %c0_81] : memref<5x96x256xf32, #tpu.memory_space<vmem>>, vector<1x96x256xf32>
    %123 = vector.shape_cast %122 : vector<1x96x256xf32> to vector<96x256xf32>
    %cst_82 = arith.constant dense<0.000000e+00> : vector<28x256xf32>
    %124 = tpu.matmul %121, %123, %cst_82 {dimension_numbers = #tpu.dot_dimension_numbers<[1], [0], [0], [1], [0, 0, 1, 1], [], []>} : vector<28x96xf32>, vector<96x256xf32>, vector<28x256xf32> -> vector<28x256xf32>
    %125 = arith.addf %120, %124 : vector<28x256xf32>
    %126 = vector.extract_strided_slice %111 {offsets = [3, 0], sizes = [28, 96], strides = [1, 1]} : vector<32x96xf32> to vector<28x96xf32>
    %c3_83 = arith.constant 3 : index
    %c0_84 = arith.constant 0 : index
    %c0_85 = arith.constant 0 : index
    %127 = vector.load %arg2[%c3_83, %c0_84, %c0_85] : memref<5x96x256xf32, #tpu.memory_space<vmem>>, vector<1x96x256xf32>
    %128 = vector.shape_cast %127 : vector<1x96x256xf32> to vector<96x256xf32>
    %cst_86 = arith.constant dense<0.000000e+00> : vector<28x256xf32>
    %129 = tpu.matmul %126, %128, %cst_86 {dimension_numbers = #tpu.dot_dimension_numbers<[1], [0], [0], [1], [0, 0, 1, 1], [], []>} : vector<28x96xf32>, vector<96x256xf32>, vector<28x256xf32> -> vector<28x256xf32>
    %130 = arith.addf %125, %129 : vector<28x256xf32>
    %131 = vector.extract_strided_slice %111 {offsets = [4, 0], sizes = [28, 96], strides = [1, 1]} : vector<32x96xf32> to vector<28x96xf32>
    %c4_87 = arith.constant 4 : index
    %c0_88 = arith.constant 0 : index
    %c0_89 = arith.constant 0 : index
    %132 = vector.load %arg2[%c4_87, %c0_88, %c0_89] : memref<5x96x256xf32, #tpu.memory_space<vmem>>, vector<1x96x256xf32>
    %133 = vector.shape_cast %132 : vector<1x96x256xf32> to vector<96x256xf32>
    %cst_90 = arith.constant dense<0.000000e+00> : vector<28x256xf32>
    %134 = tpu.matmul %131, %133, %cst_90 {dimension_numbers = #tpu.dot_dimension_numbers<[1], [0], [0], [1], [0, 0, 1, 1], [], []>} : vector<28x96xf32>, vector<96x256xf32>, vector<28x256xf32> -> vector<28x256xf32>
    %135 = arith.addf %130, %134 : vector<28x256xf32>
    %136 = vector.broadcast %1 : vector<1x256xf32> to vector<28x256xf32>
    %137 = arith.addf %135, %136 : vector<28x256xf32>
    %cst_91 = arith.constant 0.000000e+00 : f32
    %138 = vector.broadcast %cst_91 : f32 to vector<28x256xf32>
    %139 = arith.maximumf %137, %138 : vector<28x256xf32>
    %140 = vector.extract_strided_slice %139 {offsets = [0, 0], sizes = [28, 128], strides = [1, 1]} : vector<28x256xf32> to vector<28x128xf32>
    %141 = vector.extract_strided_slice %139 {offsets = [0, 128], sizes = [28, 128], strides = [1, 1]} : vector<28x256xf32> to vector<28x128xf32>
    %142 = arith.maximumf %140, %141 : vector<28x128xf32>
    %cst_92 = arith.constant dense<0.000000e+00> : vector<14x128xf32>
    %143 = tpu.matmul %9, %142, %cst_92 {dimension_numbers = #tpu.dot_dimension_numbers<[1], [0], [0], [1], [0, 0, 1, 1], [], []>} : vector<14x28xf32>, vector<28x128xf32>, vector<14x128xf32> -> vector<14x128xf32>
    %cst_93 = arith.constant dense<0.000000e+00> : vector<14x128xf32>
    %144 = tpu.matmul %10, %142, %cst_93 {dimension_numbers = #tpu.dot_dimension_numbers<[1], [0], [0], [1], [0, 0, 1, 1], [], []>} : vector<14x28xf32>, vector<28x128xf32>, vector<14x128xf32> -> vector<14x128xf32>
    %145 = arith.maximumf %143, %144 : vector<14x128xf32>
    %146 = vector.extract_strided_slice %145 {offsets = [0, 0], sizes = [10, 128], strides = [1, 1]} : vector<14x128xf32> to vector<10x128xf32>
    %c0_94 = arith.constant 0 : index
    %c0_95 = arith.constant 0 : index
    %c0_96 = arith.constant 0 : index
    %147 = vector.load %arg3[%c0_94, %c0_95, %c0_96] : memref<5x128x256xf32, #tpu.memory_space<vmem>>, vector<1x128x256xf32>
    %148 = vector.shape_cast %147 : vector<1x128x256xf32> to vector<128x256xf32>
    %cst_97 = arith.constant dense<0.000000e+00> : vector<10x256xf32>
    %149 = tpu.matmul %146, %148, %cst_97 {dimension_numbers = #tpu.dot_dimension_numbers<[1], [0], [0], [1], [0, 0, 1, 1], [], []>} : vector<10x128xf32>, vector<128x256xf32>, vector<10x256xf32> -> vector<10x256xf32>
    %150 = vector.extract_strided_slice %145 {offsets = [1, 0], sizes = [10, 128], strides = [1, 1]} : vector<14x128xf32> to vector<10x128xf32>
    %c1_98 = arith.constant 1 : index
    %c0_99 = arith.constant 0 : index
    %c0_100 = arith.constant 0 : index
    %151 = vector.load %arg3[%c1_98, %c0_99, %c0_100] : memref<5x128x256xf32, #tpu.memory_space<vmem>>, vector<1x128x256xf32>
    %152 = vector.shape_cast %151 : vector<1x128x256xf32> to vector<128x256xf32>
    %cst_101 = arith.constant dense<0.000000e+00> : vector<10x256xf32>
    %153 = tpu.matmul %150, %152, %cst_101 {dimension_numbers = #tpu.dot_dimension_numbers<[1], [0], [0], [1], [0, 0, 1, 1], [], []>} : vector<10x128xf32>, vector<128x256xf32>, vector<10x256xf32> -> vector<10x256xf32>
    %154 = arith.addf %149, %153 : vector<10x256xf32>
    %155 = vector.extract_strided_slice %145 {offsets = [2, 0], sizes = [10, 128], strides = [1, 1]} : vector<14x128xf32> to vector<10x128xf32>
    %c2_102 = arith.constant 2 : index
    %c0_103 = arith.constant 0 : index
    %c0_104 = arith.constant 0 : index
    %156 = vector.load %arg3[%c2_102, %c0_103, %c0_104] : memref<5x128x256xf32, #tpu.memory_space<vmem>>, vector<1x128x256xf32>
    %157 = vector.shape_cast %156 : vector<1x128x256xf32> to vector<128x256xf32>
    %cst_105 = arith.constant dense<0.000000e+00> : vector<10x256xf32>
    %158 = tpu.matmul %155, %157, %cst_105 {dimension_numbers = #tpu.dot_dimension_numbers<[1], [0], [0], [1], [0, 0, 1, 1], [], []>} : vector<10x128xf32>, vector<128x256xf32>, vector<10x256xf32> -> vector<10x256xf32>
    %159 = arith.addf %154, %158 : vector<10x256xf32>
    %160 = vector.extract_strided_slice %145 {offsets = [3, 0], sizes = [10, 128], strides = [1, 1]} : vector<14x128xf32> to vector<10x128xf32>
    %c3_106 = arith.constant 3 : index
    %c0_107 = arith.constant 0 : index
    %c0_108 = arith.constant 0 : index
    %161 = vector.load %arg3[%c3_106, %c0_107, %c0_108] : memref<5x128x256xf32, #tpu.memory_space<vmem>>, vector<1x128x256xf32>
    %162 = vector.shape_cast %161 : vector<1x128x256xf32> to vector<128x256xf32>
    %cst_109 = arith.constant dense<0.000000e+00> : vector<10x256xf32>
    %163 = tpu.matmul %160, %162, %cst_109 {dimension_numbers = #tpu.dot_dimension_numbers<[1], [0], [0], [1], [0, 0, 1, 1], [], []>} : vector<10x128xf32>, vector<128x256xf32>, vector<10x256xf32> -> vector<10x256xf32>
    %164 = arith.addf %159, %163 : vector<10x256xf32>
    %165 = vector.extract_strided_slice %145 {offsets = [4, 0], sizes = [10, 128], strides = [1, 1]} : vector<14x128xf32> to vector<10x128xf32>
    %c4_110 = arith.constant 4 : index
    %c0_111 = arith.constant 0 : index
    %c0_112 = arith.constant 0 : index
    %166 = vector.load %arg3[%c4_110, %c0_111, %c0_112] : memref<5x128x256xf32, #tpu.memory_space<vmem>>, vector<1x128x256xf32>
    %167 = vector.shape_cast %166 : vector<1x128x256xf32> to vector<128x256xf32>
    %cst_113 = arith.constant dense<0.000000e+00> : vector<10x256xf32>
    %168 = tpu.matmul %165, %167, %cst_113 {dimension_numbers = #tpu.dot_dimension_numbers<[1], [0], [0], [1], [0, 0, 1, 1], [], []>} : vector<10x128xf32>, vector<128x256xf32>, vector<10x256xf32> -> vector<10x256xf32>
    %169 = arith.addf %164, %168 : vector<10x256xf32>
    %170 = vector.broadcast %2 : vector<1x256xf32> to vector<10x256xf32>
    %171 = arith.addf %169, %170 : vector<10x256xf32>
    %cst_114 = arith.constant 0.000000e+00 : f32
    %172 = vector.broadcast %cst_114 : f32 to vector<10x256xf32>
    %173 = arith.maximumf %171, %172 : vector<10x256xf32>
    %174 = vector.extract_strided_slice %173 {offsets = [0, 0], sizes = [10, 128], strides = [1, 1]} : vector<10x256xf32> to vector<10x128xf32>
    %175 = vector.extract_strided_slice %173 {offsets = [0, 128], sizes = [10, 128], strides = [1, 1]} : vector<10x256xf32> to vector<10x128xf32>
    %176 = arith.maximumf %174, %175 : vector<10x128xf32>
    %cst_115 = arith.constant dense<0.000000e+00> : vector<5x128xf32>
    %177 = tpu.matmul %11, %176, %cst_115 {dimension_numbers = #tpu.dot_dimension_numbers<[1], [0], [0], [1], [0, 0, 1, 1], [], []>} : vector<5x10xf32>, vector<10x128xf32>, vector<5x128xf32> -> vector<5x128xf32>
    %cst_116 = arith.constant dense<0.000000e+00> : vector<5x128xf32>
    %178 = tpu.matmul %12, %176, %cst_116 {dimension_numbers = #tpu.dot_dimension_numbers<[1], [0], [0], [1], [0, 0, 1, 1], [], []>} : vector<5x10xf32>, vector<10x128xf32>, vector<5x128xf32> -> vector<5x128xf32>
    %179 = arith.maximumf %177, %178 : vector<5x128xf32>
    %180 = vector.extract_strided_slice %179 {offsets = [0, 0], sizes = [1, 128], strides = [1, 1]} : vector<5x128xf32> to vector<1x128xf32>
    %c0_117 = arith.constant 0 : index
    %c0_118 = arith.constant 0 : index
    %c0_119 = arith.constant 0 : index
    %181 = vector.load %arg4[%c0_117, %c0_118, %c0_119] : memref<5x128x128xf32, #tpu.memory_space<vmem>>, vector<1x128x128xf32>
    %182 = vector.shape_cast %181 : vector<1x128x128xf32> to vector<128x128xf32>
    %cst_120 = arith.constant dense<0.000000e+00> : vector<1x128xf32>
    %183 = tpu.matmul %180, %182, %cst_120 {dimension_numbers = #tpu.dot_dimension_numbers<[1], [0], [0], [1], [0, 0, 1, 1], [], []>} : vector<1x128xf32>, vector<128x128xf32>, vector<1x128xf32> -> vector<1x128xf32>
    %184 = vector.extract_strided_slice %179 {offsets = [1, 0], sizes = [1, 128], strides = [1, 1]} : vector<5x128xf32> to vector<1x128xf32>
    %c1_121 = arith.constant 1 : index
    %c0_122 = arith.constant 0 : index
    %c0_123 = arith.constant 0 : index
    %185 = vector.load %arg4[%c1_121, %c0_122, %c0_123] : memref<5x128x128xf32, #tpu.memory_space<vmem>>, vector<1x128x128xf32>
    %186 = vector.shape_cast %185 : vector<1x128x128xf32> to vector<128x128xf32>
    %cst_124 = arith.constant dense<0.000000e+00> : vector<1x128xf32>
    %187 = tpu.matmul %184, %186, %cst_124 {dimension_numbers = #tpu.dot_dimension_numbers<[1], [0], [0], [1], [0, 0, 1, 1], [], []>} : vector<1x128xf32>, vector<128x128xf32>, vector<1x128xf32> -> vector<1x128xf32>
    %188 = arith.addf %183, %187 : vector<1x128xf32>
    %189 = vector.extract_strided_slice %179 {offsets = [2, 0], sizes = [1, 128], strides = [1, 1]} : vector<5x128xf32> to vector<1x128xf32>
    %c2_125 = arith.constant 2 : index
    %c0_126 = arith.constant 0 : index
    %c0_127 = arith.constant 0 : index
    %190 = vector.load %arg4[%c2_125, %c0_126, %c0_127] : memref<5x128x128xf32, #tpu.memory_space<vmem>>, vector<1x128x128xf32>
    %191 = vector.shape_cast %190 : vector<1x128x128xf32> to vector<128x128xf32>
    %cst_128 = arith.constant dense<0.000000e+00> : vector<1x128xf32>
    %192 = tpu.matmul %189, %191, %cst_128 {dimension_numbers = #tpu.dot_dimension_numbers<[1], [0], [0], [1], [0, 0, 1, 1], [], []>} : vector<1x128xf32>, vector<128x128xf32>, vector<1x128xf32> -> vector<1x128xf32>
    %193 = arith.addf %188, %192 : vector<1x128xf32>
    %194 = vector.extract_strided_slice %179 {offsets = [3, 0], sizes = [1, 128], strides = [1, 1]} : vector<5x128xf32> to vector<1x128xf32>
    %c3_129 = arith.constant 3 : index
    %c0_130 = arith.constant 0 : index
    %c0_131 = arith.constant 0 : index
    %195 = vector.load %arg4[%c3_129, %c0_130, %c0_131] : memref<5x128x128xf32, #tpu.memory_space<vmem>>, vector<1x128x128xf32>
    %196 = vector.shape_cast %195 : vector<1x128x128xf32> to vector<128x128xf32>
    %cst_132 = arith.constant dense<0.000000e+00> : vector<1x128xf32>
    %197 = tpu.matmul %194, %196, %cst_132 {dimension_numbers = #tpu.dot_dimension_numbers<[1], [0], [0], [1], [0, 0, 1, 1], [], []>} : vector<1x128xf32>, vector<128x128xf32>, vector<1x128xf32> -> vector<1x128xf32>
    %198 = arith.addf %193, %197 : vector<1x128xf32>
    %199 = vector.extract_strided_slice %179 {offsets = [4, 0], sizes = [1, 128], strides = [1, 1]} : vector<5x128xf32> to vector<1x128xf32>
    %c4_133 = arith.constant 4 : index
    %c0_134 = arith.constant 0 : index
    %c0_135 = arith.constant 0 : index
    %200 = vector.load %arg4[%c4_133, %c0_134, %c0_135] : memref<5x128x128xf32, #tpu.memory_space<vmem>>, vector<1x128x128xf32>
    %201 = vector.shape_cast %200 : vector<1x128x128xf32> to vector<128x128xf32>
    %cst_136 = arith.constant dense<0.000000e+00> : vector<1x128xf32>
    %202 = tpu.matmul %199, %201, %cst_136 {dimension_numbers = #tpu.dot_dimension_numbers<[1], [0], [0], [1], [0, 0, 1, 1], [], []>} : vector<1x128xf32>, vector<128x128xf32>, vector<1x128xf32> -> vector<1x128xf32>
    %203 = arith.addf %198, %202 : vector<1x128xf32>
    %204 = arith.addf %203, %3 : vector<1x128xf32>
    %cst_137 = arith.constant 0.000000e+00 : f32
    %205 = vector.broadcast %cst_137 : f32 to vector<1x128xf32>
    %206 = arith.maximumf %204, %205 : vector<1x128xf32>
    %207 = tpu.iota {dimensions = array<i32: 0>} : vector<8x128xi32>
    %cst_138 = arith.constant 0.000000e+00 : f32
    %208 = vector.broadcast %cst_138 : f32 to vector<8x128xf32>
    %c0_i32 = arith.constant 0 : i32
    %209 = vector.broadcast %c0_i32 : i32 to vector<8x128xi32>
    %210 = arith.cmpi eq, %207, %209 : vector<8x128xi32>
    %211 = vector.shape_cast %109 : vector<1x128xf32> to vector<1x128xf32>
    %212 = vector.broadcast %211 : vector<1x128xf32> to vector<8x128xf32>
    %213 = arith.select %210, %212, %208 : vector<8x128xi1>, vector<8x128xf32>
    %c1_i32 = arith.constant 1 : i32
    %214 = vector.broadcast %c1_i32 : i32 to vector<8x128xi32>
    %215 = arith.cmpi eq, %207, %214 : vector<8x128xi32>
    %216 = vector.shape_cast %206 : vector<1x128xf32> to vector<1x128xf32>
    %217 = vector.broadcast %216 : vector<1x128xf32> to vector<8x128xf32>
    %218 = arith.select %215, %217, %213 : vector<8x128xi1>, vector<8x128xf32>
    %c0_139 = arith.constant 0 : index
    %c0_140 = arith.constant 0 : index
    %219 = vector.load %arg5[%c0_139, %c0_140] : memref<128x128xf32, #tpu.memory_space<vmem>>, vector<128x128xf32>
    %cst_141 = arith.constant dense<0.000000e+00> : vector<8x128xf32>
    %220 = tpu.matmul %218, %219, %cst_141 {dimension_numbers = #tpu.dot_dimension_numbers<[1], [0], [0], [1], [0, 0, 1, 1], [], []>} : vector<8x128xf32>, vector<128x128xf32>, vector<8x128xf32> -> vector<8x128xf32>
    %221 = vector.broadcast %4 : vector<1x128xf32> to vector<8x128xf32>
    %222 = arith.addf %220, %221 : vector<8x128xf32>
    %223 = vector.extract_strided_slice %222 {offsets = [0, 0], sizes = [2, 128], strides = [1, 1]} : vector<8x128xf32> to vector<2x128xf32>
    %cst_142 = arith.constant dense<0.000000e+00> : vector<128xf32>
    %224 = vector.multi_reduction <add>, %223, %cst_142 [0] : vector<2x128xf32> to vector<128xf32>
    %225 = vector.shape_cast %224 : vector<128xf32> to vector<1x128xf32>
    %cst_143 = arith.constant 2.000000e+00 : f32
    %226 = vector.broadcast %cst_143 : f32 to vector<1x128xf32>
    %227 = arith.divf %225, %226 : vector<1x128xf32>
    %228 = vector.broadcast %227 : vector<1x128xf32> to vector<2x128xf32>
    %229 = arith.subf %223, %228 : vector<2x128xf32>
    %230 = arith.mulf %229, %229 : vector<2x128xf32>
    %cst_144 = arith.constant dense<0.000000e+00> : vector<128xf32>
    %231 = vector.multi_reduction <add>, %230, %cst_144 [0] : vector<2x128xf32> to vector<128xf32>
    %232 = vector.shape_cast %231 : vector<128xf32> to vector<1x128xf32>
    %cst_145 = arith.constant 2.000000e+00 : f32
    %233 = vector.broadcast %cst_145 : f32 to vector<1x128xf32>
    %234 = arith.divf %232, %233 : vector<1x128xf32>
    %235 = vector.broadcast %227 : vector<1x128xf32> to vector<8x128xf32>
    %236 = arith.subf %222, %235 : vector<8x128xf32>
    %cst_146 = arith.constant 9.99999974E-6 : f32
    %237 = vector.broadcast %cst_146 : f32 to vector<1x128xf32>
    %238 = arith.addf %234, %237 : vector<1x128xf32>
    %239 = math.rsqrt %238 : vector<1x128xf32>
    %240 = vector.broadcast %239 : vector<1x128xf32> to vector<8x128xf32>
    %241 = arith.mulf %236, %240 : vector<8x128xf32>
    %242 = vector.broadcast %5 : vector<1x128xf32> to vector<8x128xf32>
    %243 = arith.mulf %241, %242 : vector<8x128xf32>
    %244 = vector.broadcast %6 : vector<1x128xf32> to vector<8x128xf32>
    %245 = arith.addf %243, %244 : vector<8x128xf32>
    %cst_147 = arith.constant 0.000000e+00 : f32
    %246 = vector.broadcast %cst_147 : f32 to vector<8x128xf32>
    %247 = arith.maximumf %245, %246 : vector<8x128xf32>
    %c0_148 = arith.constant 0 : index
    %c0_149 = arith.constant 0 : index
    %248 = vector.load %arg6[%c0_148, %c0_149] : memref<128x128xf32, #tpu.memory_space<vmem>>, vector<128x128xf32>
    %cst_150 = arith.constant dense<0.000000e+00> : vector<8x128xf32>
    %249 = tpu.matmul %247, %248, %cst_150 {dimension_numbers = #tpu.dot_dimension_numbers<[1], [0], [0], [1], [0, 0, 1, 1], [], []>} : vector<8x128xf32>, vector<128x128xf32>, vector<8x128xf32> -> vector<8x128xf32>
    %250 = vector.broadcast %7 : vector<1x128xf32> to vector<8x128xf32>
    %251 = arith.addf %249, %250 : vector<8x128xf32>
    %c0_151 = arith.constant 0 : index
    %c0_152 = arith.constant 0 : index
    %252 = vector.load %arg9[%c0_151, %c0_152] : memref<8x128xf32, #tpu.memory_space<vmem>>, vector<8x128xf32>
    tpu.vector_store %arg9[%c0_151, %c0_152], %251 {strides = array<i32>} : memref<8x128xf32, #tpu.memory_space<vmem>>, vector<8x128xf32>,
    return
  }
  func.func @transform_0(%arg0: i32) -> (i32, i32, i32) {
    %c0_i32 = arith.constant 0 : i32
    %c0_i32_0 = arith.constant 0 : i32
    %c0_i32_1 = arith.constant 0 : i32
    %c0_i32_2 = arith.constant 0 : i32
    return %c0_i32, %c0_i32_0, %c0_i32_1 : i32, i32, i32
  }
  func.func @transform_1(%arg0: i32) -> (i32, i32, i32) {
    %c0_i32 = arith.constant 0 : i32
    %c0_i32_0 = arith.constant 0 : i32
    %c0_i32_1 = arith.constant 0 : i32
    %c0_i32_2 = arith.constant 0 : i32
    return %c0_i32, %c0_i32_0, %c0_i32_1 : i32, i32, i32
  }
  func.func @transform_2(%arg0: i32) -> (i32, i32, i32) {
    %c0_i32 = arith.constant 0 : i32
    %c0_i32_0 = arith.constant 0 : i32
    %c0_i32_1 = arith.constant 0 : i32
    %c0_i32_2 = arith.constant 0 : i32
    return %c0_i32, %c0_i32_0, %c0_i32_1 : i32, i32, i32
  }
  func.func @transform_3(%arg0: i32) -> (i32, i32, i32) {
    %c0_i32 = arith.constant 0 : i32
    %c0_i32_0 = arith.constant 0 : i32
    %c0_i32_1 = arith.constant 0 : i32
    %c0_i32_2 = arith.constant 0 : i32
    return %c0_i32, %c0_i32_0, %c0_i32_1 : i32, i32, i32
  }
  func.func @transform_4(%arg0: i32) -> (i32, i32) {
    %c0_i32 = arith.constant 0 : i32
    %c0_i32_0 = arith.constant 0 : i32
    %c0_i32_1 = arith.constant 0 : i32
    return %c0_i32, %c0_i32_0 : i32, i32
  }
  func.func @transform_5(%arg0: i32) -> (i32, i32) {
    %c0_i32 = arith.constant 0 : i32
    %c0_i32_0 = arith.constant 0 : i32
    %c0_i32_1 = arith.constant 0 : i32
    return %c0_i32, %c0_i32_0 : i32, i32
  }
  func.func @transform_6(%arg0: i32) -> (i32, i32) {
    %c0_i32 = arith.constant 0 : i32
    %c0_i32_0 = arith.constant 0 : i32
    %c0_i32_1 = arith.constant 0 : i32
    return %c0_i32, %c0_i32_0 : i32, i32
  }
  func.func @transform_7(%arg0: i32) -> (i32, i32) {
    %c0_i32 = arith.constant 0 : i32
    %c0_i32_0 = arith.constant 0 : i32
    %c0_i32_1 = arith.constant 0 : i32
    return %c0_i32, %c0_i32_0 : i32, i32
  }
  func.func @transform_8(%arg0: i32) -> (i32, i32) {
    %c0_i32 = arith.constant 0 : i32
    %c0_i32_0 = arith.constant 0 : i32
    %c0_i32_1 = arith.constant 0 : i32
    return %c0_i32, %c0_i32_0 : i32, i32
  }
}

</mosaic_0001>

<bundles_post_ra>
// kernel: cnn_forward.1
= control target key start
LH: loop header
LB: loop body
LE: loop exit
PB: predicated region body
PF: predicated region fallthrough
CT: control target
= control target key end

     0   :  { %13 = vsyncpa [#allocation3], 0  ;;  %s7747_s0 = inlined_call_operand.vmem [shape: f32[2,32,96], index: 0, kind: input, shape index: {}]   ;;  %s7748_s1 = inlined_call_operand.hbm [shape: f32[5,96,256], index: 1, kind: input, shape index: {}]   ;;  %s7749_s2 = inlined_call_operand.hbm [shape: f32[5,128,256], index: 2, kind: input, shape index: {}]   ;;  %s7750_s3 = inlined_call_operand.vmem [shape: f32[5,128,128], index: 3, kind: input, shape index: {}]   ;;  %s7751_s4 = inlined_call_operand.hbm [shape: f32[128,128], index: 4, kind: input, shape index: {}]   ;;  %s7752_s5 = inlined_call_operand.hbm [shape: f32[128,128], index: 5, kind: input, shape index: {}]   ;;  %s7753_s6 = inlined_call_operand.hbm [shape: f32[8,256], index: 6, kind: input, shape index: {}]   ;;  %s7754_s7 = inlined_call_operand.vmem [shape: f32[16,128], index: 7, kind: input, shape index: {}]   ;;  %s7755_s8 = inlined_call_operand.vmem [shape: f32[8,128], index: 8, kind: output, shape index: {}]  }
   0x1   :  { %14 = vsyncpa [#allocation5], 0 }
   0x2   :  { %15 = vsyncpa [#allocation8], 0  ;;  %s6067_s27 = smov [#allocation4]   ;;  %s5951_s9 = scalar_lea.hbm %s7749_s2, 20480 }
   0x3   :  { %s35_s28 = sshll.u32 %s6067_s27, 4  ;;  %p5952_p0 = scmp.ne.s32.totalorder %s7749_s2, %s5951_s9  ;;  %s36_s28 = int_to_ptr.vmem [resolvable:$true] %s35_s28 }
   0x4   :  { %p5955_p1 = scmp.lt.u32.totalorder %s5951_s9, %s7749_s2 }
   0x6   :  { %p5957_p2 = pnand %p5955_p1, %p5952_p0 }
   0x8   :  { %5960 = shalt.err (!%p5957_p2)
}
   0x9   :  { %s5961_s14 = scalar_lea.vmem %s36_s28, 20480  ;;  %p5966_p4 = scmp.lt.s32.totalorder %s36_s28, %s36_s28 }
   0xa   :  { %p5962_p3 = scmp.ne.s32.totalorder %s36_s28, %s5961_s14  ;;  %p5967_p5 = scmp.lt.s32.totalorder %s5961_s14, %s5961_s14 }
   0xc   :  { %p5968_p6 = por %p5967_p5, %p5966_p4 }
   0xe   :  { %p5969_p7 = pnand %p5968_p6, %p5962_p3 }
  0x10   :  { %5972 = shalt.err (!%p5969_p7)
}
  0x11   :  { %s6068_s15 = smov 256   ;;  %s6069_s16 = smov 16  }
  0x12   :  { %41 = dma.hbm_to_vmem [thread:$0]  %s7749_s2, 20480, %s36_s28, [#allocation5], %s6068_s15, %s6068_s15, %s6069_s16  }
  0x13   :  { %s6070_s19 = smov [#allocation7]   ;;  %s6071_s21 = smov [#allocation2]  }
  0x14   :  { %s61_s20 = sshll.u32 %s6070_s19, 4  ;;  %s23_s22 = sshll.u32 %s6071_s21, 4  ;;  %s62_s20 = int_to_ptr.vmem [resolvable:$true] %s61_s20  ;;  %s24_s22 = int_to_ptr.vmem [resolvable:$true] %s23_s22 }
  0x15   :  { %s5973_s25 = scalar_lea.hbm %s7752_s5, 2048 }
  0x16   :  { %p5974_p8 = scmp.ne.s32.totalorder %s7752_s5, %s5973_s25  ;;  %p5977_p9 = scmp.lt.u32.totalorder %s5973_s25, %s7752_s5 }
  0x18   :  { %p5979_p10 = pnand %p5977_p9, %p5974_p8 }
  0x1a   :  { %5982 = shalt.err (!%p5979_p10)
}
  0x1b   :  { %s5983_s2 = scalar_lea.vmem %s62_s20, 2048  ;;  %p5988_p12 = scmp.lt.s32.totalorder %s62_s20, %s62_s20 }
  0x1c   :  { %p5984_p11 = scmp.ne.s32.totalorder %s62_s20, %s5983_s2  ;;  %p5989_p13 = scmp.lt.s32.totalorder %s5983_s2, %s5983_s2 }
  0x1e   :  { %p5990_p0 = por %p5989_p13, %p5988_p12 }
  0x20   :  { %p5991_p1 = pnand %p5990_p0, %p5984_p11 }
  0x22   :  { %5994 = shalt.err (!%p5991_p1)
}
  0x23   :  { %s6072_s28 = smov 128   ;;  %s6073_s9 = smov 8  }
  0x24   :  { %67 = dma.hbm_to_vmem [thread:$0]  %s7752_s5, 2048, %s62_s20, [#allocation8], %s6072_s28, %s6072_s28, %s6073_s9  }
  0x25   :  { %s5995_s14 = scalar_lea.hbm %s7748_s1, 15360 }
  0x26   :  { %p5996_p2 = scmp.ne.s32.totalorder %s7748_s1, %s5995_s14  ;;  %p5999_p3 = scmp.lt.u32.totalorder %s5995_s14, %s7748_s1 }
  0x28   :  { %p6001_p4 = pnand %p5999_p3, %p5996_p2 }
  0x2a   :  { %6004 = shalt.err (!%p6001_p4)
}
  0x2b   :  { %s6005_s23 = scalar_lea.vmem %s24_s22, 15360  ;;  %p6010_p6 = scmp.lt.s32.totalorder %s24_s22, %s24_s22 }
  0x2c   :  { %p6006_p5 = scmp.ne.s32.totalorder %s24_s22, %s6005_s23  ;;  %p6011_p7 = scmp.lt.s32.totalorder %s6005_s23, %s6005_s23 }
  0x2e   :  { %p6012_p8 = por %p6011_p7, %p6010_p6 }
  0x30   :  { %p6013_p9 = pnand %p6012_p8, %p6006_p5 }
  0x32   :  { %6016 = shalt.err (!%p6013_p9)
}
  0x33   :  { %29 = dma.hbm_to_vmem [thread:$0]  %s7748_s1, 15360, %s24_s22, [#allocation3], %s6068_s15, %s6068_s15, %s6069_s16  }
  0x34   :  { %s6074_s24 = smov [#allocation6]   ;;  %s6075_s26 = smov [#allocation9]  }
  0x35   :  { %s49_s25 = sshll.u32 %s6074_s24, 4  ;;  %s74_s27 = sshll.u32 %s6075_s26, 4  ;;  %s50_s25 = int_to_ptr.vmem [resolvable:$true] %s49_s25  ;;  %s75_s27 = int_to_ptr.vmem [resolvable:$true] %s74_s27 }
  0x36   :  { %s6017_s2 = scalar_lea.hbm %s7751_s4, 2048 }
  0x37   :  { %p6018_p10 = scmp.ne.s32.totalorder %s7751_s4, %s6017_s2  ;;  %p6021_p11 = scmp.lt.u32.totalorder %s6017_s2, %s7751_s4 }
  0x39   :  { %p6023_p12 = pnand %p6021_p11, %p6018_p10 }
  0x3b   :  { %6026 = shalt.err (!%p6023_p12)
}
  0x3c   :  { %s6027_s1 = scalar_lea.vmem %s50_s25, 2048  ;;  %p6032_p0 = scmp.lt.s32.totalorder %s50_s25, %s50_s25 }
  0x3d   :  { %p6028_p13 = scmp.ne.s32.totalorder %s50_s25, %s6027_s1  ;;  %p6033_p1 = scmp.lt.s32.totalorder %s6027_s1, %s6027_s1 }
  0x3f   :  { %p6034_p2 = por %p6033_p1, %p6032_p0 }
  0x41   :  { %p6035_p3 = pnand %p6034_p2, %p6028_p13 }
  0x43   :  { %6038 = shalt.err (!%p6035_p3)
}
  0x44   :  { %55 = dma.hbm_to_vmem [thread:$0]  %s7751_s4, 2048, %s50_s25, [#allocation5], %s6072_s28, %s6072_s28, %s6073_s9  }
  0x45   :  { %s6039_s17 = scalar_lea.hbm %s7753_s6, 256 }
  0x46   :  { %p6040_p4 = scmp.ne.s32.totalorder %s7753_s6, %s6039_s17  ;;  %p6043_p5 = scmp.lt.u32.totalorder %s6039_s17, %s7753_s6 }
  0x48   :  { %p6045_p6 = pnand %p6043_p5, %p6040_p4 }
  0x4a   :  { %6048 = shalt.err (!%p6045_p6)
}
  0x4b   :  { %s6049_s5 = scalar_lea.vmem %s75_s27, 256  ;;  %p6054_p8 = scmp.lt.s32.totalorder %s75_s27, %s75_s27 }
  0x4c   :  { %p6050_p7 = scmp.ne.s32.totalorder %s75_s27, %s6049_s5  ;;  %p6055_p9 = scmp.lt.s32.totalorder %s6049_s5, %s6049_s5 }
  0x4e   :  { %p6056_p10 = por %p6055_p9, %p6054_p8 }
  0x50   :  { %p6057_p11 = pnand %p6056_p10, %p6050_p7 }
  0x52   :  { %6060 = shalt.err (!%p6057_p11)
}
  0x53   :  { %77 = dma.hbm_to_vmem [thread:$0]  %s7753_s6, 256, %s75_s27, [#allocation8]  }
  0x54   :  { %6061 = dma.done.wait [#allocation3], 15360  }
  0x55   :  { %6062 = vsyncadd [#allocation3], 4294951936 }
  0x56   :  { %6063 = dma.done.wait [#allocation5], 22528  }
  0x57   :  { %6064 = vsyncadd [#allocation5], 4294944768 }
  0x58   :  { %6065 = dma.done.wait [#allocation8], 2304  }
  0x59   :  { %6066 = vsyncadd [#allocation8], 4294964992  ;;  %v7762_v0 = vmov 0.0   ;;  %v129_v1 = vld [vmem:[#allocation2 + $0xc8] sm:$0xff]  ;;  %v131_v2 = vld [vmem:[#allocation2 + $0xd8] sm:$0xff]  ;;  %vm522_vm0 = vcmask 1044480  }
  0x5a   :  { %237 = vmatprep.mubr.f32.mxu0 %v7762_v0  ;;  %v128_v3 = vld [vmem:[#allocation2 + $0xc0] sm:$0xff]  ;;  %v6201_v4 = vpack.c.bf16 %v131_v2, %v129_v1  ;;  %v130_v5 = vld [vmem:[#allocation2 + $0xd0] sm:$0xff]  ;;  %v133_v6 = vld [vmem:[#allocation2 + $0xe8] sm:$0xff]  ;;  %vm660_vm1 = vcmask 1043456   ;;  %vm156_vm2 = vcmask 1046528   ;;  %vm164_vm3 = vcmask 785408  }
  0x5b   :  { %v135_v7 = vld [vmem:[#allocation2 + $0xf8] sm:$0xff]  ;;  %v6203_v8 = vpack.c.bf16 %v130_v5, %v128_v3  ;;  %v132_v10 = vld [vmem:[#allocation2 + $0xe0] sm:$0xff]  ;;  %v134_v11 = vld [vmem:[#allocation2 + $0xf0] sm:$0xff]  ;;  %s6077_s10 = smov 96   ;;  %vm384_vm4 = vcmask 1045504   ;;  %vm801_vm5 = vcmask 228352  }
  0x5c   :  { %v6205_v9 = vpack.c.bf16 %v135_v7, %v133_v6  ;;  %v137_v12 = vld [vmem:[#allocation2 + $0x108] sm:$0xff]  ;;  %4931 = vmatprep.subr.bf16.mxu0 %v6201_v4  ;;  %v139_v13 = vld [vmem:[#allocation2 + $0x118] sm:$0xff]  ;;  %v6209_v14 = vpack.c.bf16 %v134_v11, %v132_v10  ;;  %v136_v16 = vld [vmem:[#allocation2 + $0x100] sm:$0xff]  ;;  %vm6078_vm6 = vmmov 1   ;;  %s6079_s13 = smov 64   ;;  %s6080_s1 = smov 32  }
  0x5d   :  { %4933 = vmatpush1.bf16.msra.mxu0 %v6203_v8  ;;  %v6212_v15 = vpack.c.bf16 %v139_v13, %v137_v12  ;;  %v138_v17 = vld [vmem:[#allocation2 + $0x110] sm:$0xff]  ;;  %v141_v18 = vld [vmem:[#allocation2 + $0x128] sm:$0xff]  ;;  %v143_v19 = vld [vmem:[#allocation2 + $0x138] sm:$0xff]  ;;  %vm6082_vm8 = vmmov 0   ;;  %vm1577_vm9 = vcmask 1041408   ;;  %vm1574_vm11 = vcmask 80896  }
  0x5e   :  { %4935 = vmatprep.subr.bf16.mxu0 %v6205_v9  ;;  %v6215_v20 = vpack.c.bf16 %v138_v17, %v136_v16  ;;  %v6220_v21 = vld [vmem:[%s7747_s0] sm:$0xff]  ;;  %v6223_v22 = vpack.c.bf16 %v143_v19, %v141_v18  ;;  %v142_v24 = vld [vmem:[#allocation2 + $0x130] sm:$0xff]  ;;  %v6228_v25 = vld [vmem:[%s7747_s0 + $0x8] sm:$0xff] }
  0x5f   :  { %v140_v23 = vld [vmem:[#allocation2 + $0x120] sm:$0xff]  ;;  %v523_v26 = vrot.slane %v6220_v21, 3  ;;  %v145_v27 = vld [vmem:[#allocation2 + $0x148] sm:$0xff]  ;;  %v147_v28 = vld [vmem:[#allocation2 + $0x158] sm:$0xff]  ;;  %v524_v29 = vrot.slane %v6228_v25, 3  ;;  %v661_v30 = vrot.slane %v6220_v21, 4 }
  0x60   :  { %v662_v31 = vrot.slane %v6228_v25, 4  ;;  %v6235_v32 = vpack.c.bf16 %v142_v24, %v140_v23  ;;  %v6238_v33 = vpack.c.bf16 %v147_v28, %v145_v27  ;;  %v144_v34 = vld [vmem:[#allocation2 + $0x140] sm:$0xff]  ;;  %v146_v35 = vld [vmem:[#allocation2 + $0x150] sm:$0xff]  ;;  %v149_v39 = vld [vmem:[#allocation2 + $0x168] sm:$0xff]  ;;  %v157_v56 = vrot.slane %v6220_v21, 1 }
  0x61   :  { %4937 = vmatpush1.bf16.msra.mxu0 %v6209_v14  ;;  %v6243_v36 = vld [vmem:[%s7747_s0 + $0x10] sm:$0xff]  ;;  %v6246_v37 = vsel %vm522_vm0, %v523_v26, %v524_v29  ;;  %v151_v40 = vld [vmem:[#allocation2 + $0x178] sm:$0xff]  ;;  %v6254_v43 = vpack.c.bf16 %v146_v35, %v144_v34  ;;  %v148_v46 = vld [vmem:[#allocation2 + $0x160] sm:$0xff]  ;;  %v158_v57 = vrot.slane %v6228_v25, 1 }
  0x62   :  { %4939 = vmatprep.subr.bf16.mxu0 %v6212_v15  ;;  %v6249_v38 = vsel %vm660_vm1, %v661_v30, %v662_v31  ;;  %v526_v41 = vrot.slane %v6243_v36, 3  ;;  %v664_v42 = vrot.slane %v6243_v36, 4  ;;  %v6259_v44 = vld [vmem:[%s7747_s0 + $0x18] sm:$0xff]  ;;  %v6262_v45 = vpack.c.bf16 %v151_v40, %v149_v39  ;;  %v150_v47 = vld [vmem:[#allocation2 + $0x170] sm:$0xff]  ;;  %v104_v50 = vld [vmem:[#allocation2 + $0x8] sm:$0xff] }
  0x63   :  { %v7757_v49 = vrot.slane %v6259_v44, 3  ;;  %v106_v51 = vld [vmem:[#allocation2 + $0x18] sm:$0xff]  ;;  %v7756_v54 = vrot.slane %v6259_v44, 4  ;;  %v6278_v55 = vpack.c.bf16 %v150_v47, %v148_v46  ;;  %v103_v59 = vld [vmem:[#allocation2] sm:$0xff]  ;;  %v105_v60 = vld [vmem:[#allocation2 + $0x10] sm:$0xff]  ;;  %v159_v1 = vsel %vm156_vm2, %v157_v56, %v158_v57 }
  0x64   :  { %v6265_v48 = vsel %vm522_vm0, %v524_v29, %v526_v41  ;;  %v6269_v52 = vsel %vm660_vm1, %v662_v31, %v664_v42  ;;  %v6283_v58 = vpack.c.bf16 %v106_v51, %v104_v50  ;;  %v108_v62 = vld [vmem:[#allocation2 + $0x28] sm:$0xff]  ;;  %v110_v63 = vld [vmem:[#allocation2 + $0x38] sm:$0xff]  ;;  %v6292_v2 = vpack.c.bf16 %v105_v60, %v103_v59  ;;  %v107_v6 = vld [vmem:[#allocation2 + $0x20] sm:$0xff] }
  0x65   :  { %4941 = vmatpush1.bf16.msra.mxu0 %v6215_v20  ;;  %v6274_v53 = vsel %vm522_vm0, %v526_v41, %v7757_v49  ;;  %v6288_v61 = vsel %vm660_vm1, %v664_v42, %v7756_v54  ;;  %v160_v3 = vrot.slane %v6243_v36, 1  ;;  %v6296_v5 = vpack.c.bf16 %v110_v63, %v108_v62  ;;  %v109_v7 = vld [vmem:[#allocation2 + $0x30] sm:$0xff]  ;;  %v112_v10 = vld [vmem:[#allocation2 + $0x48] sm:$0xff]  ;;  %v114_v11 = vld [vmem:[#allocation2 + $0x58] sm:$0xff] }
  0x66   :  { %4943 = vmatprep.subr.bf16.mxu0 %v6223_v22  ;;  %v6300_v12 = vpack.c.bf16 %v109_v7, %v107_v6  ;;  %v162_v16 = vrot.slane %v6259_v44, 1  ;;  %v6306_v17 = vpack.c.bf16 %v114_v11, %v112_v10  ;;  %v111_v18 = vld [vmem:[#allocation2 + $0x40] sm:$0xff]  ;;  %v113_v19 = vld [vmem:[#allocation2 + $0x50] sm:$0xff]  ;;  %v116_v23 = vld [vmem:[#allocation2 + $0x68] sm:$0xff] }
  0x67   :  { %v161_v13 = vsel %vm156_vm2, %v158_v57, %v160_v3  ;;  %v118_v24 = vld [vmem:[#allocation2 + $0x78] sm:$0xff]  ;;  %v6310_v26 = vpack.c.bf16 %v113_v19, %v111_v18  ;;  %v115_v29 = vld [vmem:[#allocation2 + $0x60] sm:$0xff]  ;;  %v117_v30 = vld [vmem:[#allocation2 + $0x70] sm:$0xff] }
  0x68   :  { %v163_v27 = vsel %vm156_vm2, %v160_v3, %v162_v16  ;;  %v6315_v28 = vpack.c.bf16 %v118_v24, %v116_v23  ;;  %v120_v31 = vld [vmem:[#allocation2 + $0x88] sm:$0xff]  ;;  %v122_v34 = vld [vmem:[#allocation2 + $0x98] sm:$0xff]  ;;  %v6319_v35 = vpack.c.bf16 %v117_v30, %v115_v29  ;;  %v119_v40 = vld [vmem:[#allocation2 + $0x80] sm:$0xff] }
  0x69   :  { %4945 = vmatpush1.bf16.msra.mxu0 %v6235_v32  ;;  %v6323_v39 = vpack.c.bf16 %v122_v34, %v120_v31  ;;  %v121_v41 = vld [vmem:[#allocation2 + $0x90] sm:$0xff]  ;;  %v124_v42 = vld [vmem:[#allocation2 + $0xa8] sm:$0xff]  ;;  %v126_v46 = vld [vmem:[#allocation2 + $0xb8] sm:$0xff] }
  0x6a   :  { %4947 = vmatprep.subr.bf16.mxu0 %v6238_v33  ;;  %v6327_v47 = vpack.c.bf16 %v121_v41, %v119_v40  ;;  %v6331_v50 = vpack.c.bf16 %v126_v46, %v124_v42  ;;  %v123_v51 = vld [vmem:[#allocation2 + $0xa0] sm:$0xff]  ;;  %v125_v56 = vld [vmem:[#allocation2 + $0xb0] sm:$0xff]  ;;  %v361_v59 = vld [vmem:[#allocation2 + $0x188] sm:$0xff] }
  0x6b   :  { %v6336_v57 = vld [vmem:[%s7754_s7] sm:$0xff]  ;;  %v363_v60 = vld [vmem:[#allocation2 + $0x198] sm:$0xff]  ;;  %v6342_v62 = vld [vmem:[%s7754_s7 + $0x8] sm:$0xff]  ;;  %v6345_v63 = vpack.c.bf16 %v125_v56, %v123_v51 }
  0x6c   :  { %886 = vrot.lane.b32.xlu0 %v6336_v57, %s6077_s10  ;;  %v360_v3 = vld [vmem:[#allocation2 + $0x180] sm:$0xff]  ;;  %v362_v6 = vld [vmem:[#allocation2 + $0x190] sm:$0xff]  ;;  %v365_v7 = vld [vmem:[#allocation2 + $0x1a8] sm:$0xff]  ;;  %1572 = vrot.lane.b32.xlu1 %v6336_v57, %s6079_s13 }
  0x6d   :  { %4949 = vmatpush1.bf16.msra.mxu0 %v6254_v43  ;;  %v367_v10 = vld [vmem:[#allocation2 + $0x1b8] sm:$0xff]  ;;  %v6352_v11 = vpack.c.bf16 %v362_v6, %v360_v3  ;;  %v366_v18 = vld [vmem:[#allocation2 + $0x1b0] sm:$0xff]  ;;  %v369_v19 = vld [vmem:[#allocation2 + $0x1c8] sm:$0xff] }
  0x6e   :  { %4951 = vmatprep.subr.bf16.mxu0 %v6262_v45  ;;  %v371_v23 = vld [vmem:[#allocation2 + $0x1d8] sm:$0xff]  ;;  %v368_v29 = vld [vmem:[#allocation2 + $0x1c0] sm:$0xff]  ;;  %v370_v30 = vld [vmem:[#allocation2 + $0x1d0] sm:$0xff] }
  0x6f   :  { %v373_v31 = vld [vmem:[#allocation2 + $0x1e8] sm:$0xff]  ;;  %v375_v34 = vld [vmem:[#allocation2 + $0x1f8] sm:$0xff]  ;;  %v6369_v40 = vpack.c.bf16 %v370_v30, %v368_v29  ;;  %v372_v42 = vld [vmem:[#allocation2 + $0x1e0] sm:$0xff] }
  0x70   :  { %888 = vrot.lane.b32.xlu0 %v6342_v62, %s6077_s10  ;;  %v6373_v41 = vpack.c.bf16 %v375_v34, %v373_v31  ;;  %v374_v46 = vld [vmem:[#allocation2 + $0x1f0] sm:$0xff]  ;;  %v377_v51 = vld [vmem:[#allocation2 + $0x208] sm:$0xff]  ;;  %v379_v56 = vld [vmem:[#allocation2 + $0x218] sm:$0xff]  ;;  %v385_v34 = vrot.slane %v6220_v21, 2  ;;  %1651 = vrot.lane.b32.xlu1 %v6336_v57, %s6080_s1 }
  0x71   :  { %4953 = vmatpush1.bf16.msra.mxu0 %v6278_v55  ;;  %v376_v3 = vld [vmem:[#allocation2 + $0x200] sm:$0xff]  ;;  %v378_v6 = vld [vmem:[#allocation2 + $0x210] sm:$0xff]  ;;  %v499_v29 = vld [vmem:[#allocation2 + $0x248] sm:$0xff] }
  0x72   :  { %4955 = vmatprep.subr.bf16.mxu0 %v6283_v58  ;;  %v501_v30 = vld [vmem:[#allocation2 + $0x258] sm:$0xff]  ;;  %vm6543_vm7 = vmpackc.low %vm660_vm1, %vm6078_vm6 }
  0x73   :  { %v513_v49 = vld [vmem:[#allocation2 + $0x2b8] sm:$0xff]  ;;  %vm6931_vm10 = vmpackc.low %vm1577_vm9, %vm6078_vm6 }
  0x74   :  { %4070 = vmatmul.mubr.msk.f32.vlgmr.msra.gmra.mrb[0].mxu0 %vm164_vm3, %v159_v1  ;;  %v6348_v1 = vpack.c.bf16 %v363_v60, %v361_v59  ;;  %v6378_v59 = vpack.c.bf16 %v374_v46, %v372_v42  ;;  %v6382_v60 = vpack.c.bf16 %v379_v56, %v377_v51  ;;  %v386_v42 = vrot.slane %v6228_v25, 2  ;;  %v498_v51 = vld [vmem:[#allocation2 + $0x240] sm:$0xff]  ;;  %v500_v56 = vld [vmem:[#allocation2 + $0x250] sm:$0xff] }
  0x75   :  { %4957 = vmatpush1.bf16.msra.mxu0 %v6292_v2  ;;  %243 = vmatprep.mubr.f32.mxu0 %v7762_v0  ;;  %v6399_v46 = vpack.c.bf16 %v501_v30, %v499_v29  ;;  %v507_v29 = vld [vmem:[#allocation2 + $0x288] sm:$0xff]  ;;  %v509_v30 = vld [vmem:[#allocation2 + $0x298] sm:$0xff] }
  0x76   :  { %4959 = vmatprep.subr.bf16.mxu0 %v6296_v5 }
  0x77   :  { %7903 = vst [vmem:[#allocation13_spill] sm:$0xff] %v6399_v46 }
  0x78   :  { %4071 = vmatmul.mubr.msk.f32.gmra.mrb[2].mxu0 %vm164_vm3, %v161_v13  ;;  %v6355_v13 = vpack.c.bf16 %v367_v10, %v365_v7  ;;  %v381_v7 = vld [vmem:[#allocation2 + $0x228] sm:$0xff]  ;;  %v383_v10 = vld [vmem:[#allocation2 + $0x238] sm:$0xff] }
  0x79   :  { %4961 = vmatpush1.bf16.msra.mxu0 %v6300_v12  ;;  %249 = vmatprep.mubr.f32.mxu0 %v7762_v0 }
  0x7a   :  { %4963 = vmatprep.subr.bf16.mxu0 %v6306_v17 }
  0x7c   :  { %4072 = vmatmul.mubr.msk.f32.gmra.mrb[4].mxu0 %vm164_vm3, %v163_v27  ;;  %v6364_v27 = vpack.c.bf16 %v371_v23, %v369_v19  ;;  %v380_v19 = vld [vmem:[#allocation2 + $0x220] sm:$0xff]  ;;  %v382_v23 = vld [vmem:[#allocation2 + $0x230] sm:$0xff] }
  0x7d   :  { %4965 = vmatpush1.bf16.msra.mxu0 %v6310_v26  ;;  %255 = vmatprep.mubr.f32.mxu0 %v7762_v0  ;;  %v6394_v31 = vpack.c.bf16 %v382_v23, %v380_v19  ;;  %v388_v19 = vrot.slane %v6243_v36, 2  ;;  %v504_v23 = vld [vmem:[#allocation2 + $0x270] sm:$0xff] }
  0x7e   :  { %4967 = vmatprep.subr.bf16.mxu0 %v6315_v28 }
  0x80   :  { %4073 = vmatmul.mubr.msk.f32.gmra.mrb[6].mxu0 %vm164_vm3, %v162_v16  ;;  %v364_v16 = vld [vmem:[#allocation2 + $0x1a0] sm:$0xff] }
  0x81   :  { %4969 = vmatpush1.bf16.msra.mxu0 %v6319_v35  ;;  %334 = vmatprep.mubr.f32.mxu0 %v7762_v0  ;;  %v6360_v24 = vpack.c.bf16 %v366_v18, %v364_v16  ;;  %v6387_v16 = vpack.c.bf16 %v378_v6, %v376_v3  ;;  %v6391_v18 = vpack.c.bf16 %v383_v10, %v381_v7  ;;  %v503_v3 = vld [vmem:[#allocation2 + $0x268] sm:$0xff]  ;;  %v505_v6 = vld [vmem:[#allocation2 + $0x278] sm:$0xff] }
  0x82   :  { %4971 = vmatprep.subr.bf16.mxu0 %v6323_v39  ;;  %v387_v7 = vsel %vm384_vm4, %v385_v34, %v386_v42  ;;  %v6403_v10 = vpack.c.bf16 %v500_v56, %v498_v51  ;;  %v389_v34 = vsel %vm384_vm4, %v386_v42, %v388_v19  ;;  %v6417_v51 = vpack.c.bf16 %v509_v30, %v507_v29  ;;  %v506_v56 = vld [vmem:[#allocation2 + $0x280] sm:$0xff]  ;;  %v512_v29 = vld [vmem:[#allocation2 + $0x2b0] sm:$0xff]  ;;  %v515_v30 = vld [vmem:[#allocation2 + $0x2c8] sm:$0xff] }
  0x84   :  { %7904 = vst [vmem:[#allocation14_spill] sm:$0xff] %v6403_v10  ;;  %7907 = vst [vmem:[#allocation17_spill] sm:$0xff] %v6417_v51 }
  0x85   :  { %4973 = vmatpush1.bf16.msra.mxu0 %v6327_v47 }
  0x86   :  { %4975 = vmatprep.subr.bf16.mxu0 %v6331_v50 }
  0x89   :  { %4977 = vmatpush1.bf16.msra.mxu0 %v6345_v63 }
  0x8a   :  { %4979 = vmatprep.subr.bf16.mxu0 %v6348_v1 }
  0x8c   :  { %4074 = vmatmul.mubr.msk.f32.vlgmr.msra.gmra.mrb[0].mxu0 %vm164_vm3, %v6220_v21  ;;  %v6407_v21 = vpack.c.bf16 %v505_v6, %v503_v3  ;;  %v508_v3 = vld [vmem:[#allocation2 + $0x290] sm:$0xff]  ;;  %v511_v6 = vld [vmem:[#allocation2 + $0x2a8] sm:$0xff] }
  0x8d   :  { %4981 = vmatpush1.bf16.msra.mxu0 %v6352_v11  ;;  %340 = vmatprep.mubr.f32.mxu0 %v7762_v0 }
  0x8e   :  { %4983 = vmatprep.subr.bf16.mxu0 %v6355_v13  ;;  %7905 = vst [vmem:[#allocation15_spill] sm:$0xff] %v6407_v21 }
  0x90   :  { %4075 = vmatmul.mubr.msk.f32.gmra.mrb[2].mxu0 %vm164_vm3, %v6228_v25  ;;  %v502_v25 = vld [vmem:[#allocation2 + $0x260] sm:$0xff] }
  0x91   :  { %4985 = vmatpush1.bf16.msra.mxu0 %v6360_v24  ;;  %346 = vmatprep.mubr.f32.mxu0 %v7762_v0  ;;  %v6411_v54 = vpack.c.bf16 %v504_v23, %v502_v25  ;;  %v6426_v25 = vpack.c.bf16 %v513_v49, %v511_v6  ;;  %v510_v23 = vld [vmem:[#allocation2 + $0x2a0] sm:$0xff]  ;;  %v519_v49 = vld [vmem:[#allocation2 + $0x2e8] sm:$0xff]  ;;  %v521_v6 = vld [vmem:[#allocation2 + $0x2f8] sm:$0xff] }
  0x92   :  { %4987 = vmatprep.subr.bf16.mxu0 %v6364_v27 }
  0x93   :  { %7906 = vst [vmem:[#allocation16_spill] sm:$0xff] %v6411_v54  ;;  %7909 = vst [vmem:[#allocation19_spill] sm:$0xff] %v6426_v25 }
  0x94   :  { %4076 = vmatmul.mubr.msk.f32.gmra.mrb[4].mxu0 %vm164_vm3, %v6243_v36  ;;  %v390_v36 = vrot.slane %v6259_v44, 2 }
  0x95   :  { %4989 = vmatpush1.bf16.msra.mxu0 %v6369_v40  ;;  %352 = vmatprep.mubr.f32.mxu0 %v7762_v0 }
  0x96   :  { %4991 = vmatprep.subr.bf16.mxu0 %v6373_v41  ;;  %v391_v42 = vsel %vm384_vm4, %v388_v19, %v390_v36  ;;  %v514_v19 = vld [vmem:[#allocation2 + $0x2c0] sm:$0xff] }
  0x98   :  { %4077 = vmatmul.mubr.msk.f32.gmra.mrb[6].mxu0 %vm164_vm3, %v6259_v44 }
  0x99   :  { %4993 = vmatpush1.bf16.msra.mxu0 %v6378_v59  ;;  %464 = vmatprep.mubr.f32.mxu0 %v7762_v0 }
  0x9a   :  { %4995 = vmatprep.subr.bf16.mxu0 %v6382_v60 }
  0x9d   :  { %4997 = vmatpush1.bf16.msra.mxu0 %v6387_v16 }
  0x9e   :  { %4999 = vmatprep.subr.bf16.mxu0 %v6391_v18 }
  0xa1   :  { %5001 = vmatpush1.bf16.msra.mxu0 %v6394_v31 }
  0xa2   :  { %5003 = vmatprep.subr.bf16.mxu0 %v6399_v46 }
  0xa4   :  { %4078 = vmatmul.mubr.msk.f32.vlgmr.msra.gmra.mrb[0].mxu0 %vm164_vm3, %v387_v7  ;;  %v6421_v7 = vpack.c.bf16 %v508_v3, %v506_v56  ;;  %v516_v3 = vld [vmem:[#allocation2 + $0x2d0] sm:$0xff] }
  0xa5   :  { %5005 = vmatpush1.bf16.msra.mxu0 %v6403_v10  ;;  %470 = vmatprep.mubr.f32.mxu0 %v7762_v0 }
  0xa6   :  { %5007 = vmatprep.subr.bf16.mxu0 %v6407_v21  ;;  %7908 = vst [vmem:[#allocation18_spill] sm:$0xff] %v6421_v7  ;;  %v517_v21 = vld [vmem:[#allocation2 + $0x2d8] sm:$0xff] }
  0xa7   :  { %v6434_v56 = vpack.c.bf16 %v517_v21, %v515_v30  ;;  %v637_v21 = vld [vmem:[#allocation2 + $0x308] sm:$0xff]  ;;  %v639_v30 = vld [vmem:[#allocation2 + $0x318] sm:$0xff] }
  0xa8   :  { %4079 = vmatmul.mubr.msk.f32.gmra.mrb[2].mxu0 %vm164_vm3, %v389_v34  ;;  %v6430_v34 = vpack.c.bf16 %v512_v29, %v510_v23  ;;  %v518_v23 = vld [vmem:[#allocation2 + $0x2e0] sm:$0xff]  ;;  %v520_v29 = vld [vmem:[#allocation2 + $0x2f0] sm:$0xff] }
  0xa9   :  { %5009 = vmatpush1.bf16.msra.mxu0 %v6411_v54  ;;  %476 = vmatprep.mubr.f32.mxu0 %v7762_v0  ;;  %7911 = vst [vmem:[#allocation21_spill] sm:$0xff] %v6434_v56 }
  0xaa   :  { %5011 = vmatprep.subr.bf16.mxu0 %v6417_v51  ;;  %7910 = vst [vmem:[#allocation20_spill] sm:$0xff] %v6430_v34  ;;  %v6438_v51 = vpack.c.bf16 %v516_v3, %v514_v19  ;;  %v636_v19 = vld [vmem:[#allocation2 + $0x300] sm:$0xff]  ;;  %v638_v3 = vld [vmem:[#allocation2 + $0x310] sm:$0xff] }
  0xac   :  { %4080 = vmatmul.mubr.msk.f32.gmra.mrb[4].mxu0 %vm164_vm3, %v391_v42  ;;  %7912 = vst [vmem:[#allocation22_spill] sm:$0xff] %v6438_v51  ;;  %v6442_v42 = vpack.c.bf16 %v521_v6, %v519_v49  ;;  %v6451_v49 = vpack.c.bf16 %v638_v3, %v636_v19  ;;  %v644_v3 = vld [vmem:[#allocation2 + $0x340] sm:$0xff] }
  0xad   :  { %5013 = vmatpush1.bf16.msra.mxu0 %v6421_v7  ;;  %482 = vmatprep.mubr.f32.mxu0 %v7762_v0 }
  0xae   :  { %5015 = vmatprep.subr.bf16.mxu0 %v6426_v25  ;;  %7913 = vst [vmem:[#allocation23_spill] sm:$0xff] %v6442_v42  ;;  %v6445_v25 = vpack.c.bf16 %v520_v29, %v518_v23  ;;  %7916 = vst [vmem:[#allocation26_spill] sm:$0xff] %v6451_v49  ;;  %v645_v23 = vld [vmem:[#allocation2 + $0x348] sm:$0xff]  ;;  %v647_v29 = vld [vmem:[#allocation2 + $0x358] sm:$0xff] }
  0xaf   :  { %v6463_v19 = vpack.c.bf16 %v647_v29, %v645_v23  ;;  %v650_v23 = vld [vmem:[#allocation2 + $0x370] sm:$0xff]  ;;  %v653_v29 = vld [vmem:[#allocation2 + $0x388] sm:$0xff] }
  0xb0   :  { %4081 = vmatmul.mubr.msk.f32.gmra.mrb[6].mxu0 %vm164_vm3, %v390_v36  ;;  %7914 = vst [vmem:[#allocation24_spill] sm:$0xff] %v6445_v25  ;;  %v6448_v36 = vpack.c.bf16 %v639_v30, %v637_v21  ;;  %v7919_v30 = vmov 0.0  }
  0xb1   :  { %5017 = vmatpush1.bf16.msra.mxu0 %v6430_v34  ;;  %602 = vmatprep.mubr.f32.mxu0 %v7762_v0  ;;  %v641_v34 = vld [vmem:[#allocation2 + $0x328] sm:$0xff]  ;;  %v643_v0 = vld [vmem:[#allocation2 + $0x338] sm:$0xff]  ;;  %7920 = vst [vmem:[#allocation29_spill] sm:$0xff] %v6463_v19 }
  0xb2   :  { %5019 = vmatprep.subr.bf16.mxu0 %v6434_v56  ;;  %7915 = vst [vmem:[#allocation25_spill] sm:$0xff] %v6448_v36  ;;  %v6454_v6 = vpack.c.bf16 %v643_v0, %v641_v34  ;;  %v640_v56 = vld [vmem:[#allocation2 + $0x320] sm:$0xff]  ;;  %v646_v0 = vld [vmem:[#allocation2 + $0x350] sm:$0xff]  ;;  %v649_v34 = vld [vmem:[#allocation2 + $0x368] sm:$0xff] }
  0xb4   :  { %7917 = vst [vmem:[#allocation27_spill] sm:$0xff] %v6454_v6 }
  0xb5   :  { %5021 = vmatpush1.bf16.msra.mxu0 %v6438_v51  ;;  %v642_v51 = vld [vmem:[#allocation2 + $0x330] sm:$0xff] }
  0xb6   :  { %5023 = vmatprep.subr.bf16.mxu0 %v6442_v42  ;;  %v6459_v21 = vpack.c.bf16 %v642_v51, %v640_v56  ;;  %v648_v56 = vld [vmem:[#allocation2 + $0x360] sm:$0xff] }
  0xb8   :  { %7918 = vst [vmem:[#allocation28_spill] sm:$0xff] %v6459_v21 }
  0xb9   :  { %5025 = vmatpush1.bf16.msra.mxu0 %v6445_v25 }
  0xba   :  { %5027 = vmatprep.subr.bf16.mxu0 %v6448_v36  ;;  %v651_v36 = vld [vmem:[#allocation2 + $0x378] sm:$0xff] }
  0xbb   :  { %v6472_v51 = vpack.c.bf16 %v651_v36, %v649_v34  ;;  %v654_v36 = vld [vmem:[#allocation2 + $0x390] sm:$0xff]  ;;  %v657_v34 = vld [vmem:[#allocation2 + $0x3a8] sm:$0xff] }
  0xbc   :  { %4082 = vmatmul.mubr.msk.f32.vlgmr.msra.gmra.mrb[0].mxu0 %vm164_vm3, %v6246_v37  ;;  %v6468_v37 = vpack.c.bf16 %v646_v0, %v644_v3  ;;  %v652_v0 = vld [vmem:[#allocation2 + $0x380] sm:$0xff] }
  0xbd   :  { %5029 = vmatpush1.bf16.msra.mxu0 %v6451_v49  ;;  %608 = vmatprep.mubr.f32.mxu0 %v7919_v30  ;;  %7922 = vst [vmem:[#allocation31_spill] sm:$0xff] %v6472_v51 }
  0xbe   :  { %5031 = vmatprep.subr.bf16.mxu0 %v6454_v6  ;;  %7921 = vst [vmem:[#allocation30_spill] sm:$0xff] %v6468_v37  ;;  %v655_v6 = vld [vmem:[#allocation2 + $0x398] sm:$0xff] }
  0xbf   :  { %v6481_v3 = vpack.c.bf16 %v655_v6, %v653_v29  ;;  %v656_v6 = vld [vmem:[#allocation2 + $0x3a0] sm:$0xff] }
  0xc0   :  { %4083 = vmatmul.mubr.msk.f32.gmra.mrb[2].mxu0 %vm164_vm3, %v6265_v48  ;;  %v6477_v48 = vpack.c.bf16 %v650_v23, %v648_v56  ;;  %v658_v23 = vld [vmem:[#allocation2 + $0x3b0] sm:$0xff] }
  0xc1   :  { %5033 = vmatpush1.bf16.msra.mxu0 %v6459_v21  ;;  %614 = vmatprep.mubr.f32.mxu0 %v7919_v30  ;;  %7924 = vst [vmem:[#allocation33_spill] sm:$0xff] %v6481_v3  ;;  %v7925_v21 = vrot.slane %v6259_v44, 3  ;;  %v6494_v29 = vpack.c.bf16 %v658_v23, %v656_v6 }
  0xc2   :  { %5035 = vmatprep.subr.bf16.mxu0 %v6463_v19  ;;  %7923 = vst [vmem:[#allocation32_spill] sm:$0xff] %v6477_v48  ;;  %v659_v19 = vld [vmem:[#allocation2 + $0x3b8] sm:$0xff] }
  0xc3   :  { %v6491_v56 = vpack.c.bf16 %v659_v19, %v657_v34  ;;  %7928 = vst [vmem:[#allocation36_spill] sm:$0xff] %v6494_v29 }
  0xc4   :  { %4084 = vmatmul.mubr.msk.f32.gmra.mrb[4].mxu0 %vm164_vm3, %v6274_v53  ;;  %v6487_v53 = vpack.c.bf16 %v654_v36, %v652_v0  ;;  %v6521_v0 = vld [vmem:[#allocation9] sm:$0xff] }
  0xc5   :  { %5037 = vmatpush1.bf16.msra.mxu0 %v6468_v37  ;;  %620 = vmatprep.mubr.f32.mxu0 %v7919_v30  ;;  %7927 = vst [vmem:[#allocation35_spill] sm:$0xff] %v6491_v56 }
  0xc6   :  { %5039 = vmatprep.subr.bf16.mxu0 %v6472_v51  ;;  %7926 = vst [vmem:[#allocation34_spill] sm:$0xff] %v6487_v53 }
  0xc8   :  { %4085 = vmatmul.mubr.msk.f32.gmra.mrb[6].mxu0 %vm164_vm3, %v7925_v21  ;;  %v7929_v21 = vrot.slane %v6259_v44, 4  ;;  %v6523_v44 = vld [vmem:[#allocation9 + $0x8] sm:$0xff] }
  0xc9   :  { %5041 = vmatpush1.bf16.msra.mxu0 %v6477_v48  ;;  %740 = vmatprep.mubr.f32.mxu0 %v7919_v30 }
  0xca   :  { %5043 = vmatprep.subr.bf16.mxu0 %v6481_v3 }
  0xcd   :  { %5045 = vmatpush1.bf16.msra.mxu0 %v6487_v53 }
  0xce   :  { %5047 = vmatprep.subr.bf16.mxu0 %v6491_v56 }
  0xd1   :  { %5049 = vmatpush1.bf16.msra.mxu0 %v6494_v29 }
  0xd4   :  { %4086 = vmatmul.mubr.msk.f32.vlgmr.msra.gmra.mrb[0].mxu0 %vm164_vm3, %v6249_v38  ;;  %v773_v38 = vlaneseq }
  0xd5   :  { %746 = vmatprep.mubr.f32.mxu0 %v7919_v30 }
  0xd8   :  { %4087 = vmatmul.mubr.msk.f32.gmra.mrb[2].mxu0 %vm164_vm3, %v6269_v52  ;;  %v6516_v52 = vshrl.u32 %v773_v38, 7 }
  0xd9   :  { %752 = vmatprep.mubr.f32.mxu0 %v7919_v30 }
  0xda   :  { %7931 = vst [vmem:[#allocation38_spill] sm:$0xff] %v6516_v52 }
  0xdc   :  { %4088 = vmatmul.mubr.msk.f32.gmra.mrb[4].mxu0 %vm164_vm3, %v6288_v61  ;;  %v6519_v61 = vsub.s32 0, %v6516_v52 }
  0xdd   :  { %758 = vmatprep.mubr.f32.mxu0 %v7919_v30 }
  0xde   :  { %v6510_v19 = vpop.permute.xlu0 %886  ;;  %7932 = vst [vmem:[#allocation39_spill] sm:$0xff] %v6519_v61  ;;  %v6527_v36 = vrot.slane %v6521_v0, %v6519_v61  ;;  %v6531_v34 = vrot.slane %v6523_v44, %v6519_v61 }
  0xdf   :  { %7930 = vst [vmem:[#allocation37_spill] sm:$0xff] %v6510_v19  ;;  %4457 = vmatprep.mubr.msk.f32.mxu1 %vm801_vm5, %v6510_v19 }
  0xe0   :  { %4089 = vmatmul.mubr.msk.f32.gmra.mrb[6].mxu0 %vm164_vm3, %v7929_v21 }
  0xe1   :  { %4446 = vmatprep.mubr.msk.f32.mxu0 %vm801_vm5, %v6336_v57 }
 0x1a7   :  { %v742_v6 = vpop.f32.mrb[0].mxu0 }
 0x1a8   :  { %v781_v23 = vadd.f32 %v6527_v36, %v742_v6  ;;  %v744_v21 = vpop.f32.mrb[1].mxu0 }
 0x1a9   :  { %v782_v38 = vadd.f32 %v6531_v34, %v744_v21 }
 0x1aa   :  { %v789_v19 = vmax.f32 %v781_v23, 0.0 }
 0x1ab   :  { %v790_v29 = vmax.f32 %v782_v38, 0.0  ;;  %v748_v56 = vpop.f32.mrb[2].mxu0 }
 0x1ac   :  { %v783_v53 = vadd.f32 %v6527_v36, %v748_v56  ;;  %v750_v3 = vpop.f32.mrb[3].mxu0 }
 0x1ad   :  { %v797_v48 = vmax.f32 %v789_v19, %v790_v29  ;;  %v784_v51 = vadd.f32 %v6531_v34, %v750_v3  ;;  %v1005_v3 = vld [vmem:[#allocation4 + $0x108] sm:$0xff] }
 0x1ae   :  { %v791_v37 = vmax.f32 %v783_v53, 0.0  ;;  %v1006_v53 = vld [vmem:[#allocation4 + $0x110] sm:$0xff]  ;;  %v1009_v19 = vld [vmem:[#allocation4 + $0x128] sm:$0xff] }
 0x1af   :  { %v792_v49 = vmax.f32 %v784_v51, 0.0  ;;  %v754_v25 = vpop.f32.mrb[4].mxu0 }
 0x1b0   :  { %v785_v61 = vadd.f32 %v6527_v36, %v754_v25  ;;  %v756_v42 = vpop.f32.mrb[5].mxu0 }
 0x1b1   :  { %v798_v7 = vmax.f32 %v791_v37, %v792_v49  ;;  %v786_v6 = vadd.f32 %v6531_v34, %v756_v42  ;;  %v1007_v49 = vld [vmem:[#allocation4 + $0x118] sm:$0xff] }
 0x1b2   :  { %v793_v54 = vmax.f32 %v785_v61, 0.0  ;;  %v6557_v61 = vpop.permute.xlu0 %888 }
 0x1b3   :  { %v5050_v21 = vpack.c.bf16 %v798_v7, %v797_v48  ;;  %v794_v23 = vmax.f32 %v786_v6, 0.0  ;;  %v760_v38 = vpop.f32.mrb[6].mxu0  ;;  %v7933_v7 = vmov 0  ;;  %v1004_v48 = vld [vmem:[#allocation4 + $0x100] sm:$0xff]  ;;  %7937 = vst [vmem:[#allocation42_spill] sm:$0xff] %v6557_v61 }
 0x1b4   :  { %v787_v10 = vadd.f32 %v6527_v36, %v760_v38  ;;  %v762_v56 = vpop.f32.mrb[7].mxu0  ;;  %v7934_v7 = vsel %vm6543_vm7, 4294967295, %v7933_v7  ;;  %v1013_v38 = vld [vmem:[#allocation4 + $0x148] sm:$0xff] }
 0x1b5   :  { %v799_v46 = vmax.f32 %v793_v54, %v794_v23  ;;  %v788_v29 = vadd.f32 %v6531_v34, %v762_v56  ;;  %5051 = vmatprep.subr.bf16.mxu0 %v5050_v21  ;;  %5061 = vmatprep.subr.bf16.mxu1 %v5050_v21  ;;  %7935 = vst [vmem:[#allocation40_spill] sm:$0xff] %v7934_v7  ;;  %v1010_v23 = vld [vmem:[#allocation4 + $0x130] sm:$0xff]  ;;  %v1015_v56 = vld [vmem:[#allocation4 + $0x158] sm:$0xff] }
 0x1b6   :  { %v795_v51 = vmax.f32 %v787_v10, 0.0  ;;  %5053 = vmatpush3.bf16.msra.mxu0 %v5050_v21  ;;  %5063 = vmatpush3.bf16.msra.mxu1 %v5050_v21  ;;  %v6547_v54 = vpack.c.bf16 %v1007_v49, %v1005_v3  ;;  %v1011_v10 = vld [vmem:[#allocation4 + $0x138] sm:$0xff]  ;;  %v1008_v21 = vld [vmem:[#allocation4 + $0x120] sm:$0xff]  ;;  %v1014_v3 = vld [vmem:[#allocation4 + $0x150] sm:$0xff] }
 0x1b7   :  { %v796_v25 = vmax.f32 %v788_v29, 0.0  ;;  %v6562_v6 = vpack.c.bf16 %v1011_v10, %v1009_v19  ;;  %v6569_v29 = vpack.c.bf16 %v1010_v23, %v1008_v21  ;;  %v1017_v49 = vld [vmem:[#allocation4 + $0x168] sm:$0xff]  ;;  %v1023_v10 = vld [vmem:[#allocation4 + $0x198] sm:$0xff] }
 0x1b8   :  { %7936 = vst [vmem:[#allocation41_spill] sm:$0xff] %v6547_v54  ;;  %v1021_v19 = vld [vmem:[#allocation4 + $0x188] sm:$0xff] }
 0x1b9   :  { %v800_v37 = vmax.f32 %v795_v51, %v796_v25  ;;  %7939 = vst [vmem:[#allocation44_spill] sm:$0xff] %v6562_v6  ;;  %7940 = vst [vmem:[#allocation45_spill] sm:$0xff] %v6569_v29  ;;  %v6573_v51 = vpack.c.bf16 %v1015_v56, %v1013_v38  ;;  %v1012_v25 = vld [vmem:[#allocation4 + $0x140] sm:$0xff]  ;;  %v6585_v23 = vpack.c.bf16 %v1023_v10, %v1021_v19  ;;  %v1022_v56 = vld [vmem:[#allocation4 + $0x190] sm:$0xff] }
 0x1ba   :  { %v1020_v38 = vld [vmem:[#allocation4 + $0x180] sm:$0xff] }
 0x1bb   :  { %v5054_v42 = vpack.c.bf16 %v800_v37, %v799_v46  ;;  %v6559_v46 = vpack.c.bf16 %v1006_v53, %v1004_v48  ;;  %7941 = vst [vmem:[#allocation46_spill] sm:$0xff] %v6573_v51  ;;  %v1019_v37 = vld [vmem:[#allocation4 + $0x178] sm:$0xff]  ;;  %v1016_v48 = vld [vmem:[#allocation4 + $0x160] sm:$0xff]  ;;  %v1018_v53 = vld [vmem:[#allocation4 + $0x170] sm:$0xff] }
 0x1bc   :  { %v6582_v21 = vpack.c.bf16 %v1018_v53, %v1016_v48  ;;  %7945 = vst [vmem:[#allocation50_spill] sm:$0xff] %v6585_v23  ;;  %v1029_v48 = vld [vmem:[#allocation4 + $0x1c8] sm:$0xff]  ;;  %v1031_v53 = vld [vmem:[#allocation4 + $0x1d8] sm:$0xff] }
 0x1bd   :  { %5056 = vmatprep.subr.msk.bf16.mxu0 %vm6543_vm7, %v5054_v42  ;;  %5066 = vmatprep.subr.msk.bf16.mxu1 %vm6543_vm7, %v5054_v42  ;;  %7938 = vst [vmem:[#allocation43_spill] sm:$0xff] %v6559_v46  ;;  %v6597_v10 = vpack.c.bf16 %v1031_v53, %v1029_v48  ;;  %v972_v48 = vld [vmem:[#allocation4 + $0x8] sm:$0xff]  ;;  %v974_v53 = vld [vmem:[#allocation4 + $0x18] sm:$0xff] }
 0x1be   :  { %5059 = vmatpush3.bf16.msk.msra.mxu0 %vm6543_vm7, %v5054_v42  ;;  %5069 = vmatpush3.bf16.msk.msra.mxu1 %vm6543_vm7, %v5054_v42  ;;  %v6579_v42 = vpack.c.bf16 %v1019_v37, %v1017_v49  ;;  %7944 = vst [vmem:[#allocation49_spill] sm:$0xff] %v6582_v21  ;;  %v6588_v49 = vpack.c.bf16 %v1022_v56, %v1020_v38  ;;  %v1033_v56 = vld [vmem:[#allocation4 + $0x1e8] sm:$0xff] }
 0x1bf   :  { %5071 = vmatprep.subr.bf16.mxu1 %v6547_v54  ;;  %7949 = vst [vmem:[#allocation54_spill] sm:$0xff] %v6597_v10 }
 0x1c0   :  { %7943 = vst [vmem:[#allocation48_spill] sm:$0xff] %v6579_v42  ;;  %7946 = vst [vmem:[#allocation51_spill] sm:$0xff] %v6588_v49 }
 0x1c1   :  { %4447 = vmatmul.mubr.msk.f32.vlgmr.msra.gmra.mrb[8].mxu0 %vm801_vm5, %v6342_v62  ;;  %4458 = vmatmul.mubr.msk.f32.vlgmr.msra.gmra.mrb[0].mxu1 %vm801_vm5, %v6557_v61  ;;  %v6576_v62 = vpack.c.bf16 %v1014_v3, %v1012_v25  ;;  %v1025_v25 = vld [vmem:[#allocation4 + $0x1a8] sm:$0xff]  ;;  %v1027_v3 = vld [vmem:[#allocation4 + $0x1b8] sm:$0xff] }
 0x1c2   :  { %5073 = vmatpush1.bf16.msra.mxu1 %v6559_v46  ;;  %1107 = vmatprep.mubr.f32.mxu1 %v7919_v30  ;;  %v6591_v37 = vpack.c.bf16 %v1027_v3, %v1025_v25  ;;  %v1035_v25 = vld [vmem:[#allocation4 + $0x1f8] sm:$0xff]  ;;  %v980_v46 = vld [vmem:[#allocation4 + $0x48] sm:$0xff] }
 0x1c3   :  { %5075 = vmatprep.subr.bf16.mxu1 %v6562_v6  ;;  %7942 = vst [vmem:[#allocation47_spill] sm:$0xff] %v6576_v62  ;;  %v6604_v3 = vpack.c.bf16 %v1035_v25, %v1033_v56  ;;  %4464 = vmatprep.mubr.msk.f32.mxu0 %vm6082_vm8, %v7919_v30 }
 0x1c4   :  { %7947 = vst [vmem:[#allocation52_spill] sm:$0xff] %v6591_v37 }
 0x1c5   :  { %7951 = vst [vmem:[#allocation56_spill] sm:$0xff] %v6604_v3 }
 0x1c6   :  { %5077 = vmatpush1.bf16.msra.mxu1 %v6569_v29 }
 0x1c7   :  { %5079 = vmatprep.subr.bf16.mxu1 %v6573_v51  ;;  %v1024_v51 = vld [vmem:[#allocation4 + $0x1a0] sm:$0xff] }
 0x1ca   :  { %5081 = vmatpush1.bf16.msra.mxu1 %v6576_v62  ;;  %v1026_v62 = vld [vmem:[#allocation4 + $0x1b0] sm:$0xff] }
 0x1cb   :  { %5083 = vmatprep.subr.bf16.mxu1 %v6579_v42  ;;  %v6594_v19 = vpack.c.bf16 %v1026_v62, %v1024_v51  ;;  %v1028_v42 = vld [vmem:[#allocation4 + $0x1c0] sm:$0xff]  ;;  %v1034_v62 = vld [vmem:[#allocation4 + $0x1f0] sm:$0xff] }
 0x1cc   :  { %v1032_v51 = vld [vmem:[#allocation4 + $0x1e0] sm:$0xff] }
 0x1cd   :  { %7948 = vst [vmem:[#allocation53_spill] sm:$0xff] %v6594_v19 }
 0x1ce   :  { %5085 = vmatpush1.bf16.msra.mxu1 %v6582_v21  ;;  %v1030_v21 = vld [vmem:[#allocation4 + $0x1d0] sm:$0xff] }
 0x1cf   :  { %5087 = vmatprep.subr.bf16.mxu1 %v6585_v23  ;;  %v6600_v38 = vpack.c.bf16 %v1030_v21, %v1028_v42  ;;  %v6610_v42 = vpack.c.bf16 %v974_v53, %v972_v48  ;;  %v971_v21 = vld [vmem:[#allocation4] sm:$0xff]  ;;  %v978_v23 = vld [vmem:[#allocation4 + $0x38] sm:$0xff] }
 0x1d0   :  { %v982_v48 = vld [vmem:[#allocation4 + $0x58] sm:$0xff] }
 0x1d1   :  { %7950 = vst [vmem:[#allocation55_spill] sm:$0xff] %v6600_v38  ;;  %7953 = vst [vmem:[#allocation58_spill] sm:$0xff] %v6610_v42 }
 0x1d2   :  { %5089 = vmatpush1.bf16.msra.mxu1 %v6588_v49  ;;  %v6606_v49 = vpack.c.bf16 %v1034_v62, %v1032_v51 }
 0x1d3   :  { %5091 = vmatprep.subr.bf16.mxu1 %v6591_v37 }
 0x1d4   :  { %7952 = vst [vmem:[#allocation57_spill] sm:$0xff] %v6606_v49 }
 0x1d6   :  { %5093 = vmatpush1.bf16.msra.mxu1 %v6594_v19 }
 0x1d7   :  { %5095 = vmatprep.subr.bf16.mxu1 %v6597_v10 }
 0x1da   :  { %5097 = vmatpush1.bf16.msra.mxu1 %v6600_v38  ;;  %v973_v38 = vld [vmem:[#allocation4 + $0x10] sm:$0xff] }
 0x1db   :  { %5099 = vmatprep.subr.bf16.mxu1 %v6604_v3  ;;  %v6617_v62 = vpack.c.bf16 %v973_v38, %v971_v21  ;;  %v976_v3 = vld [vmem:[#allocation4 + $0x28] sm:$0xff]  ;;  %v975_v21 = vld [vmem:[#allocation4 + $0x20] sm:$0xff] }
 0x1dc   :  { %v6627_v38 = vpack.c.bf16 %v978_v23, %v976_v3  ;;  %v6650_v3 = vpack.c.bf16 %v982_v48, %v980_v46  ;;  %v988_v46 = vld [vmem:[#allocation4 + $0x88] sm:$0xff]  ;;  %v990_v48 = vld [vmem:[#allocation4 + $0x98] sm:$0xff] }
 0x1de   :  { %5101 = vmatpush1.bf16.msra.mxu1 %v6606_v49  ;;  %7958 = vst [vmem:[#allocation60_spill] sm:$0xff] %v6650_v3 }
 0x1df   :  { %5103 = vmatprep.subr.bf16.mxu1 %v6610_v42 }
 0x294   :  { %v4448_v10 = vpop.f32.mrb[8].mxu0  ;;  %v4459_v19 = vpop.f32.mrb[0].mxu1 }
 0x295   :  { %v6613_v56 = vmax.f32 %v4448_v10, %v4459_v19  ;;  %v877_v25 = vpop.f32.mrb[9].mxu0  ;;  %v960_v37 = vpop.f32.mrb[1].mxu1 }
 0x296   :  { %v6615_v51 = vmax.f32 %v877_v25, %v960_v37  ;;  %v977_v25 = vld [vmem:[#allocation4 + $0x30] sm:$0xff] }
 0x297   :  { %v1039_v49 = vrot.slane %v6613_v56, 1  ;;  %v7954_v53 = vrot.slane %v6613_v56, 2  ;;  %v7955_v61 = vrot.slane %v6613_v56, 3  ;;  %v7956_v7 = vrot.slane %v6613_v56, 4 }
 0x298   :  { %v1038_v29 = vrot.slane %v6615_v51, 1  ;;  %v1230_v19 = vrot.slane %v6615_v51, 2  ;;  %v1349_v10 = vrot.slane %v6615_v51, 3  ;;  %v1468_v37 = vrot.slane %v6615_v51, 4 }
 0x29a   :  { %v1040_v6 = vsel %vm156_vm2, %v1038_v29, %v1039_v49  ;;  %v6633_v42 = vsel %vm384_vm4, %v1230_v19, %v7954_v53  ;;  %v6638_v54 = vsel %vm522_vm0, %v1349_v10, %v7955_v61  ;;  %v6643_v23 = vsel %vm660_vm1, %v1468_v37, %v7956_v7  ;;  %v979_v53 = vld [vmem:[#allocation4 + $0x40] sm:$0xff]  ;;  %v981_v19 = vld [vmem:[#allocation4 + $0x50] sm:$0xff]  ;;  %v984_v61 = vld [vmem:[#allocation4 + $0x68] sm:$0xff] }
 0x29b   :  { %1108 = vmatmul.mubr.f32.vlgmr.msra.gmra.mrb[2].mxu1 %v1040_v6  ;;  %v6647_v29 = vpack.c.bf16 %v977_v25, %v975_v21  ;;  %v986_v10 = vld [vmem:[#allocation4 + $0x78] sm:$0xff]  ;;  %v6653_v7 = vpack.c.bf16 %v981_v19, %v979_v53  ;;  %v983_v37 = vld [vmem:[#allocation4 + $0x60] sm:$0xff]  ;;  %v985_v21 = vld [vmem:[#allocation4 + $0x70] sm:$0xff]  ;;  %v6664_v25 = vpack.c.bf16 %v990_v48, %v988_v46 }
 0x29c   :  { %5105 = vmatpush1.bf16.msra.mxu1 %v6617_v62  ;;  %1113 = vmatprep.mubr.f32.mxu1 %v7919_v30  ;;  %v6657_v6 = vpack.c.bf16 %v986_v10, %v984_v61  ;;  %v987_v53 = vld [vmem:[#allocation4 + $0x80] sm:$0xff]  ;;  %v989_v19 = vld [vmem:[#allocation4 + $0x90] sm:$0xff]  ;;  %v992_v61 = vld [vmem:[#allocation4 + $0xa8] sm:$0xff] }
 0x29d   :  { %7957 = vst [vmem:[#allocation59_spill] sm:$0xff] %v6647_v29  ;;  %5107 = vmatprep.subr.bf16.mxu1 %v6627_v38  ;;  %7959 = vst [vmem:[#allocation61_spill] sm:$0xff] %v6653_v7  ;;  %v994_v10 = vld [vmem:[#allocation4 + $0xb8] sm:$0xff] }
 0x29e   :  { %7960 = vst [vmem:[#allocation62_spill] sm:$0xff] %v6657_v6  ;;  %7962 = vst [vmem:[#allocation64_spill] sm:$0xff] %v6664_v25  ;;  %v998_v46 = vld [vmem:[#allocation4 + $0xd8] sm:$0xff] }
 0x29f   :  { %1114 = vmatmul.mubr.f32.gmra.mrb[4].mxu1 %v1039_v49  ;;  %v6661_v49 = vpack.c.bf16 %v985_v21, %v983_v37  ;;  %v991_v37 = vld [vmem:[#allocation4 + $0xa0] sm:$0xff]  ;;  %v993_v21 = vld [vmem:[#allocation4 + $0xb0] sm:$0xff] }
 0x2a0   :  { %5109 = vmatpush1.bf16.msra.mxu1 %v6647_v29  ;;  %1184 = vmatprep.mubr.f32.mxu1 %v7919_v30  ;;  %v6674_v48 = vpack.c.bf16 %v993_v21, %v991_v37  ;;  %v995_v29 = vld [vmem:[#allocation4 + $0xc0] sm:$0xff]  ;;  %v1199_v37 = vld [vmem:[#allocation4 + $0x208] sm:$0xff]  ;;  %v1201_v21 = vld [vmem:[#allocation4 + $0x218] sm:$0xff] }
 0x2a1   :  { %5111 = vmatprep.subr.bf16.mxu1 %v6650_v3  ;;  %7961 = vst [vmem:[#allocation63_spill] sm:$0xff] %v6661_v49  ;;  %v6668_v3 = vpack.c.bf16 %v989_v19, %v987_v53  ;;  %v1000_v53 = vld [vmem:[#allocation4 + $0xe8] sm:$0xff]  ;;  %v1002_v19 = vld [vmem:[#allocation4 + $0xf8] sm:$0xff] }
 0x2a2   :  { %7965 = vst [vmem:[#allocation67_spill] sm:$0xff] %v6674_v48 }
 0x2a3   :  { %7963 = vst [vmem:[#allocation65_spill] sm:$0xff] %v6668_v3 }
 0x2a4   :  { %5113 = vmatpush1.bf16.msra.mxu1 %v6653_v7  ;;  %v6671_v7 = vpack.c.bf16 %v994_v10, %v992_v61  ;;  %v6683_v10 = vpack.c.bf16 %v1002_v19, %v1000_v53 }
 0x2a5   :  { %5115 = vmatprep.subr.bf16.mxu1 %v6657_v6  ;;  %v996_v6 = vld [vmem:[#allocation4 + $0xc8] sm:$0xff] }
 0x2a6   :  { %7964 = vst [vmem:[#allocation66_spill] sm:$0xff] %v6671_v7  ;;  %v6677_v57 = vpack.c.bf16 %v998_v46, %v996_v6  ;;  %v6689_v46 = vpack.c.bf16 %v1201_v21, %v1199_v37  ;;  %v1208_v21 = vld [vmem:[#allocation4 + $0x250] sm:$0xff] }
 0x2a8   :  { %5117 = vmatpush1.bf16.msra.mxu1 %v6661_v49  ;;  %7966 = vst [vmem:[#allocation68_spill] sm:$0xff] %v6677_v57  ;;  %v997_v49 = vld [vmem:[#allocation4 + $0xd0] sm:$0xff]  ;;  %7969 = vst [vmem:[#allocation71_spill] sm:$0xff] %v6689_v46 }
 0x2a9   :  { %5119 = vmatprep.subr.bf16.mxu1 %v6664_v25  ;;  %v6680_v61 = vpack.c.bf16 %v997_v49, %v995_v29  ;;  %v999_v25 = vld [vmem:[#allocation4 + $0xe0] sm:$0xff]  ;;  %v1203_v29 = vld [vmem:[#allocation4 + $0x228] sm:$0xff]  ;;  %v1205_v49 = vld [vmem:[#allocation4 + $0x238] sm:$0xff] }
 0x2aa   :  { %v6695_v19 = vpack.c.bf16 %v1205_v49, %v1203_v29  ;;  %v1211_v29 = vld [vmem:[#allocation4 + $0x268] sm:$0xff]  ;;  %v1213_v49 = vld [vmem:[#allocation4 + $0x278] sm:$0xff] }
 0x2ab   :  { %7967 = vst [vmem:[#allocation69_spill] sm:$0xff] %v6680_v61 }
 0x2ac   :  { %5121 = vmatpush1.bf16.msra.mxu1 %v6668_v3  ;;  %v1001_v3 = vld [vmem:[#allocation4 + $0xf0] sm:$0xff]  ;;  %7971 = vst [vmem:[#allocation73_spill] sm:$0xff] %v6695_v19 }
 0x2ad   :  { %5123 = vmatprep.subr.bf16.mxu1 %v6671_v7  ;;  %v6686_v6 = vpack.c.bf16 %v1001_v3, %v999_v25  ;;  %v1198_v7 = vld [vmem:[#allocation4 + $0x200] sm:$0xff]  ;;  %v1207_v3 = vld [vmem:[#allocation4 + $0x248] sm:$0xff]  ;;  %v1209_v25 = vld [vmem:[#allocation4 + $0x258] sm:$0xff] }
 0x2af   :  { %7968 = vst [vmem:[#allocation70_spill] sm:$0xff] %v6686_v6 }
 0x2b0   :  { %5125 = vmatpush1.bf16.msra.mxu1 %v6674_v48  ;;  %v1200_v48 = vld [vmem:[#allocation4 + $0x210] sm:$0xff] }
 0x2b1   :  { %5127 = vmatprep.subr.bf16.mxu1 %v6677_v57  ;;  %v6692_v53 = vpack.c.bf16 %v1200_v48, %v1198_v7  ;;  %v1202_v57 = vld [vmem:[#allocation4 + $0x220] sm:$0xff]  ;;  %v6703_v7 = vpack.c.bf16 %v1209_v25, %v1207_v3  ;;  %v1215_v3 = vld [vmem:[#allocation4 + $0x288] sm:$0xff]  ;;  %v1217_v25 = vld [vmem:[#allocation4 + $0x298] sm:$0xff] }
 0x2b2   :  { %v1206_v48 = vld [vmem:[#allocation4 + $0x240] sm:$0xff] }
 0x2b3   :  { %7970 = vst [vmem:[#allocation72_spill] sm:$0xff] %v6692_v53  ;;  %7973 = vst [vmem:[#allocation75_spill] sm:$0xff] %v6703_v7 }
 0x2b4   :  { %5129 = vmatpush1.bf16.msra.mxu1 %v6680_v61  ;;  %v1204_v61 = vld [vmem:[#allocation4 + $0x230] sm:$0xff] }
 0x2b5   :  { %5131 = vmatprep.subr.bf16.mxu1 %v6683_v10  ;;  %v6700_v37 = vpack.c.bf16 %v1204_v61, %v1202_v57  ;;  %v1210_v57 = vld [vmem:[#allocation4 + $0x260] sm:$0xff]  ;;  %v1212_v61 = vld [vmem:[#allocation4 + $0x270] sm:$0xff] }
 0x2b7   :  { %7972 = vst [vmem:[#allocation74_spill] sm:$0xff] %v6700_v37 }
 0x2b8   :  { %5133 = vmatpush1.bf16.msra.mxu1 %v6686_v6  ;;  %v1221_v6 = vld [vmem:[#allocation4 + $0x2b8] sm:$0xff] }
 0x2b9   :  { %5135 = vmatprep.subr.bf16.mxu1 %v6689_v46  ;;  %v6707_v46 = vpack.c.bf16 %v1208_v21, %v1206_v48  ;;  %v1214_v48 = vld [vmem:[#allocation4 + $0x280] sm:$0xff]  ;;  %v1216_v21 = vld [vmem:[#allocation4 + $0x290] sm:$0xff] }
 0x2bb   :  { %1185 = vmatmul.mubr.f32.vlgmr.msra.gmra.mrb[2].mxu1 %v6615_v51  ;;  %7974 = vst [vmem:[#allocation76_spill] sm:$0xff] %v6707_v46  ;;  %v6711_v51 = vpack.c.bf16 %v1213_v49, %v1211_v29  ;;  %v6720_v29 = vpack.c.bf16 %v1216_v21, %v1214_v48  ;;  %v1227_v48 = vld [vmem:[#allocation4 + $0x2e8] sm:$0xff]  ;;  %v1229_v21 = vld [vmem:[#allocation4 + $0x2f8] sm:$0xff] }
 0x2bc   :  { %5137 = vmatpush1.bf16.msra.mxu1 %v6692_v53  ;;  %1190 = vmatprep.mubr.f32.mxu1 %v7919_v30  ;;  %v6717_v53 = vpack.c.bf16 %v1217_v25, %v1215_v3 }
 0x2bd   :  { %5139 = vmatprep.subr.bf16.mxu1 %v6695_v19  ;;  %7975 = vst [vmem:[#allocation77_spill] sm:$0xff] %v6711_v51  ;;  %v6714_v19 = vpack.c.bf16 %v1212_v61, %v1210_v57  ;;  %7978 = vst [vmem:[#allocation80_spill] sm:$0xff] %v6720_v29  ;;  %v1223_v57 = vld [vmem:[#allocation4 + $0x2c8] sm:$0xff]  ;;  %v1225_v61 = vld [vmem:[#allocation4 + $0x2d8] sm:$0xff] }
 0x2be   :  { %7977 = vst [vmem:[#allocation79_spill] sm:$0xff] %v6717_v53  ;;  %v6729_v25 = vpack.c.bf16 %v1225_v61, %v1223_v57 }
 0x2bf   :  { %1191 = vmatmul.mubr.f32.gmra.mrb[4].mxu1 %v6613_v56  ;;  %7976 = vst [vmem:[#allocation78_spill] sm:$0xff] %v6714_v19 }
 0x2c0   :  { %5141 = vmatpush1.bf16.msra.mxu1 %v6700_v37  ;;  %1299 = vmatprep.mubr.f32.mxu1 %v7919_v30  ;;  %v1219_v37 = vld [vmem:[#allocation4 + $0x2a8] sm:$0xff]  ;;  %7981 = vst [vmem:[#allocation83_spill] sm:$0xff] %v6729_v25 }
 0x2c1   :  { %5143 = vmatprep.subr.bf16.mxu1 %v6703_v7  ;;  %v6723_v49 = vpack.c.bf16 %v1221_v6, %v1219_v37  ;;  %v1218_v7 = vld [vmem:[#allocation4 + $0x2a0] sm:$0xff]  ;;  %v6735_v37 = vpack.c.bf16 %v1229_v21, %v1227_v48 }
 0x2c3   :  { %7979 = vst [vmem:[#allocation81_spill] sm:$0xff] %v6723_v49 }
 0x2c4   :  { %5145 = vmatpush1.bf16.msra.mxu1 %v6707_v46  ;;  %v1220_v46 = vld [vmem:[#allocation4 + $0x2b0] sm:$0xff] }
 0x2c5   :  { %5147 = vmatprep.subr.bf16.mxu1 %v6711_v51  ;;  %v6726_v3 = vpack.c.bf16 %v1220_v46, %v1218_v7  ;;  %v1222_v51 = vld [vmem:[#allocation4 + $0x2c0] sm:$0xff]  ;;  %v1318_v46 = vld [vmem:[#allocation4 + $0x308] sm:$0xff]  ;;  %v1320_v7 = vld [vmem:[#allocation4 + $0x318] sm:$0xff] }
 0x2c6   :  { %v6741_v61 = vpack.c.bf16 %v1320_v7, %v1318_v46  ;;  %v1327_v7 = vld [vmem:[#allocation4 + $0x350] sm:$0xff] }
 0x2c7   :  { %7980 = vst [vmem:[#allocation82_spill] sm:$0xff] %v6726_v3 }
 0x2c8   :  { %5149 = vmatpush1.bf16.msra.mxu1 %v6714_v19  ;;  %v1224_v19 = vld [vmem:[#allocation4 + $0x2d0] sm:$0xff]  ;;  %7984 = vst [vmem:[#allocation86_spill] sm:$0xff] %v6741_v61 }
 0x2c9   :  { %5151 = vmatprep.subr.bf16.mxu1 %v6717_v53  ;;  %v6732_v6 = vpack.c.bf16 %v1224_v19, %v1222_v51  ;;  %v1226_v53 = vld [vmem:[#allocation4 + $0x2e0] sm:$0xff]  ;;  %v1322_v19 = vld [vmem:[#allocation4 + $0x328] sm:$0xff]  ;;  %v1324_v51 = vld [vmem:[#allocation4 + $0x338] sm:$0xff] }
 0x2ca   :  { %v6747_v21 = vpack.c.bf16 %v1324_v51, %v1322_v19  ;;  %v1330_v19 = vld [vmem:[#allocation4 + $0x368] sm:$0xff]  ;;  %v1332_v51 = vld [vmem:[#allocation4 + $0x378] sm:$0xff] }
 0x2cb   :  { %7982 = vst [vmem:[#allocation84_spill] sm:$0xff] %v6732_v6 }
 0x2cc   :  { %5153 = vmatpush1.bf16.msra.mxu1 %v6720_v29  ;;  %v1228_v29 = vld [vmem:[#allocation4 + $0x2f0] sm:$0xff]  ;;  %7986 = vst [vmem:[#allocation88_spill] sm:$0xff] %v6747_v21 }
 0x2cd   :  { %5155 = vmatprep.subr.bf16.mxu1 %v6723_v49  ;;  %v6738_v57 = vpack.c.bf16 %v1228_v29, %v1226_v53  ;;  %v1317_v49 = vld [vmem:[#allocation4 + $0x300] sm:$0xff]  ;;  %v1326_v53 = vld [vmem:[#allocation4 + $0x348] sm:$0xff]  ;;  %v1328_v29 = vld [vmem:[#allocation4 + $0x358] sm:$0xff] }
 0x2cf   :  { %7983 = vst [vmem:[#allocation85_spill] sm:$0xff] %v6738_v57 }
 0x2d0   :  { %5157 = vmatpush1.bf16.msra.mxu1 %v6726_v3  ;;  %v1319_v3 = vld [vmem:[#allocation4 + $0x310] sm:$0xff] }
 0x2d1   :  { %5159 = vmatprep.subr.bf16.mxu1 %v6729_v25  ;;  %v6744_v48 = vpack.c.bf16 %v1319_v3, %v1317_v49  ;;  %v1321_v25 = vld [vmem:[#allocation4 + $0x320] sm:$0xff]  ;;  %v6755_v49 = vpack.c.bf16 %v1328_v29, %v1326_v53  ;;  %v1331_v53 = vld [vmem:[#allocation4 + $0x370] sm:$0xff]  ;;  %v1334_v29 = vld [vmem:[#allocation4 + $0x388] sm:$0xff] }
 0x2d2   :  { %v1325_v3 = vld [vmem:[#allocation4 + $0x340] sm:$0xff] }
 0x2d3   :  { %7985 = vst [vmem:[#allocation87_spill] sm:$0xff] %v6744_v48  ;;  %7988 = vst [vmem:[#allocation90_spill] sm:$0xff] %v6755_v49 }
 0x2d4   :  { %5161 = vmatpush1.bf16.msra.mxu1 %v6732_v6  ;;  %v1323_v6 = vld [vmem:[#allocation4 + $0x330] sm:$0xff] }
 0x2d5   :  { %5163 = vmatprep.subr.bf16.mxu1 %v6735_v37  ;;  %v6752_v46 = vpack.c.bf16 %v1323_v6, %v1321_v25  ;;  %v6764_v25 = vpack.c.bf16 %v1332_v51, %v1330_v19  ;;  %v1329_v6 = vld [vmem:[#allocation4 + $0x360] sm:$0xff] }
 0x2d7   :  { %7987 = vst [vmem:[#allocation89_spill] sm:$0xff] %v6752_v46  ;;  %7991 = vst [vmem:[#allocation92_spill] sm:$0xff] %v6764_v25 }
 0x2d8   :  { %5165 = vmatpush1.bf16.msra.mxu1 %v6738_v57  ;;  %v1340_v57 = vld [vmem:[#allocation4 + $0x3b8] sm:$0xff] }
 0x2d9   :  { %5167 = vmatprep.subr.bf16.mxu1 %v6741_v61  ;;  %v7989_v61 = vrot.slane %v6613_v56, 2 }
 0x2db   :  { %1300 = vmatmul.mubr.f32.vlgmr.msra.gmra.mrb[2].mxu1 %v6633_v42  ;;  %v6760_v42 = vpack.c.bf16 %v1327_v7, %v1325_v3  ;;  %v1333_v3 = vld [vmem:[#allocation4 + $0x380] sm:$0xff]  ;;  %v1335_v7 = vld [vmem:[#allocation4 + $0x390] sm:$0xff] }
 0x2dc   :  { %5169 = vmatpush1.bf16.msra.mxu1 %v6744_v48  ;;  %1305 = vmatprep.mubr.f32.mxu1 %v7919_v30  ;;  %v6767_v48 = vpack.c.bf16 %v1331_v53, %v1329_v6  ;;  %v6773_v19 = vpack.c.bf16 %v1335_v7, %v1333_v3  ;;  %v1342_v6 = vld [vmem:[#allocation4 + $0x3c8] sm:$0xff]  ;;  %v1344_v53 = vld [vmem:[#allocation4 + $0x3d8] sm:$0xff] }
 0x2dd   :  { %5171 = vmatprep.subr.bf16.mxu1 %v6747_v21  ;;  %7990 = vst [vmem:[#allocation91_spill] sm:$0xff] %v6760_v42  ;;  %v1336_v21 = vld [vmem:[#allocation4 + $0x398] sm:$0xff]  ;;  %v1346_v3 = vld [vmem:[#allocation4 + $0x3e8] sm:$0xff] }
 0x2de   :  { %7992 = vst [vmem:[#allocation93_spill] sm:$0xff] %v6767_v48  ;;  %7994 = vst [vmem:[#allocation95_spill] sm:$0xff] %v6773_v19  ;;  %v1348_v7 = vld [vmem:[#allocation4 + $0x3f8] sm:$0xff] }
 0x2df   :  { %1306 = vmatmul.mubr.f32.gmra.mrb[4].mxu1 %v7989_v61  ;;  %v6770_v61 = vpack.c.bf16 %v1336_v21, %v1334_v29  ;;  %v6782_v29 = vpack.c.bf16 %v1344_v53, %v1342_v6 }
 0x2e0   :  { %5173 = vmatpush1.bf16.msra.mxu1 %v6752_v46  ;;  %1418 = vmatprep.mubr.f32.mxu1 %v7919_v30  ;;  %v1338_v46 = vld [vmem:[#allocation4 + $0x3a8] sm:$0xff] }
 0x2e1   :  { %5175 = vmatprep.subr.bf16.mxu1 %v6755_v49  ;;  %7993 = vst [vmem:[#allocation94_spill] sm:$0xff] %v6770_v61  ;;  %v6776_v51 = vpack.c.bf16 %v1340_v57, %v1338_v46  ;;  %v1337_v49 = vld [vmem:[#allocation4 + $0x3a0] sm:$0xff]  ;;  %7997 = vst [vmem:[#allocation98_spill] sm:$0xff] %v6782_v29  ;;  %v6788_v46 = vpack.c.bf16 %v1348_v7, %v1346_v3 }
 0x2e3   :  { %7995 = vst [vmem:[#allocation96_spill] sm:$0xff] %v6776_v51 }
 0x2e4   :  { %5177 = vmatpush1.bf16.msra.mxu1 %v6760_v42  ;;  %v1339_v42 = vld [vmem:[#allocation4 + $0x3b0] sm:$0xff] }
 0x2e5   :  { %5179 = vmatprep.subr.bf16.mxu1 %v6764_v25  ;;  %v6779_v21 = vpack.c.bf16 %v1339_v42, %v1337_v49  ;;  %v1341_v25 = vld [vmem:[#allocation4 + $0x3c0] sm:$0xff]  ;;  %v1437_v49 = vld [vmem:[#allocation4 + $0x408] sm:$0xff]  ;;  %v1439_v42 = vld [vmem:[#allocation4 + $0x418] sm:$0xff] }
 0x2e6   :  { %v6794_v53 = vpack.c.bf16 %v1439_v42, %v1437_v49  ;;  %v1446_v42 = vld [vmem:[#allocation4 + $0x450] sm:$0xff] }
 0x2e7   :  { %7996 = vst [vmem:[#allocation97_spill] sm:$0xff] %v6779_v21 }
 0x2e8   :  { %5181 = vmatpush1.bf16.msra.mxu1 %v6767_v48  ;;  %v1343_v48 = vld [vmem:[#allocation4 + $0x3d0] sm:$0xff]  ;;  %8000 = vst [vmem:[#allocation101_spill] sm:$0xff] %v6794_v53 }
 0x2e9   :  { %5183 = vmatprep.subr.bf16.mxu1 %v6770_v61  ;;  %v6785_v57 = vpack.c.bf16 %v1343_v48, %v1341_v25  ;;  %v1345_v61 = vld [vmem:[#allocation4 + $0x3e0] sm:$0xff]  ;;  %v1441_v48 = vld [vmem:[#allocation4 + $0x428] sm:$0xff]  ;;  %v1443_v25 = vld [vmem:[#allocation4 + $0x438] sm:$0xff] }
 0x2ea   :  { %v6800_v7 = vpack.c.bf16 %v1443_v25, %v1441_v48  ;;  %v1449_v48 = vld [vmem:[#allocation4 + $0x468] sm:$0xff]  ;;  %v1451_v25 = vld [vmem:[#allocation4 + $0x478] sm:$0xff] }
 0x2eb   :  { %7998 = vst [vmem:[#allocation99_spill] sm:$0xff] %v6785_v57 }
 0x2ec   :  { %5185 = vmatpush1.bf16.msra.mxu1 %v6773_v19  ;;  %v1347_v19 = vld [vmem:[#allocation4 + $0x3f0] sm:$0xff]  ;;  %8002 = vst [vmem:[#allocation103_spill] sm:$0xff] %v6800_v7 }
 0x2ed   :  { %5187 = vmatprep.subr.bf16.mxu1 %v6776_v51  ;;  %v6791_v6 = vpack.c.bf16 %v1347_v19, %v1345_v61  ;;  %v1436_v51 = vld [vmem:[#allocation4 + $0x400] sm:$0xff]  ;;  %v1445_v61 = vld [vmem:[#allocation4 + $0x448] sm:$0xff]  ;;  %v1447_v19 = vld [vmem:[#allocation4 + $0x458] sm:$0xff] }
 0x2ef   :  { %7999 = vst [vmem:[#allocation100_spill] sm:$0xff] %v6791_v6 }
 0x2f0   :  { %5189 = vmatpush1.bf16.msra.mxu1 %v6779_v21  ;;  %v1438_v21 = vld [vmem:[#allocation4 + $0x410] sm:$0xff] }
 0x2f1   :  { %5191 = vmatprep.subr.bf16.mxu1 %v6782_v29  ;;  %v6797_v3 = vpack.c.bf16 %v1438_v21, %v1436_v51  ;;  %v1440_v29 = vld [vmem:[#allocation4 + $0x420] sm:$0xff]  ;;  %v6808_v51 = vpack.c.bf16 %v1447_v19, %v1445_v61  ;;  %v1450_v61 = vld [vmem:[#allocation4 + $0x470] sm:$0xff]  ;;  %v1453_v19 = vld [vmem:[#allocation4 + $0x488] sm:$0xff] }
 0x2f2   :  { %v1444_v21 = vld [vmem:[#allocation4 + $0x440] sm:$0xff] }
 0x2f3   :  { %8001 = vst [vmem:[#allocation102_spill] sm:$0xff] %v6797_v3  ;;  %8004 = vst [vmem:[#allocation105_spill] sm:$0xff] %v6808_v51 }
 0x2f4   :  { %5193 = vmatpush1.bf16.msra.mxu1 %v6785_v57  ;;  %v1442_v57 = vld [vmem:[#allocation4 + $0x430] sm:$0xff] }
 0x2f5   :  { %5195 = vmatprep.subr.bf16.mxu1 %v6788_v46  ;;  %v6805_v49 = vpack.c.bf16 %v1442_v57, %v1440_v29  ;;  %v6817_v29 = vpack.c.bf16 %v1451_v25, %v1449_v48  ;;  %v1448_v57 = vld [vmem:[#allocation4 + $0x460] sm:$0xff] }
 0x2f7   :  { %8003 = vst [vmem:[#allocation104_spill] sm:$0xff] %v6805_v49  ;;  %8007 = vst [vmem:[#allocation107_spill] sm:$0xff] %v6817_v29 }
 0x2f8   :  { %5197 = vmatpush1.bf16.msra.mxu1 %v6791_v6  ;;  %v1459_v6 = vld [vmem:[#allocation4 + $0x4b8] sm:$0xff] }
 0x2f9   :  { %5199 = vmatprep.subr.bf16.mxu1 %v6794_v53  ;;  %v8005_v53 = vrot.slane %v6613_v56, 3 }
 0x2fb   :  { %1419 = vmatmul.mubr.f32.vlgmr.msra.gmra.mrb[2].mxu1 %v6638_v54  ;;  %v6813_v54 = vpack.c.bf16 %v1446_v42, %v1444_v21  ;;  %v1452_v21 = vld [vmem:[#allocation4 + $0x480] sm:$0xff]  ;;  %v1454_v42 = vld [vmem:[#allocation4 + $0x490] sm:$0xff] }
 0x2fc   :  { %5201 = vmatpush1.bf16.msra.mxu1 %v6797_v3  ;;  %1424 = vmatprep.mubr.f32.mxu1 %v7919_v30  ;;  %v6820_v3 = vpack.c.bf16 %v1450_v61, %v1448_v57  ;;  %v6826_v48 = vpack.c.bf16 %v1454_v42, %v1452_v21  ;;  %v1461_v57 = vld [vmem:[#allocation4 + $0x4c8] sm:$0xff]  ;;  %v1463_v61 = vld [vmem:[#allocation4 + $0x4d8] sm:$0xff] }
 0x2fd   :  { %5203 = vmatprep.subr.bf16.mxu1 %v6800_v7  ;;  %8006 = vst [vmem:[#allocation106_spill] sm:$0xff] %v6813_v54  ;;  %v1455_v7 = vld [vmem:[#allocation4 + $0x498] sm:$0xff]  ;;  %v1465_v21 = vld [vmem:[#allocation4 + $0x4e8] sm:$0xff] }
 0x2fe   :  { %8008 = vst [vmem:[#allocation108_spill] sm:$0xff] %v6820_v3  ;;  %8010 = vst [vmem:[#allocation110_spill] sm:$0xff] %v6826_v48  ;;  %v1467_v42 = vld [vmem:[#allocation4 + $0x4f8] sm:$0xff] }
 0x2ff   :  { %1425 = vmatmul.mubr.f32.gmra.mrb[4].mxu1 %v8005_v53  ;;  %v6823_v53 = vpack.c.bf16 %v1455_v7, %v1453_v19  ;;  %v6835_v19 = vpack.c.bf16 %v1463_v61, %v1461_v57  ;;  %v4120_v61 = vld [vmem:[%s7750_s3 + $0x120] sm:$0xff] }
 0x300   :  { %5205 = vmatpush1.bf16.msra.mxu1 %v6805_v49  ;;  %1537 = vmatprep.mubr.f32.mxu1 %v7919_v30  ;;  %v1457_v49 = vld [vmem:[#allocation4 + $0x4a8] sm:$0xff] }
 0x301   :  { %5207 = vmatprep.subr.bf16.mxu1 %v6808_v51  ;;  %8009 = vst [vmem:[#allocation109_spill] sm:$0xff] %v6823_v53  ;;  %v6829_v25 = vpack.c.bf16 %v1459_v6, %v1457_v49  ;;  %v1456_v51 = vld [vmem:[#allocation4 + $0x4a0] sm:$0xff]  ;;  %v6841_v49 = vpack.c.bf16 %v1467_v42, %v1465_v21  ;;  %v4121_v21 = vld [vmem:[%s7750_s3 + $0x128] sm:$0xff] }
 0x302   :  { %v6884_v42 = vpack.c.bf16 %v4121_v21, %v4120_v61  ;;  %v4126_v21 = vld [vmem:[%s7750_s3 + $0x150] sm:$0xff] }
 0x303   :  { %8012 = vst [vmem:[#allocation112_spill] sm:$0xff] %v6841_v49 }
 0x304   :  { %5209 = vmatpush1.bf16.msra.mxu1 %v6813_v54  ;;  %v1458_v54 = vld [vmem:[#allocation4 + $0x4b0] sm:$0xff]  ;;  %8017 = vst [vmem:[#allocation116_spill] sm:$0xff] %v6884_v42 }
 0x305   :  { %5211 = vmatprep.subr.bf16.mxu1 %v6817_v29  ;;  %v6832_v7 = vpack.c.bf16 %v1458_v54, %v1456_v51  ;;  %v1460_v29 = vld [vmem:[#allocation4 + $0x4c0] sm:$0xff]  ;;  %v7866_v54 = vmov 0.0|0.0  }
 0x306   :  { %5230 = vmatprep.subr.bf16.mxu0 %v7866_v54 }
 0x308   :  { %5213 = vmatpush1.bf16.msra.mxu1 %v6820_v3  ;;  %v1462_v3 = vld [vmem:[#allocation4 + $0x4d0] sm:$0xff] }
 0x309   :  { %5215 = vmatprep.subr.bf16.mxu1 %v6823_v53  ;;  %v6838_v6 = vpack.c.bf16 %v1462_v3, %v1460_v29  ;;  %v1464_v53 = vld [vmem:[#allocation4 + $0x4e0] sm:$0xff]  ;;  %v8014_v3 = vrot.slane %v6613_v56, 4  ;;  %v4117_v56 = vld [vmem:[%s7750_s3 + $0x108] sm:$0xff] }
 0x30b   :  { %8011 = vst [vmem:[#allocation111_spill] sm:$0xff] %v6838_v6 }
 0x30c   :  { %5217 = vmatpush1.bf16.msra.mxu1 %v6826_v48  ;;  %v1466_v48 = vld [vmem:[#allocation4 + $0x4f0] sm:$0xff] }
 0x30d   :  { %5219 = vmatprep.subr.bf16.mxu1 %v6829_v25  ;;  %v6844_v51 = vpack.c.bf16 %v1466_v48, %v1464_v53  ;;  %v4118_v53 = vld [vmem:[%s7750_s3 + $0x110] sm:$0xff]  ;;  %v4119_v48 = vld [vmem:[%s7750_s3 + $0x118] sm:$0xff] }
 0x30e   :  { %v6874_v57 = vpack.c.bf16 %v4119_v48, %v4118_v53  ;;  %v4124_v53 = vld [vmem:[%s7750_s3 + $0x140] sm:$0xff]  ;;  %v4125_v48 = vld [vmem:[%s7750_s3 + $0x148] sm:$0xff] }
 0x30f   :  { %8013 = vst [vmem:[#allocation113_spill] sm:$0xff] %v6844_v51  ;;  %v6904_v61 = vpack.c.bf16 %v4125_v48, %v4124_v53  ;;  %v1556_v53 = vsub.s32 1, %v6516_v52 }
 0x310   :  { %5221 = vmatpush1.bf16.msra.mxu1 %v6832_v7  ;;  %8016 = vst [vmem:[#allocation115_spill] sm:$0xff] %v6874_v57 }
 0x311   :  { %5223 = vmatprep.subr.bf16.mxu1 %v6835_v19  ;;  %8019 = vst [vmem:[#allocation118_spill] sm:$0xff] %v6904_v61  ;;  %v6920_v48 = vrot.slane %v6521_v0, %v1556_v53 }
 0x313   :  { %8021 = vst [vmem:[#allocation120_spill] sm:$0xff] %v6920_v48 }
 0x314   :  { %5225 = vmatpush1.bf16.msra.mxu1 %v6838_v6 }
 0x315   :  { %5227 = vmatprep.subr.bf16.mxu1 %v6841_v49 }
 0x318   :  { %5229 = vmatpush1.bf16.msra.mxu1 %v6844_v51 }
 0x319   :  { %5286 = vmatprep.subr.bf16.mxu1 %v7866_v54 }
 0x31b   :  { %1538 = vmatmul.mubr.f32.vlgmr.msra.gmra.mrb[2].mxu1 %v6643_v23  ;;  %v4116_v23 = vld [vmem:[%s7750_s3 + $0x100] sm:$0xff] }
 0x31c   :  { %1543 = vmatprep.mubr.f32.mxu1 %v7919_v30  ;;  %v6864_v29 = vpack.c.bf16 %v4117_v56, %v4116_v23  ;;  %v4123_v23 = vld [vmem:[%s7750_s3 + $0x138] sm:$0xff] }
 0x31e   :  { %8015 = vst [vmem:[#allocation114_spill] sm:$0xff] %v6864_v29  ;;  %5288 = vmatpush3.bf16.msra.mxu1 %v6864_v29 }
 0x31f   :  { %1544 = vmatmul.mubr.f32.gmra.mrb[4].mxu1 %v8014_v3  ;;  %5289 = vmatprep.subr.bf16.mxu1 %v7866_v54  ;;  %v4122_v3 = vld [vmem:[%s7750_s3 + $0x130] sm:$0xff] }
 0x320   :  { %4576 = vmatprep.mubr.msk.f32.mxu1 %vm6082_vm8, %v7919_v30  ;;  %v6894_v56 = vpack.c.bf16 %v4123_v23, %v4122_v3  ;;  %v4127_v3 = vld [vmem:[%s7750_s3 + $0x158] sm:$0xff] }
 0x321   :  { %v6914_v23 = vpack.c.bf16 %v4127_v3, %v4126_v21 }
 0x322   :  { %5291 = vmatpush3.bf16.msra.mxu1 %v6874_v57  ;;  %8018 = vst [vmem:[#allocation117_spill] sm:$0xff] %v6894_v56 }
 0x323   :  { %5292 = vmatprep.subr.bf16.mxu1 %v7866_v54  ;;  %8020 = vst [vmem:[#allocation119_spill] sm:$0xff] %v6914_v23 }
 0x326   :  { %5294 = vmatpush3.bf16.msra.mxu1 %v6884_v42 }
 0x327   :  { %5295 = vmatprep.subr.bf16.mxu1 %v7866_v54 }
 0x32a   :  { %5297 = vmatpush3.bf16.msra.mxu1 %v6894_v56 }
 0x32b   :  { %5298 = vmatprep.subr.bf16.mxu1 %v7866_v54 }
 0x32e   :  { %5300 = vmatpush3.bf16.msra.mxu1 %v6904_v61  ;;  %v6923_v61 = vrot.slane %v6523_v44, %v1556_v53 }
 0x32f   :  { %5301 = vmatprep.subr.bf16.mxu1 %v7866_v54 }
 0x330   :  { %8022 = vst [vmem:[#allocation121_spill] sm:$0xff] %v6923_v61 }
 0x332   :  { %5303 = vmatpush3.bf16.msra.mxu1 %v6914_v23 }
 0x333   :  { %5304 = vmatprep.subr.bf16.mxu1 %v7866_v54 }
 0x3ee   :  { %v1539_v56 = vpop.f32.mrb[2].mxu1 }
 0x3ef   :  { %v1562_v42 = vadd.f32 %v6920_v48, %v1539_v56  ;;  %v1541_v57 = vpop.f32.mrb[3].mxu1  ;;  %v8023_v56 = vmov 0 }
 0x3f0   :  { %v1563_v29 = vadd.f32 %v6923_v61, %v1541_v57  ;;  %v8024_v56 = vsel %vm6931_vm10, 4294967295, %v8023_v56 }
 0x3f1   :  { %v1566_v21 = vmax.f32 %v1562_v42, 0.0  ;;  %8025 = vst [vmem:[#allocation122_spill] sm:$0xff] %v8024_v56  ;;  %v6935_v42 = vpop.permute.xlu1 %1572 }
 0x3f2   :  { %v1567_v3 = vmax.f32 %v1563_v29, 0.0  ;;  %v1545_v51 = vpop.f32.mrb[4].mxu1  ;;  %8026 = vst [vmem:[#allocation123_spill] sm:$0xff] %v6935_v42  ;;  %v4102_v29 = vld [vmem:[%s7750_s3 + $0x90] sm:$0xff] }
 0x3f3   :  { %v1564_v23 = vadd.f32 %v6920_v48, %v1545_v51  ;;  %v1547_v54 = vpop.f32.mrb[5].mxu1  ;;  %v8027_v51 = vmov 0.0|0.0   ;;  %v1729_v48 = vld [vmem:[%s7750_s3 + $0x18] sm:$0xff] }
 0x3f4   :  { %v1570_v49 = vmax.f32 %v1566_v21, %v1567_v3  ;;  %v1565_v52 = vadd.f32 %v6923_v61, %v1547_v54  ;;  %v4104_v21 = vld [vmem:[%s7750_s3 + $0xa0] sm:$0xff]  ;;  %v4105_v3 = vld [vmem:[%s7750_s3 + $0xa8] sm:$0xff] }
 0x3f5   :  { %v1568_v0 = vmax.f32 %v1564_v23, 0.0  ;;  %v4103_v23 = vld [vmem:[%s7750_s3 + $0x98] sm:$0xff] }
 0x3f6   :  { %v1569_v6 = vmax.f32 %v1565_v52, 0.0  ;;  %v4100_v52 = vld [vmem:[%s7750_s3 + $0x80] sm:$0xff]  ;;  %v6966_v53 = vpack.c.bf16 %v4103_v23, %v4102_v29  ;;  %v4109_v29 = vld [vmem:[%s7750_s3 + $0xc8] sm:$0xff] }
 0x3f8   :  { %v1571_v44 = vmax.f32 %v1568_v0, %v1569_v6  ;;  %v4101_v6 = vld [vmem:[%s7750_s3 + $0x88] sm:$0xff]  ;;  %8030 = vst [vmem:[#allocation126_spill] sm:$0xff] %v6966_v53  ;;  %v6978_v0 = vpack.c.bf16 %v4105_v3, %v4104_v21  ;;  %v4110_v21 = vld [vmem:[%s7750_s3 + $0xd0] sm:$0xff]  ;;  %v4111_v3 = vld [vmem:[%s7750_s3 + $0xd8] sm:$0xff] }
 0x3f9   :  { %v6954_v54 = vpack.c.bf16 %v4101_v6, %v4100_v52  ;;  %v4108_v6 = vld [vmem:[%s7750_s3 + $0xc0] sm:$0xff] }
 0x3fa   :  { %v5231_v57 = vpack.c.bf16 %v1571_v44, %v1570_v49  ;;  %v6950_v49 = vpop.permute.xlu1 %1651  ;;  %8031 = vst [vmem:[#allocation127_spill] sm:$0xff] %v6978_v0  ;;  %v4106_v44 = vld [vmem:[%s7750_s3 + $0xb0] sm:$0xff]  ;;  %v6998_v23 = vpack.c.bf16 %v4109_v29, %v4108_v6  ;;  %v4113_v6 = vld [vmem:[%s7750_s3 + $0xe8] sm:$0xff]  ;;  %v4128_v29 = vld [vmem:[%s7750_s3 + $0x160] sm:$0xff] }
 0x3fb   :  { %8028 = vst [vmem:[#allocation124_spill] sm:$0xff] %v6950_v49  ;;  %8029 = vst [vmem:[#allocation125_spill] sm:$0xff] %v6954_v54 }
 0x3fc   :  { %5233 = vmatpush3.bf16.msk.msra.mxu0 %vm6931_vm10, %v5231_v57  ;;  %8033 = vst [vmem:[#allocation129_spill] sm:$0xff] %v6998_v23 }
 0x3fd   :  { %5234 = vmatprep.subr.bf16.mxu0 %v8027_v51 }
 0x3ff   :  { %4465 = vmatmul.mubr.msk.f32.vlgmr.msra.gmra.mrb[10].mxu0 %vm1574_vm11, %v6935_v42  ;;  %v1728_v42 = vld [vmem:[%s7750_s3 + $0x10] sm:$0xff] }
 0x400   :  { %5237 = vmatpush3.bf16.msk.msra.mxu0 %vm6931_vm10, %v5231_v57  ;;  %4471 = vmatprep.mubr.msk.f32.mxu0 %vm6082_vm8, %v7919_v30  ;;  %v4107_v57 = vld [vmem:[%s7750_s3 + $0xb8] sm:$0xff] }
 0x401   :  { %5238 = vmatprep.subr.bf16.mxu0 %v8027_v51  ;;  %v6988_v52 = vpack.c.bf16 %v4107_v57, %v4106_v44  ;;  %v7008_v44 = vpack.c.bf16 %v4111_v3, %v4110_v21  ;;  %v4112_v57 = vld [vmem:[%s7750_s3 + $0xe0] sm:$0xff]  ;;  %v4129_v3 = vld [vmem:[%s7750_s3 + $0x168] sm:$0xff] }
 0x402   :  { %v7022_v21 = vpack.c.bf16 %v4113_v6, %v4112_v57  ;;  %v4115_v57 = vld [vmem:[%s7750_s3 + $0xf8] sm:$0xff]  ;;  %v4130_v6 = vld [vmem:[%s7750_s3 + $0x170] sm:$0xff] }
 0x403   :  { %4472 = vmatmul.mubr.msk.f32.vlgmr.msra.gmra.mrb[12].mxu0 %vm1574_vm11, %v6950_v49  ;;  %8032 = vst [vmem:[#allocation128_spill] sm:$0xff] %v6988_v52  ;;  %8034 = vst [vmem:[#allocation130_spill] sm:$0xff] %v7008_v44 }
 0x404   :  { %5240 = vmatpush3.bf16.msra.mxu0 %v6954_v54  ;;  %4506 = vmatprep.mubr.msk.f32.mxu0 %vm6082_vm8, %v7919_v30  ;;  %8035 = vst [vmem:[#allocation131_spill] sm:$0xff] %v7022_v21 }
 0x405   :  { %5241 = vmatprep.subr.bf16.mxu0 %v8027_v51 }
 0x408   :  { %5243 = vmatpush3.bf16.msra.mxu0 %v6966_v53 }
 0x409   :  { %5244 = vmatprep.subr.bf16.mxu0 %v8027_v51 }
 0x40c   :  { %5246 = vmatpush3.bf16.msra.mxu0 %v6978_v0 }
 0x40d   :  { %5247 = vmatprep.subr.bf16.mxu0 %v8027_v51 }
 0x410   :  { %5249 = vmatpush3.bf16.msra.mxu0 %v6988_v52 }
 0x411   :  { %5250 = vmatprep.subr.bf16.mxu0 %v8027_v51 }
 0x414   :  { %5252 = vmatpush3.bf16.msra.mxu0 %v6998_v23  ;;  %v4114_v23 = vld [vmem:[%s7750_s3 + $0xf0] sm:$0xff] }
 0x415   :  { %5253 = vmatprep.subr.bf16.mxu0 %v8027_v51 }
 0x418   :  { %5255 = vmatpush3.bf16.msra.mxu0 %v7008_v44  ;;  %v7027_v44 = vpack.c.bf16 %v4129_v3, %v4128_v29  ;;  %v7042_v29 = vpack.c.bf16 %v4115_v57, %v4114_v23  ;;  %v4131_v3 = vld [vmem:[%s7750_s3 + $0x178] sm:$0xff]  ;;  %v1726_v23 = vld [vmem:[%s7750_s3] sm:$0xff]  ;;  %v1727_v57 = vld [vmem:[%s7750_s3 + $0x8] sm:$0xff] }
 0x419   :  { %5256 = vmatprep.subr.bf16.mxu0 %v8027_v51  ;;  %v7067_v54 = vpack.c.bf16 %v1727_v57, %v1726_v23  ;;  %v7087_v23 = vpack.c.bf16 %v1729_v48, %v1728_v42  ;;  %v4153_v48 = vld [vmem:[%s7750_s3 + $0x228] sm:$0xff] }
 0x41a   :  { %5306 = vmatpush3.bf16.msra.mxu1 %v7027_v44  ;;  %8036 = vst [vmem:[#allocation132_spill] sm:$0xff] %v7042_v29 }
 0x41b   :  { %5307 = vmatprep.subr.bf16.mxu1 %v8027_v51 }
 0x41c   :  { %5258 = vmatpush3.bf16.msra.mxu0 %v7022_v21  ;;  %v7047_v21 = vpack.c.bf16 %v4131_v3, %v4130_v6  ;;  %v4148_v6 = vld [vmem:[%s7750_s3 + $0x200] sm:$0xff]  ;;  %v4149_v3 = vld [vmem:[%s7750_s3 + $0x208] sm:$0xff] }
 0x41d   :  { %5259 = vmatprep.subr.bf16.mxu0 %v8027_v51  ;;  %v7069_v49 = vpack.c.bf16 %v4149_v3, %v4148_v6  ;;  %v1730_v6 = vld [vmem:[%s7750_s3 + $0x20] sm:$0xff] }
 0x41e   :  { %5309 = vmatpush3.bf16.msra.mxu1 %v7047_v21 }
 0x41f   :  { %5334 = vmatprep.subr.bf16.mxu1 %v8027_v51 }
 0x420   :  { %5261 = vmatpush3.bf16.msra.mxu0 %v7042_v29 }
 0x421   :  { %5262 = vmatprep.subr.bf16.mxu0 %v8027_v51 }
 0x4d2   :  { %v1647_v52 = vpop.f32.mrb[10].mxu0 }
 0x4d3   :  { %v4466_v0 = vpop.f32.mrb[11].mxu0 }
 0x4d6   :  { %v1721_v29 = vpop.f32.mrb[12].mxu0 }
 0x4d7   :  { %v7065_v53 = vmax.f32 %v1647_v52, %v1721_v29  ;;  %v4473_v0 = vpop.f32.mrb[13].mxu0  ;;  %v4150_v52 = vld [vmem:[%s7750_s3 + $0x210] sm:$0xff]  ;;  %v4151_v29 = vld [vmem:[%s7750_s3 + $0x218] sm:$0xff] }
 0x4d8   :  { %v7089_v57 = vpack.c.bf16 %v4151_v29, %v4150_v52  ;;  %v1732_v0 = vld [vmem:[%s7750_s3 + $0x30] sm:$0xff]  ;;  %v1733_v52 = vld [vmem:[%s7750_s3 + $0x38] sm:$0xff] }
 0x4d9   :  { %v1760_v56 = vrot.slane %v7065_v53, 1  ;;  %v1919_v61 = vrot.slane %v7065_v53, 2  ;;  %v4154_v29 = vld [vmem:[%s7750_s3 + $0x230] sm:$0xff] }
 0x4da   :  { %8037 = vst [vmem:[#allocation133_spill] sm:$0xff] %v7089_v57 }
 0x4db   :  { %4507 = vmatmul.mubr.f32.vlgmr.msra.gmra.mrb[14].mxu0 %v1760_v56  ;;  %4577 = vmatmul.mubr.f32.vlgmr.msra.gmra.mrb[6].mxu1 %v1919_v61  ;;  %v1731_v61 = vld [vmem:[%s7750_s3 + $0x28] sm:$0xff]  ;;  %v4152_v56 = vld [vmem:[%s7750_s3 + $0x220] sm:$0xff] }
 0x4dc   :  { %5264 = vmatpush3.bf16.msra.mxu0 %v7067_v54  ;;  %5336 = vmatpush3.bf16.msra.mxu1 %v7069_v49  ;;  %v7111_v42 = vpack.c.bf16 %v1731_v61, %v1730_v6  ;;  %v7113_v3 = vpack.c.bf16 %v4153_v48, %v4152_v56  ;;  %v4155_v6 = vld [vmem:[%s7750_s3 + $0x238] sm:$0xff]  ;;  %v7131_v61 = vpack.c.bf16 %v1733_v52, %v1732_v0  ;;  %v1734_v48 = vld [vmem:[%s7750_s3 + $0x40] sm:$0xff]  ;;  %v4157_v0 = vld [vmem:[%s7750_s3 + $0x248] sm:$0xff] }
 0x4dd   :  { %5265 = vmatprep.subr.bf16.mxu0 %v8027_v51  ;;  %5337 = vmatprep.subr.bf16.mxu1 %v8027_v51  ;;  %v7133_v56 = vpack.c.bf16 %v4155_v6, %v4154_v29  ;;  %v1736_v6 = vld [vmem:[%s7750_s3 + $0x50] sm:$0xff] }
 0x4de   :  { %4541 = vmatprep.mubr.msk.f32.mxu0 %vm6082_vm8, %v7919_v30  ;;  %4646 = vmatprep.mubr.msk.f32.mxu1 %vm6082_vm8, %v7919_v30  ;;  %8038 = vst [vmem:[#allocation134_spill] sm:$0xff] %v7111_v42  ;;  %8039 = vst [vmem:[#allocation135_spill] sm:$0xff] %v7113_v3 }
 0x4df   :  { %8040 = vst [vmem:[#allocation136_spill] sm:$0xff] %v7131_v61  ;;  %8041 = vst [vmem:[#allocation137_spill] sm:$0xff] %v7133_v56 }
 0x4e0   :  { %5267 = vmatpush3.bf16.msra.mxu0 %v7087_v23  ;;  %5339 = vmatpush3.bf16.msra.mxu1 %v7089_v57  ;;  %v1735_v57 = vld [vmem:[%s7750_s3 + $0x48] sm:$0xff] }
 0x4e1   :  { %5268 = vmatprep.subr.bf16.mxu0 %v8027_v51  ;;  %5340 = vmatprep.subr.bf16.mxu1 %v8027_v51  ;;  %v7151_v52 = vpack.c.bf16 %v1735_v57, %v1734_v48  ;;  %v4159_v57 = vld [vmem:[%s7750_s3 + $0x258] sm:$0xff] }
 0x4e3   :  { %8042 = vst [vmem:[#allocation138_spill] sm:$0xff] %v7151_v52 }
 0x4e4   :  { %5270 = vmatpush3.bf16.msra.mxu0 %v7111_v42  ;;  %5342 = vmatpush3.bf16.msra.mxu1 %v7113_v3  ;;  %v4156_v3 = vld [vmem:[%s7750_s3 + $0x240] sm:$0xff]  ;;  %v1737_v42 = vld [vmem:[%s7750_s3 + $0x58] sm:$0xff] }
 0x4e5   :  { %5271 = vmatprep.subr.bf16.mxu0 %v8027_v51  ;;  %5343 = vmatprep.subr.bf16.mxu1 %v8027_v51  ;;  %v7153_v29 = vpack.c.bf16 %v4157_v0, %v4156_v3  ;;  %v7171_v3 = vpack.c.bf16 %v1737_v42, %v1736_v6  ;;  %v1738_v0 = vld [vmem:[%s7750_s3 + $0x60] sm:$0xff]  ;;  %v4161_v42 = vld [vmem:[%s7750_s3 + $0x268] sm:$0xff] }
 0x4e7   :  { %8043 = vst [vmem:[#allocation139_spill] sm:$0xff] %v7153_v29  ;;  %8044 = vst [vmem:[#allocation140_spill] sm:$0xff] %v7171_v3 }
 0x4e8   :  { %5273 = vmatpush3.bf16.msra.mxu0 %v7131_v61  ;;  %5345 = vmatpush3.bf16.msra.mxu1 %v7133_v56  ;;  %v4158_v56 = vld [vmem:[%s7750_s3 + $0x250] sm:$0xff]  ;;  %v1739_v61 = vld [vmem:[%s7750_s3 + $0x68] sm:$0xff] }
 0x4e9   :  { %5274 = vmatprep.subr.bf16.mxu0 %v8027_v51  ;;  %5346 = vmatprep.subr.bf16.mxu1 %v8027_v51  ;;  %v7173_v48 = vpack.c.bf16 %v4159_v57, %v4158_v56  ;;  %v7191_v56 = vpack.c.bf16 %v1739_v61, %v1738_v0  ;;  %v1740_v57 = vld [vmem:[%s7750_s3 + $0x70] sm:$0xff]  ;;  %v4163_v61 = vld [vmem:[%s7750_s3 + $0x278] sm:$0xff] }
 0x4eb   :  { %8045 = vst [vmem:[#allocation141_spill] sm:$0xff] %v7173_v48 }
 0x4ec   :  { %5276 = vmatpush3.bf16.msra.mxu0 %v7151_v52  ;;  %5348 = vmatpush3.bf16.msra.mxu1 %v7153_v29  ;;  %v4160_v29 = vld [vmem:[%s7750_s3 + $0x260] sm:$0xff]  ;;  %v1741_v52 = vld [vmem:[%s7750_s3 + $0x78] sm:$0xff] }
 0x4ed   :  { %5277 = vmatprep.subr.bf16.mxu0 %v8027_v51  ;;  %5349 = vmatprep.subr.bf16.mxu1 %v8027_v51  ;;  %v7193_v6 = vpack.c.bf16 %v4161_v42, %v4160_v29  ;;  %v7211_v29 = vpack.c.bf16 %v1741_v52, %v1740_v57  ;;  %v4132_v42 = vld [vmem:[%s7750_s3 + $0x180] sm:$0xff]  ;;  %v4134_v57 = vld [vmem:[%s7750_s3 + $0x190] sm:$0xff] }
 0x4ef   :  { %8046 = vst [vmem:[#allocation142_spill] sm:$0xff] %v7211_v29 }
 0x4f0   :  { %5279 = vmatpush3.bf16.msra.mxu0 %v7171_v3  ;;  %5351 = vmatpush3.bf16.msra.mxu1 %v7173_v48  ;;  %v4162_v48 = vld [vmem:[%s7750_s3 + $0x270] sm:$0xff]  ;;  %v4133_v3 = vld [vmem:[%s7750_s3 + $0x188] sm:$0xff] }
 0x4f1   :  { %5280 = vmatprep.subr.bf16.mxu0 %v8027_v51  ;;  %5352 = vmatprep.subr.bf16.mxu1 %v8027_v51  ;;  %v7213_v0 = vpack.c.bf16 %v4163_v61, %v4162_v48  ;;  %v7225_v52 = vpack.c.bf16 %v4133_v3, %v4132_v42  ;;  %v2099_v48 = vrot.slane %v7065_v53, 4  ;;  %v4135_v61 = vld [vmem:[%s7750_s3 + $0x198] sm:$0xff]  ;;  %v4136_v3 = vld [vmem:[%s7750_s3 + $0x1a0] sm:$0xff]  ;;  %v4137_v42 = vld [vmem:[%s7750_s3 + $0x1a8] sm:$0xff] }
 0x4f3   :  { %8047 = vst [vmem:[#allocation143_spill] sm:$0xff] %v7213_v0  ;;  %8048 = vst [vmem:[#allocation144_spill] sm:$0xff] %v7225_v52 }
 0x4f4   :  { %5282 = vmatpush3.bf16.msra.mxu0 %v7191_v56  ;;  %5354 = vmatpush3.bf16.msra.mxu1 %v7193_v6 }
 0x4f5   :  { %5283 = vmatprep.subr.bf16.mxu0 %v8027_v51  ;;  %5355 = vmatprep.subr.bf16.mxu1 %v8027_v51 }
 0x4f8   :  { %5285 = vmatpush3.bf16.msra.mxu0 %v7211_v29  ;;  %5357 = vmatpush3.bf16.msra.mxu1 %v7213_v0  ;;  %v7237_v0 = vpack.c.bf16 %v4135_v61, %v4134_v57  ;;  %v7253_v57 = vpack.c.bf16 %v4137_v42, %v4136_v3  ;;  %v4138_v61 = vld [vmem:[%s7750_s3 + $0x1b0] sm:$0xff]  ;;  %v4140_v3 = vld [vmem:[%s7750_s3 + $0x1c0] sm:$0xff]  ;;  %v4141_v42 = vld [vmem:[%s7750_s3 + $0x1c8] sm:$0xff] }
 0x4f9   :  { %5310 = vmatprep.subr.bf16.mxu0 %v8027_v51 }
 0x4fa   :  { %8049 = vst [vmem:[#allocation145_spill] sm:$0xff] %v7253_v57 }
 0x4fb   :  { %4542 = vmatmul.mubr.f32.vlgmr.msra.gmra.mrb[16].mxu0 %v7065_v53  ;;  %4647 = vmatmul.mubr.f32.vlgmr.msra.gmra.mrb[8].mxu1 %v2099_v48  ;;  %v5948_v48 = vld [vmem:[%s7754_s7] sm:$0xff] }
 0x4fc   :  { %5312 = vmatpush3.bf16.msra.mxu0 %v7225_v52  ;;  %4611 = vmatprep.mubr.msk.f32.mxu0 %vm6082_vm8, %v7919_v30  ;;  %v4139_v52 = vld [vmem:[%s7750_s3 + $0x1b8] sm:$0xff] }
 0x4fd   :  { %5313 = vmatprep.subr.bf16.mxu0 %v8027_v51  ;;  %4657 = vmatprep.mubr.msk.f32.mxu1 %vm801_vm5, %v5948_v48  ;;  %v7263_v29 = vpack.c.bf16 %v4139_v52, %v4138_v61  ;;  %v7273_v48 = vpack.c.bf16 %v4141_v42, %v4140_v3  ;;  %v4142_v52 = vld [vmem:[%s7750_s3 + $0x1d0] sm:$0xff]  ;;  %v4143_v61 = vld [vmem:[%s7750_s3 + $0x1d8] sm:$0xff]  ;;  %v4144_v3 = vld [vmem:[%s7750_s3 + $0x1e0] sm:$0xff] }
 0x4fe   :  { %v4145_v42 = vld [vmem:[%s7750_s3 + $0x1e8] sm:$0xff] }
 0x4ff   :  { %8050 = vst [vmem:[#allocation146_spill] sm:$0xff] %v7263_v29  ;;  %8051 = vst [vmem:[#allocation147_spill] sm:$0xff] %v7273_v48 }
 0x500   :  { %5315 = vmatpush3.bf16.msra.mxu0 %v7237_v0 }
 0x501   :  { %5316 = vmatprep.subr.bf16.mxu0 %v8027_v51 }
 0x504   :  { %5318 = vmatpush3.bf16.msra.mxu0 %v7253_v57  ;;  %v7283_v57 = vpack.c.bf16 %v4143_v61, %v4142_v52  ;;  %v4146_v52 = vld [vmem:[%s7750_s3 + $0x1f0] sm:$0xff]  ;;  %v4147_v61 = vld [vmem:[%s7750_s3 + $0x1f8] sm:$0xff] }
 0x505   :  { %5319 = vmatprep.subr.bf16.mxu0 %v8027_v51 }
 0x508   :  { %5321 = vmatpush3.bf16.msra.mxu0 %v7263_v29  ;;  %v7293_v29 = vpack.c.bf16 %v4145_v42, %v4144_v3  ;;  %v2009_v3 = vrot.slane %v7065_v53, 3 }
 0x509   :  { %5322 = vmatprep.subr.bf16.mxu0 %v8027_v51 }
 0x50c   :  { %5324 = vmatpush3.bf16.msra.mxu0 %v7273_v48  ;;  %v7303_v48 = vpack.c.bf16 %v4147_v61, %v4146_v52  ;;  %v8066_v52 = vld [vmem:[#allocation27_spill] sm:$0xff]  ;;  %v8067_v61 = vld [vmem:[#allocation28_spill] sm:$0xff] }
 0x50d   :  { %5325 = vmatprep.subr.bf16.mxu0 %v8027_v51 }
 0x510   :  { %5327 = vmatpush3.bf16.msra.mxu0 %v7283_v57 }
 0x511   :  { %5328 = vmatprep.subr.bf16.mxu0 %v8027_v51 }
 0x514   :  { %5330 = vmatpush3.bf16.msra.mxu0 %v7293_v29 }
 0x515   :  { %5331 = vmatprep.subr.bf16.mxu0 %v8027_v51 }
 0x518   :  { %5333 = vmatpush3.bf16.msra.mxu0 %v7303_v48 }
 0x519   :  { %5359 = vmatprep.subr.bf16.mxu0 %v6201_v4  ;;  %v7321_v4 = vld [vmem:[%s7747_s0 + $0x20] sm:$0xff] }
 0x51b   :  { %4612 = vmatmul.mubr.f32.vlgmr.msra.gmra.mrb[18].mxu0 %v2009_v3 }
 0x51c   :  { %5361 = vmatpush1.bf16.msra.mxu0 %v6203_v8  ;;  %2265 = vmatprep.mubr.f32.mxu0 %v7919_v30  ;;  %v7326_v8 = vld [vmem:[%s7747_s0 + $0x28] sm:$0xff] }
 0x51d   :  { %5363 = vmatprep.subr.bf16.mxu0 %v6205_v9  ;;  %v2186_v9 = vrot.slane %v7321_v4, 1 }
 0x520   :  { %5365 = vmatpush1.bf16.msra.mxu0 %v6209_v14  ;;  %v2187_v14 = vrot.slane %v7326_v8, 1 }
 0x521   :  { %5367 = vmatprep.subr.bf16.mxu0 %v6212_v15  ;;  %v7335_v15 = vld [vmem:[%s7747_s0 + $0x30] sm:$0xff] }
 0x524   :  { %5369 = vmatpush1.bf16.msra.mxu0 %v6215_v20  ;;  %v2188_v20 = vsel %vm156_vm2, %v2186_v9, %v2187_v14  ;;  %v8068_v9 = vld [vmem:[#allocation29_spill] sm:$0xff] }
 0x525   :  { %5371 = vmatprep.subr.bf16.mxu0 %v6223_v22  ;;  %v2189_v22 = vrot.slane %v7335_v15, 1 }
 0x528   :  { %5373 = vmatpush1.bf16.msra.mxu0 %v6235_v32  ;;  %v7344_v32 = vld [vmem:[%s7747_s0 + $0x38] sm:$0xff] }
 0x529   :  { %5375 = vmatprep.subr.bf16.mxu0 %v6238_v33  ;;  %v2190_v33 = vsel %vm156_vm2, %v2187_v14, %v2189_v22  ;;  %v2504_v42 = vrot.slane %v7344_v32, 3  ;;  %v8069_v14 = vld [vmem:[#allocation30_spill] sm:$0xff] }
 0x52c   :  { %5377 = vmatpush1.bf16.msra.mxu0 %v6254_v43  ;;  %v2191_v43 = vrot.slane %v7344_v32, 1 }
 0x52d   :  { %5379 = vmatprep.subr.bf16.mxu0 %v6262_v45 }
 0x52e   :  { %v2192_v45 = vsel %vm156_vm2, %v2189_v22, %v2191_v43  ;;  %v8071_v22 = vld [vmem:[#allocation32_spill] sm:$0xff] }
 0x530   :  { %5381 = vmatpush1.bf16.msra.mxu0 %v6278_v55  ;;  %v2387_v55 = vrot.slane %v7321_v4, 2 }
 0x531   :  { %5383 = vmatprep.subr.bf16.mxu0 %v6283_v58  ;;  %v2388_v58 = vrot.slane %v7326_v8, 2 }
 0x533   :  { %4168 = vmatmul.mubr.msk.f32.vlgmr.msra.gmra.mrb[20].mxu0 %vm164_vm3, %v2188_v20  ;;  %v8070_v20 = vld [vmem:[#allocation31_spill] sm:$0xff] }
 0x534   :  { %5385 = vmatpush1.bf16.msra.mxu0 %v6292_v2  ;;  %2271 = vmatprep.mubr.f32.mxu0 %v7919_v30  ;;  %v2389_v2 = vsel %vm384_vm4, %v2387_v55, %v2388_v58  ;;  %v2612_v55 = vrot.slane %v7326_v8, 4 }
 0x535   :  { %5387 = vmatprep.subr.bf16.mxu0 %v6296_v5  ;;  %v2390_v5 = vrot.slane %v7335_v15, 2 }
 0x537   :  { %4169 = vmatmul.mubr.msk.f32.gmra.mrb[22].mxu0 %vm164_vm3, %v2190_v33  ;;  %v8072_v33 = vld [vmem:[#allocation33_spill] sm:$0xff] }
 0x538   :  { %5389 = vmatpush1.bf16.msra.mxu0 %v6300_v12  ;;  %2277 = vmatprep.mubr.f32.mxu0 %v7919_v30  ;;  %v8052_v12 = vld [vmem:[#allocation13_spill] sm:$0xff] }
 0x539   :  { %5391 = vmatprep.subr.bf16.mxu0 %v6306_v17  ;;  %v8053_v17 = vld [vmem:[#allocation14_spill] sm:$0xff] }
 0x53b   :  { %4170 = vmatmul.mubr.msk.f32.gmra.mrb[24].mxu0 %vm164_vm3, %v2192_v45  ;;  %v2611_v45 = vrot.slane %v7321_v4, 4 }
 0x53c   :  { %5393 = vmatpush1.bf16.msra.mxu0 %v6310_v26  ;;  %2283 = vmatprep.mubr.f32.mxu0 %v7919_v30  ;;  %v2391_v26 = vsel %vm384_vm4, %v2388_v58, %v2390_v5  ;;  %v8074_v58 = vld [vmem:[#allocation35_spill] sm:$0xff] }
 0x53d   :  { %5395 = vmatprep.subr.bf16.mxu0 %v6315_v28  ;;  %v2392_v28 = vrot.slane %v7344_v32, 2 }
 0x53f   :  { %4171 = vmatmul.mubr.msk.f32.gmra.mrb[26].mxu0 %vm164_vm3, %v2191_v43  ;;  %v8073_v43 = vld [vmem:[#allocation34_spill] sm:$0xff] }
 0x540   :  { %5397 = vmatpush1.bf16.msra.mxu0 %v6319_v35  ;;  %2362 = vmatprep.mubr.f32.mxu0 %v7919_v30  ;;  %v8054_v35 = vld [vmem:[#allocation15_spill] sm:$0xff] }
 0x541   :  { %5399 = vmatprep.subr.bf16.mxu0 %v6323_v39  ;;  %v8055_v39 = vld [vmem:[#allocation16_spill] sm:$0xff] }
 0x544   :  { %5401 = vmatpush1.bf16.msra.mxu0 %v6327_v47  ;;  %v2393_v47 = vsel %vm384_vm4, %v2390_v5, %v2392_v28  ;;  %v2613_v5 = vsel %vm660_vm1, %v2611_v45, %v2612_v55 }
 0x545   :  { %5403 = vmatprep.subr.bf16.mxu0 %v6331_v50  ;;  %v8056_v50 = vld [vmem:[#allocation17_spill] sm:$0xff] }
 0x548   :  { %5405 = vmatpush1.bf16.msra.mxu0 %v6345_v63  ;;  %v8057_v63 = vld [vmem:[#allocation18_spill] sm:$0xff] }
 0x549   :  { %5407 = vmatprep.subr.bf16.mxu0 %v6348_v1  ;;  %v8058_v1 = vld [vmem:[#allocation19_spill] sm:$0xff] }
 0x54b   :  { %4172 = vmatmul.mubr.msk.f32.vlgmr.msra.gmra.mrb[20].mxu0 %vm164_vm3, %v7321_v4 }
 0x54c   :  { %5409 = vmatpush1.bf16.msra.mxu0 %v6352_v11  ;;  %2368 = vmatprep.mubr.f32.mxu0 %v7919_v30  ;;  %v8059_v11 = vld [vmem:[#allocation20_spill] sm:$0xff] }
 0x54d   :  { %5411 = vmatprep.subr.bf16.mxu0 %v6355_v13  ;;  %v8060_v13 = vld [vmem:[#allocation21_spill] sm:$0xff] }
 0x54f   :  { %4173 = vmatmul.mubr.msk.f32.gmra.mrb[22].mxu0 %vm164_vm3, %v7326_v8 }
 0x550   :  { %5413 = vmatpush1.bf16.msra.mxu0 %v6360_v24  ;;  %2374 = vmatprep.mubr.f32.mxu0 %v7919_v30  ;;  %v8061_v24 = vld [vmem:[#allocation22_spill] sm:$0xff] }
 0x551   :  { %5415 = vmatprep.subr.bf16.mxu0 %v6364_v27  ;;  %v2499_v27 = vrot.slane %v7321_v4, 3  ;;  %v2616_v4 = vrot.slane %v7344_v32, 4 }
 0x553   :  { %4174 = vmatmul.mubr.msk.f32.gmra.mrb[24].mxu0 %vm164_vm3, %v7335_v15 }
 0x554   :  { %5417 = vmatpush1.bf16.msra.mxu0 %v6369_v40  ;;  %2380 = vmatprep.mubr.f32.mxu0 %v7919_v30  ;;  %v2500_v40 = vrot.slane %v7326_v8, 3 }
 0x555   :  { %5419 = vmatprep.subr.bf16.mxu0 %v6373_v41  ;;  %v8062_v41 = vld [vmem:[#allocation23_spill] sm:$0xff] }
 0x557   :  { %4175 = vmatmul.mubr.msk.f32.gmra.mrb[26].mxu0 %vm164_vm3, %v7344_v32 }
 0x558   :  { %5421 = vmatpush1.bf16.msra.mxu0 %v6378_v59  ;;  %2466 = vmatprep.mubr.f32.mxu0 %v7919_v30  ;;  %v8063_v59 = vld [vmem:[#allocation24_spill] sm:$0xff] }
 0x559   :  { %5423 = vmatprep.subr.bf16.mxu0 %v6382_v60  ;;  %v2501_v60 = vsel %vm522_vm0, %v2499_v27, %v2500_v40 }
 0x55c   :  { %5425 = vmatpush1.bf16.msra.mxu0 %v6387_v16  ;;  %v2502_v16 = vrot.slane %v7335_v15, 3 }
 0x55d   :  { %5427 = vmatprep.subr.bf16.mxu0 %v6391_v18  ;;  %v8064_v18 = vld [vmem:[#allocation25_spill] sm:$0xff] }
 0x55e   :  { %v2503_v53 = vsel %vm522_vm0, %v2500_v40, %v2502_v16  ;;  %v2505_v3 = vsel %vm522_vm0, %v2502_v16, %v2504_v42 }
 0x560   :  { %5429 = vmatpush1.bf16.msra.mxu0 %v6394_v31  ;;  %v8065_v31 = vld [vmem:[#allocation26_spill] sm:$0xff] }
 0x561   :  { %5431 = vmatprep.subr.bf16.mxu0 %v8052_v12  ;;  %v2614_v12 = vrot.slane %v7335_v15, 4 }
 0x563   :  { %4176 = vmatmul.mubr.msk.f32.vlgmr.msra.gmra.mrb[20].mxu0 %vm164_vm3, %v2389_v2  ;;  %v8075_v2 = vld [vmem:[#allocation36_spill] sm:$0xff]  ;;  %v2617_v8 = vsel %vm660_vm1, %v2614_v12, %v2616_v4 }
 0x564   :  { %5433 = vmatpush1.bf16.msra.mxu0 %v8053_v17  ;;  %2472 = vmatprep.mubr.f32.mxu0 %v7919_v30  ;;  %v2615_v17 = vsel %vm660_vm1, %v2612_v55, %v2614_v12 }
 0x565   :  { %5435 = vmatprep.subr.bf16.mxu0 %v8054_v35 }
 0x567   :  { %4177 = vmatmul.mubr.msk.f32.gmra.mrb[22].mxu0 %vm164_vm3, %v2391_v26 }
 0x568   :  { %5437 = vmatpush1.bf16.msra.mxu0 %v8055_v39  ;;  %2478 = vmatprep.mubr.f32.mxu0 %v7919_v30 }
 0x569   :  { %5439 = vmatprep.subr.bf16.mxu0 %v8056_v50 }
 0x56b   :  { %4178 = vmatmul.mubr.msk.f32.gmra.mrb[24].mxu0 %vm164_vm3, %v2393_v47 }
 0x56c   :  { %5441 = vmatpush1.bf16.msra.mxu0 %v8057_v63  ;;  %2484 = vmatprep.mubr.f32.mxu0 %v7919_v30 }
 0x56d   :  { %5443 = vmatprep.subr.bf16.mxu0 %v8058_v1 }
 0x56f   :  { %4179 = vmatmul.mubr.msk.f32.gmra.mrb[26].mxu0 %vm164_vm3, %v2392_v28 }
 0x570   :  { %5445 = vmatpush1.bf16.msra.mxu0 %v8059_v11  ;;  %2578 = vmatprep.mubr.f32.mxu0 %v7919_v30 }
 0x571   :  { %5447 = vmatprep.subr.bf16.mxu0 %v8060_v13 }
 0x574   :  { %5449 = vmatpush1.bf16.msra.mxu0 %v8061_v24 }
 0x575   :  { %5451 = vmatprep.subr.bf16.mxu0 %v8062_v41 }
 0x578   :  { %5453 = vmatpush1.bf16.msra.mxu0 %v8063_v59 }
 0x579   :  { %5455 = vmatprep.subr.bf16.mxu0 %v8064_v18 }
 0x57b   :  { %4180 = vmatmul.mubr.msk.f32.vlgmr.msra.gmra.mrb[20].mxu0 %vm164_vm3, %v2501_v60 }
 0x57c   :  { %5457 = vmatpush1.bf16.msra.mxu0 %v8065_v31  ;;  %2584 = vmatprep.mubr.f32.mxu0 %v7919_v30 }
 0x57d   :  { %5459 = vmatprep.subr.bf16.mxu0 %v8066_v52 }
 0x57f   :  { %4181 = vmatmul.mubr.msk.f32.gmra.mrb[22].mxu0 %vm164_vm3, %v2503_v53 }
 0x580   :  { %5461 = vmatpush1.bf16.msra.mxu0 %v8067_v61  ;;  %2590 = vmatprep.mubr.f32.mxu0 %v7919_v30 }
 0x581   :  { %5463 = vmatprep.subr.bf16.mxu0 %v8068_v9 }
 0x583   :  { %4182 = vmatmul.mubr.msk.f32.gmra.mrb[24].mxu0 %vm164_vm3, %v2505_v3 }
 0x584   :  { %5465 = vmatpush1.bf16.msra.mxu0 %v8069_v14  ;;  %2596 = vmatprep.mubr.f32.mxu0 %v7919_v30 }
 0x585   :  { %5467 = vmatprep.subr.bf16.mxu0 %v8070_v20 }
 0x587   :  { %4183 = vmatmul.mubr.msk.f32.gmra.mrb[26].mxu0 %vm164_vm3, %v2504_v42 }
 0x588   :  { %5469 = vmatpush1.bf16.msra.mxu0 %v8071_v22  ;;  %2690 = vmatprep.mubr.f32.mxu0 %v7919_v30 }
 0x589   :  { %5471 = vmatprep.subr.bf16.mxu0 %v8072_v33 }
 0x58c   :  { %5473 = vmatpush1.bf16.msra.mxu0 %v8073_v43 }
 0x58d   :  { %5475 = vmatprep.subr.bf16.mxu0 %v8074_v58 }
 0x590   :  { %5477 = vmatpush1.bf16.msra.mxu0 %v8075_v2 }
 0x591   :  { %5658 = vmatprep.subr.bf16.mxu0 %v8027_v51 }
 0x593   :  { %4184 = vmatmul.mubr.msk.f32.vlgmr.msra.gmra.mrb[20].mxu0 %vm164_vm3, %v2613_v5 }
 0x594   :  { %2696 = vmatprep.mubr.f32.mxu0 %v7919_v30 }
 0x597   :  { %4185 = vmatmul.mubr.msk.f32.gmra.mrb[22].mxu0 %vm164_vm3, %v2615_v17 }
 0x598   :  { %2702 = vmatprep.mubr.f32.mxu0 %v7919_v30 }
 0x59b   :  { %4186 = vmatmul.mubr.msk.f32.gmra.mrb[24].mxu0 %vm164_vm3, %v2617_v8 }
 0x59c   :  { %2708 = vmatprep.mubr.f32.mxu0 %v7919_v30 }
 0x59f   :  { %4187 = vmatmul.mubr.msk.f32.gmra.mrb[26].mxu0 %vm164_vm3, %v2616_v4 }
 0x5a0   :  { %4675 = vmatprep.mubr.msk.f32.mxu0 %vm6082_vm8, %v7919_v30 }
 0x5ae   :  { %v1828_v15 = vpop.f32.mrb[14].mxu0  ;;  %v1987_v26 = vpop.f32.mrb[6].mxu1 }
 0x5af   :  { %v4508_v28 = vpop.f32.mrb[15].mxu0  ;;  %v4578_v35 = vpop.f32.mrb[7].mxu1 }
 0x5b0   :  { %v8099_v35 = vld [vmem:[#allocation62_spill] sm:$0xff] }
 0x5ce   :  { %v1898_v32 = vpop.f32.mrb[16].mxu0  ;;  %v2167_v39 = vpop.f32.mrb[8].mxu1 }
 0x5cf   :  { %v1899_v47 = vadd.f32 %v1898_v32, %v1828_v15  ;;  %v4543_v50 = vpop.f32.mrb[17].mxu0  ;;  %v4648_v63 = vpop.f32.mrb[9].mxu1  ;;  %v8078_v32 = vld [vmem:[#allocation41_spill] sm:$0xff] }
 0x5d0   :  { %v8081_v50 = vld [vmem:[#allocation44_spill] sm:$0xff]  ;;  %v8082_v63 = vld [vmem:[#allocation45_spill] sm:$0xff] }
 0x5d1   :  { %v1991_v1 = vadd.f32 %v1987_v26, %v1899_v47  ;;  %v8080_v47 = vld [vmem:[#allocation43_spill] sm:$0xff] }
 0x5ee   :  { %v2077_v11 = vpop.f32.mrb[18].mxu0 }
 0x5ef   :  { %v2081_v13 = vadd.f32 %v2077_v11, %v1991_v1  ;;  %v4613_v24 = vpop.f32.mrb[19].mxu0  ;;  %v8083_v1 = vld [vmem:[#allocation46_spill] sm:$0xff]  ;;  %v8084_v11 = vld [vmem:[#allocation47_spill] sm:$0xff] }
 0x5f0   :  { %v8086_v24 = vld [vmem:[#allocation49_spill] sm:$0xff] }
 0x5f1   :  { %v7463_v27 = vadd.f32 %v2167_v39, %v2081_v13  ;;  %v8079_v39 = vld [vmem:[#allocation42_spill] sm:$0xff]  ;;  %v8085_v13 = vld [vmem:[#allocation48_spill] sm:$0xff] }
 0x666   :  { %v2692_v40 = vpop.f32.mrb[20].mxu0 }
 0x667   :  { %v2723_v41 = vadd.f32 %v2692_v40, %v6527_v36  ;;  %v2694_v59 = vpop.f32.mrb[21].mxu0  ;;  %v8087_v40 = vld [vmem:[#allocation50_spill] sm:$0xff] }
 0x668   :  { %v2724_v60 = vadd.f32 %v2694_v59, %v6531_v34  ;;  %v8089_v59 = vld [vmem:[#allocation52_spill] sm:$0xff] }
 0x669   :  { %v2731_v16 = vmax.f32 %v2723_v41, 0.0  ;;  %v8088_v41 = vld [vmem:[#allocation51_spill] sm:$0xff] }
 0x66a   :  { %v2732_v18 = vmax.f32 %v2724_v60, 0.0  ;;  %v2698_v31 = vpop.f32.mrb[22].mxu0  ;;  %v8090_v60 = vld [vmem:[#allocation53_spill] sm:$0xff] }
 0x66b   :  { %v2725_v53 = vadd.f32 %v2698_v31, %v6527_v36  ;;  %v2700_v42 = vpop.f32.mrb[23].mxu0  ;;  %v8093_v31 = vld [vmem:[#allocation56_spill] sm:$0xff] }
 0x66c   :  { %v2739_v52 = vmax.f32 %v2731_v16, %v2732_v18  ;;  %v2726_v61 = vadd.f32 %v2700_v42, %v6531_v34  ;;  %v8091_v16 = vld [vmem:[#allocation54_spill] sm:$0xff]  ;;  %v8092_v18 = vld [vmem:[#allocation55_spill] sm:$0xff] }
 0x66d   :  { %v2733_v3 = vmax.f32 %v2725_v53, 0.0  ;;  %v8094_v53 = vld [vmem:[#allocation57_spill] sm:$0xff]  ;;  %v8095_v42 = vld [vmem:[#allocation58_spill] sm:$0xff] }
 0x66e   :  { %v2734_v9 = vmax.f32 %v2726_v61, 0.0  ;;  %v2704_v14 = vpop.f32.mrb[24].mxu0 }
 0x66f   :  { %v2727_v20 = vadd.f32 %v2704_v14, %v6527_v36  ;;  %v2706_v22 = vpop.f32.mrb[25].mxu0 }
 0x670   :  { %v2740_v33 = vmax.f32 %v2733_v3, %v2734_v9  ;;  %v2728_v43 = vadd.f32 %v2706_v22, %v6531_v34 }
 0x671   :  { %v2735_v45 = vmax.f32 %v2727_v20, 0.0 }
 0x672   :  { %v5478_v55 = vpack.c.bf16 %v2740_v33, %v2739_v52  ;;  %v2736_v58 = vmax.f32 %v2728_v43, 0.0  ;;  %v2710_v2 = vpop.f32.mrb[26].mxu0 }
 0x673   :  { %v2729_v5 = vadd.f32 %v2710_v2, %v6527_v36  ;;  %v2712_v12 = vpop.f32.mrb[27].mxu0  ;;  %v5949_v36 = vld [vmem:[%s7754_s7 + $0x8] sm:$0xff] }
 0x674   :  { %v2741_v17 = vmax.f32 %v2735_v45, %v2736_v58  ;;  %v2730_v4 = vadd.f32 %v2712_v12, %v6531_v34  ;;  %5479 = vmatprep.subr.bf16.mxu1 %v5478_v55  ;;  %v8077_v34 = vld [vmem:[#allocation37_spill] sm:$0xff] }
 0x675   :  { %v2737_v8 = vmax.f32 %v2729_v5, 0.0  ;;  %5481 = vmatpush3.bf16.msra.mxu1 %v5478_v55 }
 0x676   :  { %v2738_v15 = vmax.f32 %v2730_v4, 0.0 }
 0x678   :  { %v2742_v26 = vmax.f32 %v2737_v8, %v2738_v15  ;;  %v8096_v15 = vld [vmem:[#allocation59_spill] sm:$0xff] }
 0x67a   :  { %v5482_v28 = vpack.c.bf16 %v2742_v26, %v2741_v17  ;;  %v8097_v26 = vld [vmem:[#allocation60_spill] sm:$0xff] }
 0x67c   :  { %5484 = vmatprep.subr.msk.bf16.mxu1 %vm6543_vm7, %v5482_v28 }
 0x67d   :  { %5487 = vmatpush3.bf16.msk.msra.mxu1 %vm6543_vm7, %v5482_v28 }
 0x67e   :  { %5489 = vmatprep.subr.bf16.mxu1 %v5478_v55 }
 0x680   :  { %4658 = vmatmul.mubr.msk.f32.vlgmr.msra.gmra.mrb[10].mxu1 %vm801_vm5, %v5949_v36  ;;  %v8100_v36 = vld [vmem:[#allocation63_spill] sm:$0xff] }
 0x681   :  { %5491 = vmatpush3.bf16.msra.mxu1 %v5478_v55  ;;  %4668 = vmatprep.mubr.msk.f32.mxu1 %vm801_vm5, %v8077_v34  ;;  %v8101_v34 = vld [vmem:[#allocation64_spill] sm:$0xff] }
 0x682   :  { %5494 = vmatprep.subr.msk.bf16.mxu1 %vm6543_vm7, %v5482_v28 }
 0x685   :  { %5497 = vmatpush3.bf16.msk.msra.mxu1 %vm6543_vm7, %v5482_v28  ;;  %v8098_v28 = vld [vmem:[#allocation61_spill] sm:$0xff] }
 0x686   :  { %5499 = vmatprep.subr.bf16.mxu1 %v8078_v32  ;;  %v8103_v32 = vld [vmem:[#allocation66_spill] sm:$0xff] }
 0x688   :  { %4669 = vmatmul.mubr.msk.f32.vlgmr.msra.gmra.mrb[12].mxu1 %vm801_vm5, %v8079_v39  ;;  %v8105_v39 = vld [vmem:[#allocation68_spill] sm:$0xff] }
 0x689   :  { %5501 = vmatpush1.bf16.msra.mxu1 %v8080_v47  ;;  %2969 = vmatprep.mubr.f32.mxu1 %v7919_v30  ;;  %v8106_v47 = vld [vmem:[#allocation69_spill] sm:$0xff] }
 0x68a   :  { %5503 = vmatprep.subr.bf16.mxu1 %v8081_v50  ;;  %v8107_v50 = vld [vmem:[#allocation70_spill] sm:$0xff] }
 0x68d   :  { %5505 = vmatpush1.bf16.msra.mxu1 %v8082_v63  ;;  %v8108_v63 = vld [vmem:[#allocation71_spill] sm:$0xff] }
 0x68e   :  { %5507 = vmatprep.subr.bf16.mxu1 %v8083_v1  ;;  %v8109_v1 = vld [vmem:[#allocation72_spill] sm:$0xff] }
 0x691   :  { %5509 = vmatpush1.bf16.msra.mxu1 %v8084_v11  ;;  %v8110_v11 = vld [vmem:[#allocation73_spill] sm:$0xff] }
 0x692   :  { %5511 = vmatprep.subr.bf16.mxu1 %v8085_v13  ;;  %v8111_v13 = vld [vmem:[#allocation74_spill] sm:$0xff] }
 0x695   :  { %5513 = vmatpush1.bf16.msra.mxu1 %v8086_v24  ;;  %v8112_v24 = vld [vmem:[#allocation75_spill] sm:$0xff] }
 0x696   :  { %5515 = vmatprep.subr.bf16.mxu1 %v8087_v40  ;;  %v8114_v40 = vld [vmem:[#allocation77_spill] sm:$0xff] }
 0x699   :  { %5517 = vmatpush1.bf16.msra.mxu1 %v8088_v41  ;;  %v8115_v41 = vld [vmem:[#allocation78_spill] sm:$0xff] }
 0x69a   :  { %5519 = vmatprep.subr.bf16.mxu1 %v8089_v59  ;;  %v8116_v59 = vld [vmem:[#allocation79_spill] sm:$0xff] }
 0x69d   :  { %5521 = vmatpush1.bf16.msra.mxu1 %v8090_v60  ;;  %v8117_v60 = vld [vmem:[#allocation80_spill] sm:$0xff] }
 0x69e   :  { %5523 = vmatprep.subr.bf16.mxu1 %v8091_v16  ;;  %v8118_v16 = vld [vmem:[#allocation81_spill] sm:$0xff] }
 0x6a1   :  { %5525 = vmatpush1.bf16.msra.mxu1 %v8092_v18  ;;  %v8119_v18 = vld [vmem:[#allocation82_spill] sm:$0xff] }
 0x6a2   :  { %5527 = vmatprep.subr.bf16.mxu1 %v8093_v31  ;;  %v8120_v31 = vld [vmem:[#allocation83_spill] sm:$0xff] }
 0x6a5   :  { %5529 = vmatpush1.bf16.msra.mxu1 %v8094_v53  ;;  %v8121_v53 = vld [vmem:[#allocation84_spill] sm:$0xff] }
 0x6a6   :  { %5531 = vmatprep.subr.bf16.mxu1 %v8095_v42  ;;  %v8122_v42 = vld [vmem:[#allocation85_spill] sm:$0xff] }
 0x753   :  { %v4659_v52 = vpop.f32.mrb[10].mxu1 }
 0x754   :  { %v2812_v61 = vpop.f32.mrb[11].mxu1 }
 0x75b   :  { %v4670_v3 = vpop.f32.mrb[12].mxu1 }
 0x75c   :  { %v7507_v9 = vmax.f32 %v4659_v52, %v4670_v3  ;;  %v2887_v14 = vpop.f32.mrb[13].mxu1  ;;  %v8123_v52 = vld [vmem:[#allocation86_spill] sm:$0xff]  ;;  %v8125_v3 = vld [vmem:[#allocation88_spill] sm:$0xff] }
 0x75d   :  { %v2896_v20 = vmax.f32 %v2812_v61, %v2887_v14  ;;  %v8124_v61 = vld [vmem:[#allocation87_spill] sm:$0xff]  ;;  %v8126_v14 = vld [vmem:[#allocation89_spill] sm:$0xff] }
 0x75e   :  { %v2901_v22 = vrot.slane %v7507_v9, 1  ;;  %v3060_v33 = vrot.slane %v7507_v9, 2  ;;  %v3146_v43 = vrot.slane %v7507_v9, 3  ;;  %v3232_v45 = vrot.slane %v7507_v9, 4 }
 0x75f   :  { %v2900_v55 = vrot.slane %v2896_v20, 1  ;;  %v3059_v58 = vrot.slane %v2896_v20, 2  ;;  %v3145_v2 = vrot.slane %v2896_v20, 3  ;;  %v3231_v5 = vrot.slane %v2896_v20, 4 }
 0x761   :  { %v2902_v12 = vsel %vm156_vm2, %v2900_v55, %v2901_v22  ;;  %v3061_v17 = vsel %vm384_vm4, %v3059_v58, %v3060_v33  ;;  %v3147_v4 = vsel %vm522_vm0, %v3145_v2, %v3146_v43  ;;  %v7521_v8 = vsel %vm660_vm1, %v3231_v5, %v3232_v45  ;;  %v8130_v55 = vld [vmem:[#allocation93_spill] sm:$0xff]  ;;  %v8131_v58 = vld [vmem:[#allocation94_spill] sm:$0xff]  ;;  %v8132_v2 = vld [vmem:[#allocation95_spill] sm:$0xff] }
 0x762   :  { %2970 = vmatmul.mubr.f32.vlgmr.msra.gmra.mrb[14].mxu1 %v2902_v12  ;;  %v8133_v5 = vld [vmem:[#allocation96_spill] sm:$0xff]  ;;  %v8134_v12 = vld [vmem:[#allocation97_spill] sm:$0xff] }
 0x763   :  { %5533 = vmatpush1.bf16.msra.mxu1 %v6617_v62  ;;  %2975 = vmatprep.mubr.f32.mxu1 %v7919_v30  ;;  %v8102_v62 = vld [vmem:[#allocation65_spill] sm:$0xff] }
 0x764   :  { %5535 = vmatprep.subr.bf16.mxu1 %v6627_v38  ;;  %v8104_v38 = vld [vmem:[#allocation67_spill] sm:$0xff] }
 0x766   :  { %2976 = vmatmul.mubr.f32.gmra.mrb[16].mxu1 %v2901_v22  ;;  %v8128_v22 = vld [vmem:[#allocation91_spill] sm:$0xff] }
 0x767   :  { %5537 = vmatpush1.bf16.msra.mxu1 %v8096_v15  ;;  %3046 = vmatprep.mubr.f32.mxu1 %v7919_v30  ;;  %v8137_v15 = vld [vmem:[#allocation100_spill] sm:$0xff] }
 0x768   :  { %5539 = vmatprep.subr.bf16.mxu1 %v8097_v26  ;;  %v8138_v26 = vld [vmem:[#allocation101_spill] sm:$0xff] }
 0x76b   :  { %5541 = vmatpush1.bf16.msra.mxu1 %v8098_v28  ;;  %v8139_v28 = vld [vmem:[#allocation102_spill] sm:$0xff] }
 0x76c   :  { %5543 = vmatprep.subr.bf16.mxu1 %v8099_v35  ;;  %v8140_v35 = vld [vmem:[#allocation103_spill] sm:$0xff] }
 0x76f   :  { %5545 = vmatpush1.bf16.msra.mxu1 %v8100_v36  ;;  %v8141_v36 = vld [vmem:[#allocation104_spill] sm:$0xff] }
 0x770   :  { %5547 = vmatprep.subr.bf16.mxu1 %v8101_v34  ;;  %v8142_v34 = vld [vmem:[#allocation105_spill] sm:$0xff] }
 0x773   :  { %5549 = vmatpush1.bf16.msra.mxu1 %v8102_v62  ;;  %v8144_v62 = vld [vmem:[#allocation107_spill] sm:$0xff] }
 0x774   :  { %5551 = vmatprep.subr.bf16.mxu1 %v8103_v32  ;;  %v8146_v32 = vld [vmem:[#allocation109_spill] sm:$0xff] }
 0x777   :  { %5553 = vmatpush1.bf16.msra.mxu1 %v8104_v38  ;;  %v8147_v38 = vld [vmem:[#allocation110_spill] sm:$0xff] }
 0x778   :  { %5555 = vmatprep.subr.bf16.mxu1 %v8105_v39  ;;  %v8149_v39 = vld [vmem:[#allocation112_spill] sm:$0xff] }
 0x77b   :  { %5557 = vmatpush1.bf16.msra.mxu1 %v8106_v47  ;;  %v8150_v47 = vld [vmem:[#allocation113_spill] sm:$0xff] }
 0x77c   :  { %5559 = vmatprep.subr.bf16.mxu1 %v6683_v10  ;;  %v8113_v10 = vld [vmem:[#allocation76_spill] sm:$0xff] }
 0x77f   :  { %5561 = vmatpush1.bf16.msra.mxu1 %v8107_v50  ;;  %v8151_v50 = vld [vmem:[#allocation114_spill] sm:$0xff] }
 0x780   :  { %5563 = vmatprep.subr.bf16.mxu1 %v8108_v63  ;;  %v8157_v63 = vld [vmem:[#allocation120_spill] sm:$0xff] }
 0x782   :  { %3047 = vmatmul.mubr.f32.vlgmr.msra.gmra.mrb[14].mxu1 %v2896_v20  ;;  %v8127_v20 = vld [vmem:[#allocation90_spill] sm:$0xff] }
 0x783   :  { %5565 = vmatpush1.bf16.msra.mxu1 %v8109_v1  ;;  %3052 = vmatprep.mubr.f32.mxu1 %v7919_v30 }
 0x784   :  { %5567 = vmatprep.subr.bf16.mxu1 %v8110_v11 }
 0x786   :  { %3053 = vmatmul.mubr.f32.gmra.mrb[16].mxu1 %v7507_v9  ;;  %v8156_v9 = vld [vmem:[#allocation119_spill] sm:$0xff] }
 0x787   :  { %5569 = vmatpush1.bf16.msra.mxu1 %v8111_v13  ;;  %3128 = vmatprep.mubr.f32.mxu1 %v7919_v30  ;;  %v8158_v13 = vld [vmem:[#allocation121_spill] sm:$0xff] }
 0x788   :  { %5571 = vmatprep.subr.bf16.mxu1 %v8112_v24 }
 0x78b   :  { %5573 = vmatpush1.bf16.msra.mxu1 %v8113_v10 }
 0x78c   :  { %5575 = vmatprep.subr.bf16.mxu1 %v8114_v40 }
 0x78f   :  { %5577 = vmatpush1.bf16.msra.mxu1 %v8115_v41 }
 0x790   :  { %5579 = vmatprep.subr.bf16.mxu1 %v8116_v59 }
 0x793   :  { %5581 = vmatpush1.bf16.msra.mxu1 %v8117_v60 }
 0x794   :  { %5583 = vmatprep.subr.bf16.mxu1 %v8118_v16 }
 0x797   :  { %5585 = vmatpush1.bf16.msra.mxu1 %v8119_v18 }
 0x798   :  { %5587 = vmatprep.subr.bf16.mxu1 %v8120_v31 }
 0x79b   :  { %5589 = vmatpush1.bf16.msra.mxu1 %v8121_v53 }
 0x79c   :  { %5591 = vmatprep.subr.bf16.mxu1 %v6735_v37  ;;  %v8129_v37 = vld [vmem:[#allocation92_spill] sm:$0xff] }
 0x79f   :  { %5593 = vmatpush1.bf16.msra.mxu1 %v8122_v42 }
 0x7a0   :  { %5595 = vmatprep.subr.bf16.mxu1 %v8123_v52  ;;  %v8160_v52 = vld [vmem:[#allocation123_spill] sm:$0xff] }
 0x7a2   :  { %3129 = vmatmul.mubr.f32.vlgmr.msra.gmra.mrb[14].mxu1 %v3061_v17  ;;  %v8136_v17 = vld [vmem:[#allocation99_spill] sm:$0xff] }
 0x7a3   :  { %5597 = vmatpush1.bf16.msra.mxu1 %v8124_v61  ;;  %3134 = vmatprep.mubr.f32.mxu1 %v7919_v30  ;;  %v8161_v61 = vld [vmem:[#allocation124_spill] sm:$0xff] }
 0x7a4   :  { %5599 = vmatprep.subr.bf16.mxu1 %v8125_v3  ;;  %v8162_v3 = vld [vmem:[#allocation125_spill] sm:$0xff] }
 0x7a6   :  { %3135 = vmatmul.mubr.f32.gmra.mrb[16].mxu1 %v3060_v33  ;;  %v8135_v33 = vld [vmem:[#allocation98_spill] sm:$0xff] }
 0x7a7   :  { %5601 = vmatpush1.bf16.msra.mxu1 %v8126_v14  ;;  %3214 = vmatprep.mubr.f32.mxu1 %v7919_v30  ;;  %v8163_v14 = vld [vmem:[#allocation126_spill] sm:$0xff] }
 0x7a8   :  { %5603 = vmatprep.subr.bf16.mxu1 %v8127_v20  ;;  %v8164_v20 = vld [vmem:[#allocation127_spill] sm:$0xff] }
 0x7ab   :  { %5605 = vmatpush1.bf16.msra.mxu1 %v8128_v22  ;;  %v8165_v22 = vld [vmem:[#allocation128_spill] sm:$0xff] }
 0x7ac   :  { %5607 = vmatprep.subr.bf16.mxu1 %v8129_v37  ;;  %v8166_v37 = vld [vmem:[#allocation129_spill] sm:$0xff] }
 0x7af   :  { %5609 = vmatpush1.bf16.msra.mxu1 %v8130_v55  ;;  %v8167_v55 = vld [vmem:[#allocation130_spill] sm:$0xff] }
 0x7b0   :  { %5611 = vmatprep.subr.bf16.mxu1 %v8131_v58  ;;  %v8168_v58 = vld [vmem:[#allocation131_spill] sm:$0xff] }
 0x7b3   :  { %5613 = vmatpush1.bf16.msra.mxu1 %v8132_v2  ;;  %v8169_v2 = vld [vmem:[#allocation132_spill] sm:$0xff] }
 0x7b4   :  { %5615 = vmatprep.subr.bf16.mxu1 %v8133_v5 }
 0x7b7   :  { %5617 = vmatpush1.bf16.msra.mxu1 %v8134_v12 }
 0x7b8   :  { %5619 = vmatprep.subr.bf16.mxu1 %v8135_v33 }
 0x7bb   :  { %5621 = vmatpush1.bf16.msra.mxu1 %v8136_v17 }
 0x7bc   :  { %5623 = vmatprep.subr.bf16.mxu1 %v6788_v46  ;;  %v8143_v46 = vld [vmem:[#allocation106_spill] sm:$0xff] }
 0x7bf   :  { %5625 = vmatpush1.bf16.msra.mxu1 %v8137_v15 }
 0x7c0   :  { %5627 = vmatprep.subr.bf16.mxu1 %v8138_v26 }
 0x7c2   :  { %3215 = vmatmul.mubr.f32.vlgmr.msra.gmra.mrb[14].mxu1 %v3147_v4  ;;  %v8145_v4 = vld [vmem:[#allocation108_spill] sm:$0xff] }
 0x7c3   :  { %5629 = vmatpush1.bf16.msra.mxu1 %v8139_v28  ;;  %3220 = vmatprep.mubr.f32.mxu1 %v7919_v30 }
 0x7c4   :  { %5631 = vmatprep.subr.bf16.mxu1 %v8140_v35  ;;  %v8170_v35 = vld [vmem:[#allocation133_spill] sm:$0xff] }
 0x7c6   :  { %3221 = vmatmul.mubr.f32.gmra.mrb[16].mxu1 %v3146_v43  ;;  %v8148_v43 = vld [vmem:[#allocation111_spill] sm:$0xff] }
 0x7c7   :  { %5633 = vmatpush1.bf16.msra.mxu1 %v8141_v36  ;;  %3300 = vmatprep.mubr.f32.mxu1 %v7919_v30  ;;  %v8173_v36 = vld [vmem:[#allocation136_spill] sm:$0xff] }
 0x7c8   :  { %5635 = vmatprep.subr.bf16.mxu1 %v8142_v34  ;;  %v8174_v34 = vld [vmem:[#allocation137_spill] sm:$0xff] }
 0x7cb   :  { %5637 = vmatpush1.bf16.msra.mxu1 %v8143_v46  ;;  %v8176_v46 = vld [vmem:[#allocation139_spill] sm:$0xff] }
 0x7cc   :  { %5639 = vmatprep.subr.bf16.mxu1 %v8144_v62  ;;  %v8177_v62 = vld [vmem:[#allocation140_spill] sm:$0xff] }
 0x7cf   :  { %5641 = vmatpush1.bf16.msra.mxu1 %v8145_v4  ;;  %v8178_v4 = vld [vmem:[#allocation141_spill] sm:$0xff] }
 0x7d0   :  { %5643 = vmatprep.subr.bf16.mxu1 %v8146_v32  ;;  %v8179_v32 = vld [vmem:[#allocation142_spill] sm:$0xff] }
 0x7d3   :  { %5645 = vmatpush1.bf16.msra.mxu1 %v8147_v38  ;;  %v8180_v38 = vld [vmem:[#allocation143_spill] sm:$0xff] }
 0x7d4   :  { %5647 = vmatprep.subr.bf16.mxu1 %v6829_v25  ;;  %v8152_v25 = vld [vmem:[#allocation115_spill] sm:$0xff] }
 0x7d7   :  { %5649 = vmatpush1.bf16.msra.mxu1 %v6832_v7  ;;  %v8153_v7 = vld [vmem:[#allocation116_spill] sm:$0xff] }
 0x7d8   :  { %5651 = vmatprep.subr.bf16.mxu1 %v6835_v19  ;;  %v8154_v19 = vld [vmem:[#allocation117_spill] sm:$0xff] }
 0x7db   :  { %5653 = vmatpush1.bf16.msra.mxu1 %v8148_v43 }
 0x7dc   :  { %5655 = vmatprep.subr.bf16.mxu1 %v8149_v39  ;;  %v8181_v39 = vld [vmem:[#allocation144_spill] sm:$0xff] }
 0x7df   :  { %5657 = vmatpush1.bf16.msra.mxu1 %v8150_v47  ;;  %v8184_v47 = vld [vmem:[#allocation147_spill] sm:$0xff] }
 0x7e0   :  { %5714 = vmatprep.subr.bf16.mxu1 %v8027_v51 }
 0x7e2   :  { %3301 = vmatmul.mubr.f32.vlgmr.msra.gmra.mrb[14].mxu1 %v7521_v8  ;;  %v8155_v8 = vld [vmem:[#allocation118_spill] sm:$0xff] }
 0x7e3   :  { %3306 = vmatprep.mubr.f32.mxu1 %v7919_v30  ;;  %5716 = vmatpush3.bf16.msra.mxu1 %v8151_v50  ;;  %v3849_v50 = vld [vmem:[#allocation6] sm:$0xff] }
 0x7e4   :  { %5717 = vmatprep.subr.bf16.mxu1 %v8027_v51 }
 0x7e6   :  { %3307 = vmatmul.mubr.f32.gmra.mrb[16].mxu1 %v3232_v45 }
 0x7e7   :  { %5719 = vmatpush3.bf16.msra.mxu1 %v8152_v25  ;;  %4787 = vmatprep.mubr.msk.f32.mxu1 %vm6082_vm8, %v7919_v30  ;;  %v3850_v25 = vld [vmem:[#allocation6 + $0x8] sm:$0xff] }
 0x7e8   :  { %5720 = vmatprep.subr.bf16.mxu1 %v8027_v51 }
 0x7eb   :  { %5722 = vmatpush3.bf16.msra.mxu1 %v8153_v7  ;;  %v3851_v7 = vld [vmem:[#allocation6 + $0x10] sm:$0xff] }
 0x7ec   :  { %5723 = vmatprep.subr.bf16.mxu1 %v8027_v51 }
 0x7ef   :  { %5725 = vmatpush3.bf16.msra.mxu1 %v8154_v19  ;;  %v5787_v19 = vpack.c.bf16 %v3850_v25, %v3849_v50  ;;  %v3981_v50 = vld [vmem:[#allocation7 + $0x48] sm:$0xff] }
 0x7f0   :  { %5726 = vmatprep.subr.bf16.mxu1 %v8027_v51 }
 0x7f3   :  { %5728 = vmatpush3.bf16.msra.mxu1 %v8155_v8 }
 0x7f4   :  { %5729 = vmatprep.subr.bf16.mxu1 %v8027_v51 }
 0x7f7   :  { %5731 = vmatpush3.bf16.msra.mxu1 %v8156_v9  ;;  %v3854_v9 = vld [vmem:[#allocation6 + $0x28] sm:$0xff] }
 0x7f8   :  { %5732 = vmatprep.subr.bf16.mxu1 %v8027_v51 }
 0x7fb   :  { %5734 = vmatpush3.bf16.msra.mxu1 %v7027_v44 }
 0x7fc   :  { %5735 = vmatprep.subr.bf16.mxu1 %v8027_v51 }
 0x7ff   :  { %5737 = vmatpush3.bf16.msra.mxu1 %v7047_v21 }
 0x800   :  { %5762 = vmatprep.subr.bf16.mxu1 %v8027_v51 }
 0x8b5   :  { %v3302_v45 = vpop.f32.mrb[14].mxu1 }
 0x8b6   :  { %v3317_v1 = vadd.f32 %v3302_v45, %v8157_v63  ;;  %v3304_v11 = vpop.f32.mrb[15].mxu1  ;;  %v3855_v45 = vld [vmem:[#allocation6 + $0x30] sm:$0xff] }
 0x8b7   :  { %v3318_v24 = vadd.f32 %v3304_v11, %v8158_v13  ;;  %v3858_v11 = vld [vmem:[#allocation6 + $0x48] sm:$0xff] }
 0x8b8   :  { %v3321_v10 = vmax.f32 %v3317_v1, 0.0 }
 0x8b9   :  { %v3322_v40 = vmax.f32 %v3318_v24, 0.0  ;;  %v3308_v41 = vpop.f32.mrb[16].mxu1  ;;  %v3859_v24 = vld [vmem:[#allocation6 + $0x50] sm:$0xff] }
 0x8ba   :  { %v3319_v59 = vadd.f32 %v3308_v41, %v8157_v63  ;;  %v3310_v60 = vpop.f32.mrb[17].mxu1  ;;  %v3856_v63 = vld [vmem:[#allocation6 + $0x38] sm:$0xff]  ;;  %v3861_v41 = vld [vmem:[#allocation6 + $0x60] sm:$0xff] }
 0x8bb   :  { %v3325_v16 = vmax.f32 %v3321_v10, %v3322_v40  ;;  %v3320_v44 = vadd.f32 %v3310_v60, %v8158_v13  ;;  %v5796_v1 = vpack.c.bf16 %v3856_v63, %v3855_v45  ;;  %v3860_v10 = vld [vmem:[#allocation6 + $0x58] sm:$0xff] }
 0x8bc   :  { %v3323_v18 = vmax.f32 %v3319_v59, 0.0  ;;  %v5802_v40 = vpack.c.bf16 %v3860_v10, %v3859_v24  ;;  %v3862_v59 = vld [vmem:[#allocation6 + $0x68] sm:$0xff]  ;;  %v3987_v45 = vld [vmem:[#allocation7 + $0x78] sm:$0xff] }
 0x8bd   :  { %v3324_v31 = vmax.f32 %v3320_v44, 0.0  ;;  %v5805_v60 = vpack.c.bf16 %v3862_v59, %v3861_v41  ;;  %v3864_v44 = vld [vmem:[#allocation6 + $0x78] sm:$0xff] }
 0x8bf   :  { %v3326_v21 = vmax.f32 %v3323_v18, %v3324_v31 }
 0x8c1   :  { %v5659_v53 = vpack.c.bf16 %v3326_v21, %v3325_v16  ;;  %v3863_v16 = vld [vmem:[#allocation6 + $0x70] sm:$0xff] }
 0x8c2   :  { %v5808_v18 = vpack.c.bf16 %v3864_v44, %v3863_v16 }
 0x8c3   :  { %5661 = vmatpush3.bf16.msk.msra.mxu0 %vm6931_vm10, %v5659_v53 }
 0x8c4   :  { %5662 = vmatprep.subr.bf16.mxu0 %v8027_v51 }
 0x8c6   :  { %4676 = vmatmul.mubr.msk.f32.vlgmr.msra.gmra.mrb[28].mxu0 %vm1574_vm11, %v8160_v52 }
 0x8c7   :  { %5665 = vmatpush3.bf16.msk.msra.mxu0 %vm6931_vm10, %v5659_v53  ;;  %4682 = vmatprep.mubr.msk.f32.mxu0 %vm6082_vm8, %v7919_v30 }
 0x8c8   :  { %5666 = vmatprep.subr.bf16.mxu0 %v8027_v51 }
 0x8ca   :  { %4683 = vmatmul.mubr.msk.f32.vlgmr.msra.gmra.mrb[30].mxu0 %vm1574_vm11, %v8161_v61 }
 0x8cb   :  { %5668 = vmatpush3.bf16.msra.mxu0 %v8162_v3  ;;  %4717 = vmatprep.mubr.msk.f32.mxu0 %vm6082_vm8, %v7919_v30 }
 0x8cc   :  { %5669 = vmatprep.subr.bf16.mxu0 %v8027_v51 }
 0x8cf   :  { %5671 = vmatpush3.bf16.msra.mxu0 %v8163_v14 }
 0x8d0   :  { %5672 = vmatprep.subr.bf16.mxu0 %v8027_v51 }
 0x8d3   :  { %5674 = vmatpush3.bf16.msra.mxu0 %v8164_v20 }
 0x8d4   :  { %5675 = vmatprep.subr.bf16.mxu0 %v8027_v51 }
 0x8d7   :  { %5677 = vmatpush3.bf16.msra.mxu0 %v8165_v22 }
 0x8d8   :  { %5678 = vmatprep.subr.bf16.mxu0 %v8027_v51 }
 0x8db   :  { %5680 = vmatpush3.bf16.msra.mxu0 %v8166_v37  ;;  %v7719_v37 = vld [vmem:[#allocation9] sm:$0xff] }
 0x8dc   :  { %5681 = vmatprep.subr.bf16.mxu0 %v8027_v51 }
 0x8df   :  { %5683 = vmatpush3.bf16.msra.mxu0 %v8167_v55  ;;  %v2173_v55 = vrot.slane %v7719_v37, 2 }
 0x8e0   :  { %5684 = vmatprep.subr.bf16.mxu0 %v8027_v51 }
 0x8e3   :  { %5686 = vmatpush3.bf16.msra.mxu0 %v8168_v58  ;;  %v2175_v58 = vadd.f32 %v2173_v55, %v7463_v27  ;;  %v3973_v27 = vld [vmem:[#allocation7 + $0x8] sm:$0xff] }
 0x8e4   :  { %5687 = vmatprep.subr.bf16.mxu0 %v8027_v51 }
 0x8e7   :  { %5689 = vmatpush3.bf16.msra.mxu0 %v8169_v2 }
 0x8e8   :  { %5690 = vmatprep.subr.bf16.mxu0 %v8027_v51 }
 0x999   :  { %v3396_v5 = vpop.f32.mrb[28].mxu0 }
 0x99a   :  { %v4677_v12 = vpop.f32.mrb[29].mxu0 }
 0x99d   :  { %v3466_v33 = vpop.f32.mrb[30].mxu0 }
 0x99e   :  { %v3470_v17 = vmax.f32 %v3396_v5, %v3466_v33  ;;  %v4684_v15 = vpop.f32.mrb[31].mxu0  ;;  %v2176_v33 = vmax.f32 %v2175_v58, 0.0 }
 0x9a0   :  { %v3472_v26 = vrot.slane %v3470_v17, 1  ;;  %v3614_v28 = vrot.slane %v3470_v17, 2  ;;  %v3760_v43 = vrot.slane %v3470_v17, 4 }
 0x9a2   :  { %4718 = vmatmul.mubr.f32.vlgmr.msra.gmra.mrb[32].mxu0 %v3472_v26  ;;  %4788 = vmatmul.mubr.f32.vlgmr.msra.gmra.mrb[18].mxu1 %v3614_v28  ;;  %v8185_v26 = vld [vmem:[#allocation39_spill] sm:$0xff] }
 0x9a3   :  { %5692 = vmatpush3.bf16.msra.mxu0 %v7067_v54  ;;  %5764 = vmatpush3.bf16.msra.mxu1 %v7069_v49  ;;  %v8171_v54 = vld [vmem:[#allocation134_spill] sm:$0xff]  ;;  %v8172_v49 = vld [vmem:[#allocation135_spill] sm:$0xff]  ;;  %v3841_v28 = vrot.slane %v2176_v33, %v8185_v26 }
 0x9a4   :  { %5693 = vmatprep.subr.bf16.mxu0 %v8027_v51  ;;  %5765 = vmatprep.subr.bf16.mxu1 %v8027_v51 }
 0x9a5   :  { %4752 = vmatprep.mubr.msk.f32.mxu0 %vm6082_vm8, %v7919_v30  ;;  %4857 = vmatprep.mubr.msk.f32.mxu1 %vm6082_vm8, %v7919_v30 }
 0x9a7   :  { %5695 = vmatpush3.bf16.msra.mxu0 %v7087_v23  ;;  %5767 = vmatpush3.bf16.msra.mxu1 %v8170_v35  ;;  %v8175_v23 = vld [vmem:[#allocation138_spill] sm:$0xff] }
 0x9a8   :  { %5696 = vmatprep.subr.bf16.mxu0 %v8027_v51  ;;  %5768 = vmatprep.subr.bf16.mxu1 %v8027_v51 }
 0x9ab   :  { %5698 = vmatpush3.bf16.msra.mxu0 %v8171_v54  ;;  %5770 = vmatpush3.bf16.msra.mxu1 %v8172_v49  ;;  %v8186_v54 = vld [vmem:[#allocation38_spill] sm:$0xff] }
 0x9ac   :  { %5699 = vmatprep.subr.bf16.mxu0 %v8027_v51  ;;  %5771 = vmatprep.subr.bf16.mxu1 %v8027_v51  ;;  %vm3837_vm12 = vcmp.eq.s32.totalorder %v8186_v54, 0  ;;  %vm3843_vm13 = vcmp.eq.s32.totalorder %v8186_v54, 1  ;;  %v3968_v58 = vsub.s32 5, %v8186_v54 }
 0x9ae   :  { %v3969_v33 = vrot.slane %v7719_v37, %v3968_v58 }
 0x9af   :  { %5701 = vmatpush3.bf16.msra.mxu0 %v8173_v36  ;;  %5773 = vmatpush3.bf16.msra.mxu1 %v8174_v34  ;;  %v3842_v36 = vsel %vm3837_vm12, %v3841_v28, 0.0  ;;  %v3990_v28 = vsub.s32 6, %v8186_v54 }
 0x9b0   :  { %5702 = vmatprep.subr.bf16.mxu0 %v8027_v51  ;;  %5774 = vmatprep.subr.bf16.mxu1 %v8027_v51 }
 0x9b3   :  { %5704 = vmatpush3.bf16.msra.mxu0 %v8175_v23  ;;  %5776 = vmatpush3.bf16.msra.mxu1 %v8176_v46  ;;  %v3972_v23 = vld [vmem:[#allocation7] sm:$0xff] }
 0x9b4   :  { %5705 = vmatprep.subr.bf16.mxu0 %v8027_v51  ;;  %5777 = vmatprep.subr.bf16.mxu1 %v8027_v51  ;;  %v5811_v46 = vpack.c.bf16 %v3973_v27, %v3972_v23 }
 0x9b7   :  { %5707 = vmatpush3.bf16.msra.mxu0 %v8177_v62  ;;  %5779 = vmatpush3.bf16.msra.mxu1 %v8178_v4  ;;  %v3974_v62 = vld [vmem:[#allocation7 + $0x10] sm:$0xff]  ;;  %v3975_v4 = vld [vmem:[#allocation7 + $0x18] sm:$0xff] }
 0x9b8   :  { %5708 = vmatprep.subr.bf16.mxu0 %v8027_v51  ;;  %5780 = vmatprep.subr.bf16.mxu1 %v8027_v51 }
 0x9bb   :  { %5710 = vmatpush3.bf16.msra.mxu0 %v7191_v56  ;;  %5782 = vmatpush3.bf16.msra.mxu1 %v7193_v6  ;;  %v8182_v56 = vld [vmem:[#allocation145_spill] sm:$0xff]  ;;  %v8183_v6 = vld [vmem:[#allocation146_spill] sm:$0xff] }
 0x9bc   :  { %5711 = vmatprep.subr.bf16.mxu0 %v8027_v51  ;;  %5783 = vmatprep.subr.bf16.mxu1 %v8027_v51 }
 0x9bf   :  { %5713 = vmatpush3.bf16.msra.mxu0 %v8179_v32  ;;  %5785 = vmatpush3.bf16.msra.mxu1 %v8180_v38  ;;  %v5814_v32 = vpack.c.bf16 %v3975_v4, %v3974_v62  ;;  %v3976_v38 = vld [vmem:[#allocation7 + $0x20] sm:$0xff] }
 0x9c0   :  { %5738 = vmatprep.subr.bf16.mxu0 %v8027_v51  ;;  %5810 = vmatprep.subr.bf16.mxu1 %v8027_v51 }
 0x9c2   :  { %4753 = vmatmul.mubr.f32.vlgmr.msra.gmra.mrb[34].mxu0 %v3470_v17  ;;  %4858 = vmatmul.mubr.f32.vlgmr.msra.gmra.mrb[20].mxu1 %v3760_v43  ;;  %v3977_v43 = vld [vmem:[#allocation7 + $0x28] sm:$0xff] }
 0x9c3   :  { %5740 = vmatpush3.bf16.msra.mxu0 %v8181_v39  ;;  %4822 = vmatprep.mubr.msk.f32.mxu0 %vm6082_vm8, %v7919_v30  ;;  %v5817_v39 = vpack.c.bf16 %v3977_v43, %v3976_v38 }
 0x9c4   :  { %5741 = vmatprep.subr.bf16.mxu0 %v8027_v51  ;;  %4927 = vmatprep.mubr.msk.f32.mxu1 %vm6082_vm8, %v7919_v30 }
 0x9c5   :  { %5812 = vmatpush3.bf16.msra.mxu1 %v5811_v46 }
 0x9c6   :  { %5813 = vmatprep.subr.bf16.mxu1 %v8027_v51 }
 0x9c7   :  { %5743 = vmatpush3.bf16.msra.mxu0 %v7237_v0  ;;  %v3687_v0 = vrot.slane %v3470_v17, 3 }
 0x9c8   :  { %5744 = vmatprep.subr.bf16.mxu0 %v8027_v51 }
 0x9c9   :  { %5815 = vmatpush3.bf16.msra.mxu1 %v5814_v32 }
 0x9ca   :  { %5816 = vmatprep.subr.bf16.mxu1 %v8027_v51 }
 0x9cb   :  { %5746 = vmatpush3.bf16.msra.mxu0 %v8182_v56  ;;  %v3978_v56 = vld [vmem:[#allocation7 + $0x30] sm:$0xff] }
 0x9cc   :  { %5747 = vmatprep.subr.bf16.mxu0 %v8027_v51 }
 0x9cd   :  { %5818 = vmatpush3.bf16.msra.mxu1 %v5817_v39 }
 0x9ce   :  { %5819 = vmatprep.subr.bf16.mxu1 %v8027_v51 }
 0x9cf   :  { %5749 = vmatpush3.bf16.msra.mxu0 %v8183_v6  ;;  %v3979_v6 = vld [vmem:[#allocation7 + $0x38] sm:$0xff] }
 0x9d0   :  { %5750 = vmatprep.subr.bf16.mxu0 %v8027_v51 }
 0x9d3   :  { %5752 = vmatpush3.bf16.msra.mxu0 %v8184_v47  ;;  %v5820_v47 = vpack.c.bf16 %v3979_v6, %v3978_v56 }
 0x9d4   :  { %5753 = vmatprep.subr.bf16.mxu0 %v8027_v51 }
 0x9d5   :  { %5821 = vmatpush3.bf16.msra.mxu1 %v5820_v47 }
 0x9d6   :  { %5822 = vmatprep.subr.bf16.mxu1 %v8027_v51 }
 0x9d7   :  { %5755 = vmatpush3.bf16.msra.mxu0 %v7283_v57  ;;  %v3852_v57 = vld [vmem:[#allocation6 + $0x18] sm:$0xff] }
 0x9d8   :  { %5756 = vmatprep.subr.bf16.mxu0 %v8027_v51  ;;  %v5790_v8 = vpack.c.bf16 %v3852_v57, %v3851_v7  ;;  %v3982_v7 = vld [vmem:[#allocation7 + $0x50] sm:$0xff] }
 0x9db   :  { %5758 = vmatpush3.bf16.msra.mxu0 %v7293_v29  ;;  %v3853_v29 = vld [vmem:[#allocation6 + $0x20] sm:$0xff] }
 0x9dc   :  { %5759 = vmatprep.subr.bf16.mxu0 %v8027_v51 }
 0x9df   :  { %5761 = vmatpush3.bf16.msra.mxu0 %v7303_v48  ;;  %v5793_v48 = vpack.c.bf16 %v3854_v9, %v3853_v29  ;;  %v3985_v29 = vld [vmem:[#allocation7 + $0x68] sm:$0xff] }
 0x9e0   :  { %5786 = vmatprep.subr.bf16.mxu0 %v8027_v51 }
 0x9e2   :  { %4823 = vmatmul.mubr.f32.vlgmr.msra.gmra.mrb[36].mxu0 %v3687_v0  ;;  %v3980_v0 = vld [vmem:[#allocation7 + $0x40] sm:$0xff] }
 0x9e3   :  { %4892 = vmatprep.mubr.msk.f32.mxu0 %vm6082_vm8, %v7919_v30  ;;  %5788 = vmatpush3.bf16.msra.mxu0 %v5787_v19  ;;  %v3857_v30 = vld [vmem:[#allocation6 + $0x40] sm:$0xff]  ;;  %v5823_v25 = vpack.c.bf16 %v3981_v50, %v3980_v0  ;;  %v3983_v19 = vld [vmem:[#allocation7 + $0x58] sm:$0xff] }
 0x9e4   :  { %5789 = vmatprep.subr.bf16.mxu0 %v8027_v51  ;;  %v5799_v13 = vpack.c.bf16 %v3858_v11, %v3857_v30  ;;  %v5826_v57 = vpack.c.bf16 %v3983_v19, %v3982_v7 }
 0x9e5   :  { %5824 = vmatpush3.bf16.msra.mxu1 %v5823_v25 }
 0x9e6   :  { %5825 = vmatprep.subr.bf16.mxu1 %v8027_v51 }
 0x9e7   :  { %5791 = vmatpush3.bf16.msra.mxu0 %v5790_v8  ;;  %v3984_v8 = vld [vmem:[#allocation7 + $0x60] sm:$0xff] }
 0x9e8   :  { %5792 = vmatprep.subr.bf16.mxu0 %v8027_v51  ;;  %v5829_v9 = vpack.c.bf16 %v3985_v29, %v3984_v8 }
 0x9e9   :  { %5827 = vmatpush3.bf16.msra.mxu1 %v5826_v57 }
 0x9ea   :  { %5828 = vmatprep.subr.bf16.mxu1 %v8027_v51 }
 0x9eb   :  { %5794 = vmatpush3.bf16.msra.mxu0 %v5793_v48  ;;  %v3986_v48 = vld [vmem:[#allocation7 + $0x70] sm:$0xff] }
 0x9ec   :  { %5795 = vmatprep.subr.bf16.mxu0 %v8027_v51  ;;  %v5832_v63 = vpack.c.bf16 %v3987_v45, %v3986_v48 }
 0x9ed   :  { %5830 = vmatpush3.bf16.msra.mxu1 %v5829_v9 }
 0x9ee   :  { %5831 = vmatprep.subr.bf16.mxu1 %v8027_v51 }
 0x9ef   :  { %5797 = vmatpush3.bf16.msra.mxu0 %v5796_v1  ;;  %v3867_v1 = vsub.s32 3, %v8186_v54 }
 0x9f0   :  { %5798 = vmatprep.subr.bf16.mxu0 %v8027_v51 }
 0x9f1   :  { %5833 = vmatpush3.bf16.msra.mxu1 %v5832_v63  ;;  %v3868_v30 = vrot.slane %v7719_v37, %v3867_v1 }
 0x9f3   :  { %5800 = vmatpush3.bf16.msra.mxu0 %v5799_v13 }
 0x9f4   :  { %5801 = vmatprep.subr.bf16.mxu0 %v8027_v51 }
 0x9f7   :  { %5803 = vmatpush3.bf16.msra.mxu0 %v5802_v40 }
 0x9f8   :  { %5804 = vmatprep.subr.bf16.mxu0 %v8027_v51 }
 0x9fb   :  { %5806 = vmatpush3.bf16.msra.mxu0 %v5805_v60 }
 0x9fc   :  { %5807 = vmatprep.subr.bf16.mxu0 %v8027_v51 }
 0x9ff   :  { %5809 = vmatpush3.bf16.msra.mxu0 %v5808_v18 }
 0xa75   :  { %v3540_v31 = vpop.f32.mrb[32].mxu0  ;;  %v3682_v21 = vpop.f32.mrb[18].mxu1 }
 0xa76   :  { %v4719_v53 = vpop.f32.mrb[33].mxu0  ;;  %v4789_v42 = vpop.f32.mrb[19].mxu1 }
 0xa95   :  { %v3610_v52 = vpop.f32.mrb[34].mxu0  ;;  %v3828_v61 = vpop.f32.mrb[20].mxu1 }
 0xa96   :  { %v3611_v3 = vadd.f32 %v3610_v52, %v3540_v31  ;;  %v4754_v14 = vpop.f32.mrb[35].mxu0  ;;  %v4859_v20 = vpop.f32.mrb[21].mxu1 }
 0xa98   :  { %v3686_v22 = vadd.f32 %v3682_v21, %v3611_v3 }
 0xab5   :  { %v3755_v2 = vpop.f32.mrb[36].mxu0 }
 0xab6   :  { %v3759_v5 = vadd.f32 %v3755_v2, %v3686_v22  ;;  %v4824_v12 = vpop.f32.mrb[37].mxu0 }
 0xab8   :  { %v3832_v17 = vadd.f32 %v3828_v61, %v3759_v5 }
 0xaba   :  { %v3833_v15 = vadd.f32 %v3832_v17, %v2173_v55  ;;  %v3963_v55 = vsub.s32 4, %v8186_v54 }
 0xabc   :  { %v3834_v35 = vmax.f32 %v3833_v15, 0.0  ;;  %v3964_v2 = vrot.slane %v7719_v37, %v3963_v55 }
 0xabe   :  { %v3847_v49 = vrot.slane %v3834_v35, %v8185_v26  ;;  %v3991_v35 = vrot.slane %v7719_v37, %v3990_v28 }
 0xac0   :  { %v3848_v34 = vsel %vm3843_vm13, %v3847_v49, %v3842_v36 }
 0xac1   :  { %4893 = vmatmul.mubr.f32.vlgmr.msra.gmra.mrb[38].mxu0 %v3848_v34 }
 0xb94   :  { %v3935_v11 = vpop.f32.mrb[38].mxu0 }
 0xb95   :  { %v3936_v13 = vadd.f32 %v3935_v11, %v3868_v30  ;;  %v4894_v24 = vpop.f32.mrb[39].mxu0 }
 0xb97   :  { %v3939_v10 = vsel %vm1577_vm9, %v3936_v13, 0.0 }
 0xb98   :  { %v3940_v40 = vrot.slane %v3939_v10, 4 }
 0xb9a   :  { %v3941_v41 = vadd.f32 %v3940_v40, %v3939_v10 }
 0xb9c   :  { %v3942_v59 = vrot.slane %v3941_v41, 2 }
 0xb9e   :  { %v3943_v60 = vadd.f32 %v3942_v59, %v3941_v41 }
 0xba0   :  { %v3944_v16 = vrot.slane %v3943_v60, 1 }
 0xba2   :  { %v3945_v44 = vadd.f32 %v3944_v16, %v3943_v60 }
 0xba4   :  { %v3947_v51 = vmul.f32 0.5, %v3945_v44 }
 0xba6   :  { %v3948_v18 = vsub.f32 %v3936_v13, %v3947_v51 }
 0xba8   :  { %v3949_v31 = vmul.f32 %v3948_v18, %v3948_v18 }
 0xbaa   :  { %v3950_v21 = vsel %vm1577_vm9, %v3949_v31, 0.0 }
 0xbab   :  { %v3951_v53 = vrot.slane %v3950_v21, 4 }
 0xbad   :  { %v3952_v42 = vadd.f32 %v3951_v53, %v3950_v21 }
 0xbaf   :  { %v3953_v52 = vrot.slane %v3952_v42, 2 }
 0xbb1   :  { %v3954_v61 = vadd.f32 %v3953_v52, %v3952_v42 }
 0xbb3   :  { %v3955_v3 = vrot.slane %v3954_v61, 1 }
 0xbb5   :  { %v3956_v14 = vadd.f32 %v3955_v3, %v3954_v61 }
 0xbb7   :  { %v3957_v20 = vmul.f32 0.5, %v3956_v14 }
 0xbb9   :  { %v3958_v22 = vadd.f32 1e-05, %v3957_v20 }
 0xbbb   :  { %5946 = vrsqrt.f32 %v3958_v22 }
 0xbc5   :  { %v5947_v5 = vpop.eup %5946 }
 0xbc6   :  { %v3960_v12 = vmul.f32 %v5947_v5, %v3948_v18 }
 0xbc8   :  { %v3965_v17 = vmul.f32 %v3964_v2, %v3960_v12 }
 0xbca   :  { %v3970_v15 = vadd.f32 %v3969_v33, %v3965_v17 }
 0xbcc   :  { %v3971_v26 = vmax.f32 %v3970_v15, 0.0 }
 0xbce   :  { %4928 = vmatmul.mubr.f32.vlgmr.msra.gmra.mrb[22].mxu1 %v3971_v26 }
 0xca1   :  { %v4058_v49 = vpop.f32.mrb[22].mxu1 }
 0xca2   :  { %v4059_v36 = vadd.f32 %v4058_v49, %v3991_v35  ;;  %v4929_v34 = vpop.f32.mrb[23].mxu1 }
 0xca4   :  { %4062 = vst [vmem:[%s7755_s8] sm:$0xff] %v4059_v36 }
 0xca5   :  { %4067 = vsyncpa [#allocation3], 1 }
 0xca6   :  { %4068 = vsyncpa [#allocation5], 1 }
 0xca7   :  { %4069 = vsyncpa [#allocation8], 1 }

</bundles_post_ra>
